<compile_context>
chip_gen: v7x
topology: tpu7x:2x2x1
jax: 0.10.0
libtpu: 0.0.40
codegen_flags: <defaults>
</compile_context>

<pallas_src>
import jax
import jax.numpy as jnp
from jax.experimental import pallas as pl
from jax.experimental.pallas import tpu as pltpu

LN_EPS = 1e-5      # nn.LayerNorm default eps
NORM_EPS = 1e-12   # F.normalize default eps
LANES = 128


def _round_up(n, m):
    return ((n + m - 1) // m) * m


def _num_tensorcores():
    """2 TensorCores per chip on v7x, 1 on v5e/v6e (best-effort detection)."""
    try:
        kind = (jax.devices()[0].device_kind or "").lower()
    except Exception:
        return 1
    return 2 if "v7" in kind else 1


def _choose_tiles(batch, n_cores, tile_cap=1024):
    """Pick (tile_m, grid, padded_batch). grid is a multiple of n_cores."""
    per_core = _round_up(max(batch, 1), 8 * n_cores) // n_cores
    steps = max(1, -(-per_core // tile_cap))
    tile_m = _round_up(-(-per_core // steps), 8)
    grid = n_cores * steps
    return tile_m, grid, tile_m * grid


def _make_kernel(hidden_sizes, out_pad):
    """Fused kernel for one batch tile. Inputs: x, packed small params, weights."""
    h = tuple(hidden_sizes)
    n_h = len(h)

    def kernel(x_ref, small_ref, *rest):
        w_refs = rest[:-1]          # n_h + 1 weight matrices (bf16)
        out_ref = rest[-1]
        cdt = w_refs[0].dtype       # bfloat16

        act = x_ref[...].astype(cdt)
        for i in range(n_h):
            w = h[i]
            y = jnp.dot(act, w_refs[i][...], preferred_element_type=jnp.float32)
            y = y + small_ref[3 * i:3 * i + 1, :w]            # bias
            gamma = small_ref[3 * i + 1:3 * i + 2, :w]
            beta = small_ref[3 * i + 2:3 * i + 3, :w]
            mean = jnp.mean(y, axis=-1, keepdims=True)
            c = y - mean
            var = jnp.mean(c * c, axis=-1, keepdims=True)
            y = c * jax.lax.rsqrt(var + LN_EPS) * gamma + beta  # LayerNorm
            act = jnp.maximum(y, 0.0).astype(cdt)               # ReLU

        out = jnp.dot(act, w_refs[n_h][...], preferred_element_type=jnp.float32)
        out = out + small_ref[3 * n_h:3 * n_h + 1, :out_pad]

        # F.normalize(out, dim=-1) == out / max(||out||, eps)
        #                          == out * rsqrt(max(sum(out^2), eps^2)).
        # Padded latent columns of w/b are exactly zero -> norm unchanged.
        sq = jnp.sum(out * out, axis=-1, keepdims=True)
        inv = jax.lax.rsqrt(jnp.maximum(sq, NORM_EPS * NORM_EPS))
        out_ref[...] = (out * inv).astype(out_ref.dtype)

    return kernel


def _prepare_params(params, hidden_sizes):
    """One-time prep: bf16 casts, lane padding, packing of small vectors."""
    h = list(hidden_sizes)
    n_h = len(h)
    in_size = params["w0"].shape[0]
    out_size = params[f"w{n_h}"].shape[1]
    in_pad = _round_up(in_size, LANES)
    out_pad = _round_up(out_size, LANES)
    dims = [in_pad] + h + [out_pad]

    def pad2(w, rows, cols):
        return jnp.pad(jnp.asarray(w, jnp.float32),
                       ((0, rows - w.shape[0]), (0, cols - w.shape[1])))

    weights = []
    for i in range(n_h + 1):
        w = params[f"w{i}"]
        weights.append(pad2(w, dims[i], dims[i + 1]).astype(jnp.bfloat16))

    max_w = max(dims[1:])
    rows = []

    def vec(v):
        v = jnp.asarray(v, jnp.float32).reshape(-1)
        return jnp.pad(v, (0, max_w - v.shape[0]))

    for i in range(n_h):
        rows += [vec(params[f"b{i}"]), vec(params[f"g{i}"]), vec(params[f"beta{i}"])]
    b_last = jnp.asarray(params[f"b{n_h}"], jnp.float32).reshape(-1)
    rows.append(jnp.pad(b_last, (0, max_w - b_last.shape[0])))  # already <= max_w

    small = jnp.stack(rows)
    small = jnp.pad(small, ((0, _round_up(small.shape[0], 8) - small.shape[0]), (0, 0)))

    return tuple(weights), small, in_pad, out_pad, out_size, tuple(dims)


def make_network_forward(params, hidden_sizes, *, n_cores=None, tile_cap=1024):
    """Returns a jit-compiled forward(x) with all parameter prep hoisted out."""
    weights, small, in_pad, out_pad, out_size, dims = _prepare_params(params, hidden_sizes)
    h = tuple(hidden_sizes)
    nc = n_cores if n_cores is not None else _num_tensorcores()
    kernel = _make_kernel(h, out_pad)
    w_shapes = list(zip(dims[:-1], dims[1:]))

    @jax.jit
    def fwd(x, small_arr, *w_arrs):
        B, in_size = x.shape
        tile_m, grid, b_padded = _choose_tiles(B, nc, tile_cap)

        xp = jnp.pad(x.astype(jnp.bfloat16),
                     ((0, b_padded - B), (0, in_pad - in_size)))

        in_specs = [pl.BlockSpec((tile_m, in_pad), lambda i: (i, 0)),
                    pl.BlockSpec(small_arr.shape, lambda i: (0, 0))]
        in_specs += [pl.BlockSpec(ws, lambda i: (0, 0)) for ws in w_shapes]
        out_spec = pl.BlockSpec((tile_m, out_pad), lambda i: (i, 0))

        flops = 2 * b_padded * sum(a * b for a, b in w_shapes)
        bytes_accessed = (xp.size * 2 + sum(w.size for w in w_arrs) * 2
                          + small_arr.size * 4 + b_padded * out_pad * 4)

        out = pl.pallas_call(
            kernel,
            out_shape=jax.ShapeDtypeStruct((b_padded, out_pad), jnp.float32),
            grid_spec=pltpu.PrefetchScalarGridSpec(
                num_scalar_prefetch=0,
                grid=(grid,),
                in_specs=in_specs,
                out_specs=out_spec,
            ),
            compiler_params=pltpu.CompilerParams(
                # Batch tiles are independent -> shard across TensorCores (v7x).
                dimension_semantics=("parallel",),
            ),
            cost_estimate=pl.CostEstimate(
                flops=flops,
                transcendentals=b_padded * (len(h) + 1),
                bytes_accessed=bytes_accessed,
            ),
        )(xp, small_arr, *w_arrs)
        return out[:B, :out_size]

    def forward(x):
        return fwd(x, small, *weights)

    return forward


def init_params(key, input_size, hidden_sizes, output_size):
    """Deterministic synthetic init (PyTorch-Linear-style uniform), (in,out) layout."""
    sizes = [input_size] + list(hidden_sizes) + [output_size]
    params = {}
    keys = jax.random.split(key, 2 * (len(sizes) - 1))
    for li in range(len(sizes) - 1):
        fan_in, fan_out = sizes[li], sizes[li + 1]
        bound = 1.0 / jnp.sqrt(fan_in)
        params[f"w{li}"] = jax.random.uniform(
            keys[2 * li], (fan_in, fan_out), jnp.float32, -bound, bound)
        params[f"b{li}"] = jax.random.uniform(
            keys[2 * li + 1], (fan_out,), jnp.float32, -bound, bound).reshape(1, fan_out)
    for li, hsz in enumerate(hidden_sizes):
        params[f"g{li}"] = jnp.ones((1, hsz), jnp.float32)       # LayerNorm gamma
        params[f"beta{li}"] = jnp.zeros((1, hsz), jnp.float32)   # LayerNorm beta
    return params


def reference_forward(x, params, hidden_sizes):
    """Pure-JAX reference with the same bf16-operand / f32-accumulate matmuls."""
    h = x
    for li in range(len(hidden_sizes)):
        w = params[f"w{li}"].astype(jnp.bfloat16)
        h = jnp.dot(h.astype(jnp.bfloat16), w,
                    preferred_element_type=jnp.float32) + params[f"b{li}"]
        mean = jnp.mean(h, axis=-1, keepdims=True)
        var = jnp.mean((h - mean) ** 2, axis=-1, keepdims=True)
        h = (h - mean) * jax.lax.rsqrt(var + LN_EPS) * params[f"g{li}"] + params[f"beta{li}"]
        h = jnp.maximum(h, 0.0)
    li = len(hidden_sizes)
    out = jnp.dot(h.astype(jnp.bfloat16), params[f"w{li}"].astype(jnp.bfloat16),
                  preferred_element_type=jnp.float32) + params[f"b{li}"]
    norm = jnp.sqrt(jnp.sum(out * out, axis=-1, keepdims=True))
    return out / jnp.maximum(norm, NORM_EPS)


if __name__ == "__main__":
    # Module config: hidden_sizes fixed by the script; input/latent are data-
    # driven, so pick input_size=32 -> latentSize = 2 * ((32 - 5) // 2) = 26.
    hidden_sizes = [256, 512, 256]
    input_size = 32
    output_size = 2 * ((input_size - 5) // 2)   # 26
    batch = 128

    key = jax.random.PRNGKey(0)
    pkey, xkey = jax.random.split(key)
    params = init_params(pkey, input_size, hidden_sizes, output_size)
    x = jax.random.normal(xkey, (batch, input_size), jnp.float32)

    forward = make_network_forward(params, hidden_sizes)
    out = jax.block_until_ready(forward(x))
    assert out.shape == (batch, output_size), out.shape

    ref = reference_forward(x, params, hidden_sizes)
    max_err = float(jnp.max(jnp.abs(out - ref)))
    assert jnp.allclose(out, ref, atol=2e-2, rtol=2e-2), (
        f"mismatch vs pure-JAX reference, max abs err {max_err}")

    print("KERNEL_OK")
</pallas_src>

<mosaic_0001>
module attributes {stable_mosaic.version = 11 : i64} {
  func.func @kernel(%arg0: i32, %arg1: memref<128x128xbf16, #tpu.memory_space<vmem>>, %arg2: memref<16x512xf32, #tpu.memory_space<vmem>>, %arg3: memref<128x256xbf16, #tpu.memory_space<vmem>>, %arg4: memref<256x512xbf16, #tpu.memory_space<vmem>>, %arg5: memref<512x256xbf16, #tpu.memory_space<vmem>>, %arg6: memref<256x128xbf16, #tpu.memory_space<vmem>>, %arg7: memref<128x128xf32, #tpu.memory_space<vmem>>) attributes {dimension_semantics = [#tpu.dimension_semantics<parallel>], iteration_bounds = array<i64: 1>, scalar_prefetch = 0 : i64, scratch_operands = 0 : i64, tpu.core_type = #tpu.core_type<tc>, window_params = [{transform_indices = @transform_0, window_bounds = array<i64: 128, 128>}, {pipeline_mode = #tpu.pipeline_mode<synchronous>, transform_indices = @transform_1, window_bounds = array<i64: 16, 512>}, {pipeline_mode = #tpu.pipeline_mode<synchronous>, transform_indices = @transform_2, window_bounds = array<i64: 128, 256>}, {pipeline_mode = #tpu.pipeline_mode<synchronous>, transform_indices = @transform_3, window_bounds = array<i64: 256, 512>}, {pipeline_mode = #tpu.pipeline_mode<synchronous>, transform_indices = @transform_4, window_bounds = array<i64: 512, 256>}, {pipeline_mode = #tpu.pipeline_mode<synchronous>, transform_indices = @transform_5, window_bounds = array<i64: 256, 128>}, {transform_indices = @transform_6, window_bounds = array<i64: 128, 128>}]} {
    %c0 = arith.constant 0 : index
    %c0_0 = arith.constant 0 : index
    %0 = vector.load %arg1[%c0, %c0_0] : memref<128x128xbf16, #tpu.memory_space<vmem>>, vector<128x128xbf16>
    %c0_1 = arith.constant 0 : index
    %c0_2 = arith.constant 0 : index
    %1 = vector.load %arg3[%c0_1, %c0_2] : memref<128x256xbf16, #tpu.memory_space<vmem>>, vector<128x256xbf16>
    %cst = arith.constant dense<0.000000e+00> : vector<128x256xf32>
    %2 = tpu.matmul %0, %1, %cst {dimension_numbers = #tpu.dot_dimension_numbers<[1], [0], [0], [1], [0, 0, 1, 1], [], []>} : vector<128x128xbf16>, vector<128x256xbf16>, vector<128x256xf32> -> vector<128x256xf32>
    %c0_3 = arith.constant 0 : index
    %c0_4 = arith.constant 0 : index
    %3 = vector.load %arg2[%c0_3, %c0_4] : memref<16x512xf32, #tpu.memory_space<vmem>>, vector<1x256xf32>
    %4 = vector.broadcast %3 : vector<1x256xf32> to vector<128x256xf32>
    %5 = arith.addf %2, %4 : vector<128x256xf32>
    %c1 = arith.constant 1 : index
    %c0_5 = arith.constant 0 : index
    %6 = vector.load %arg2[%c1, %c0_5] : memref<16x512xf32, #tpu.memory_space<vmem>>, vector<1x256xf32>
    %c2 = arith.constant 2 : index
    %c0_6 = arith.constant 0 : index
    %7 = vector.load %arg2[%c2, %c0_6] : memref<16x512xf32, #tpu.memory_space<vmem>>, vector<1x256xf32>
    %cst_7 = arith.constant dense<0.000000e+00> : vector<128xf32>
    %8 = vector.multi_reduction <add>, %5, %cst_7 [1] : vector<128x256xf32> to vector<128xf32>
    %9 = vector.shape_cast %8 : vector<128xf32> to vector<128x1xf32>
    %cst_8 = arith.constant 2.560000e+02 : f32
    %10 = vector.broadcast %cst_8 : f32 to vector<128x1xf32>
    %11 = arith.divf %9, %10 : vector<128x1xf32>
    %12 = vector.broadcast %11 : vector<128x1xf32> to vector<128x256xf32>
    %13 = arith.subf %5, %12 : vector<128x256xf32>
    %14 = arith.mulf %13, %13 : vector<128x256xf32>
    %cst_9 = arith.constant dense<0.000000e+00> : vector<128xf32>
    %15 = vector.multi_reduction <add>, %14, %cst_9 [1] : vector<128x256xf32> to vector<128xf32>
    %16 = vector.shape_cast %15 : vector<128xf32> to vector<128x1xf32>
    %cst_10 = arith.constant 2.560000e+02 : f32
    %17 = vector.broadcast %cst_10 : f32 to vector<128x1xf32>
    %18 = arith.divf %16, %17 : vector<128x1xf32>
    %cst_11 = arith.constant 9.99999974E-6 : f32
    %19 = vector.broadcast %cst_11 : f32 to vector<128x1xf32>
    %20 = arith.addf %18, %19 : vector<128x1xf32>
    %21 = math.rsqrt %20 : vector<128x1xf32>
    %22 = vector.broadcast %21 : vector<128x1xf32> to vector<128x256xf32>
    %23 = arith.mulf %13, %22 : vector<128x256xf32>
    %24 = vector.broadcast %6 : vector<1x256xf32> to vector<128x256xf32>
    %25 = arith.mulf %23, %24 : vector<128x256xf32>
    %26 = vector.broadcast %7 : vector<1x256xf32> to vector<128x256xf32>
    %27 = arith.addf %25, %26 : vector<128x256xf32>
    %cst_12 = arith.constant 0.000000e+00 : f32
    %28 = vector.broadcast %cst_12 : f32 to vector<128x256xf32>
    %29 = arith.maximumf %27, %28 : vector<128x256xf32>
    %30 = arith.truncf %29 : vector<128x256xf32> to vector<128x256xbf16>
    %c0_13 = arith.constant 0 : index
    %c0_14 = arith.constant 0 : index
    %31 = vector.load %arg4[%c0_13, %c0_14] : memref<256x512xbf16, #tpu.memory_space<vmem>>, vector<256x512xbf16>
    %cst_15 = arith.constant dense<0.000000e+00> : vector<128x512xf32>
    %32 = tpu.matmul %30, %31, %cst_15 {dimension_numbers = #tpu.dot_dimension_numbers<[1], [0], [0], [1], [0, 0, 1, 1], [], []>} : vector<128x256xbf16>, vector<256x512xbf16>, vector<128x512xf32> -> vector<128x512xf32>
    %c3 = arith.constant 3 : index
    %c0_16 = arith.constant 0 : index
    %33 = vector.load %arg2[%c3, %c0_16] : memref<16x512xf32, #tpu.memory_space<vmem>>, vector<1x512xf32>
    %34 = vector.broadcast %33 : vector<1x512xf32> to vector<128x512xf32>
    %35 = arith.addf %32, %34 : vector<128x512xf32>
    %c4 = arith.constant 4 : index
    %c0_17 = arith.constant 0 : index
    %36 = vector.load %arg2[%c4, %c0_17] : memref<16x512xf32, #tpu.memory_space<vmem>>, vector<1x512xf32>
    %c5 = arith.constant 5 : index
    %c0_18 = arith.constant 0 : index
    %37 = vector.load %arg2[%c5, %c0_18] : memref<16x512xf32, #tpu.memory_space<vmem>>, vector<1x512xf32>
    %cst_19 = arith.constant dense<0.000000e+00> : vector<128xf32>
    %38 = vector.multi_reduction <add>, %35, %cst_19 [1] : vector<128x512xf32> to vector<128xf32>
    %39 = vector.shape_cast %38 : vector<128xf32> to vector<128x1xf32>
    %cst_20 = arith.constant 5.120000e+02 : f32
    %40 = vector.broadcast %cst_20 : f32 to vector<128x1xf32>
    %41 = arith.divf %39, %40 : vector<128x1xf32>
    %42 = vector.broadcast %41 : vector<128x1xf32> to vector<128x512xf32>
    %43 = arith.subf %35, %42 : vector<128x512xf32>
    %44 = arith.mulf %43, %43 : vector<128x512xf32>
    %cst_21 = arith.constant dense<0.000000e+00> : vector<128xf32>
    %45 = vector.multi_reduction <add>, %44, %cst_21 [1] : vector<128x512xf32> to vector<128xf32>
    %46 = vector.shape_cast %45 : vector<128xf32> to vector<128x1xf32>
    %cst_22 = arith.constant 5.120000e+02 : f32
    %47 = vector.broadcast %cst_22 : f32 to vector<128x1xf32>
    %48 = arith.divf %46, %47 : vector<128x1xf32>
    %cst_23 = arith.constant 9.99999974E-6 : f32
    %49 = vector.broadcast %cst_23 : f32 to vector<128x1xf32>
    %50 = arith.addf %48, %49 : vector<128x1xf32>
    %51 = math.rsqrt %50 : vector<128x1xf32>
    %52 = vector.broadcast %51 : vector<128x1xf32> to vector<128x512xf32>
    %53 = arith.mulf %43, %52 : vector<128x512xf32>
    %54 = vector.broadcast %36 : vector<1x512xf32> to vector<128x512xf32>
    %55 = arith.mulf %53, %54 : vector<128x512xf32>
    %56 = vector.broadcast %37 : vector<1x512xf32> to vector<128x512xf32>
    %57 = arith.addf %55, %56 : vector<128x512xf32>
    %cst_24 = arith.constant 0.000000e+00 : f32
    %58 = vector.broadcast %cst_24 : f32 to vector<128x512xf32>
    %59 = arith.maximumf %57, %58 : vector<128x512xf32>
    %60 = arith.truncf %59 : vector<128x512xf32> to vector<128x512xbf16>
    %c0_25 = arith.constant 0 : index
    %c0_26 = arith.constant 0 : index
    %61 = vector.load %arg5[%c0_25, %c0_26] : memref<512x256xbf16, #tpu.memory_space<vmem>>, vector<512x256xbf16>
    %cst_27 = arith.constant dense<0.000000e+00> : vector<128x256xf32>
    %62 = tpu.matmul %60, %61, %cst_27 {dimension_numbers = #tpu.dot_dimension_numbers<[1], [0], [0], [1], [0, 0, 1, 1], [], []>} : vector<128x512xbf16>, vector<512x256xbf16>, vector<128x256xf32> -> vector<128x256xf32>
    %c6 = arith.constant 6 : index
    %c0_28 = arith.constant 0 : index
    %63 = vector.load %arg2[%c6, %c0_28] : memref<16x512xf32, #tpu.memory_space<vmem>>, vector<1x256xf32>
    %64 = vector.broadcast %63 : vector<1x256xf32> to vector<128x256xf32>
    %65 = arith.addf %62, %64 : vector<128x256xf32>
    %c7 = arith.constant 7 : index
    %c0_29 = arith.constant 0 : index
    %66 = vector.load %arg2[%c7, %c0_29] : memref<16x512xf32, #tpu.memory_space<vmem>>, vector<1x256xf32>
    %c8 = arith.constant 8 : index
    %c0_30 = arith.constant 0 : index
    %67 = vector.load %arg2[%c8, %c0_30] : memref<16x512xf32, #tpu.memory_space<vmem>>, vector<1x256xf32>
    %cst_31 = arith.constant dense<0.000000e+00> : vector<128xf32>
    %68 = vector.multi_reduction <add>, %65, %cst_31 [1] : vector<128x256xf32> to vector<128xf32>
    %69 = vector.shape_cast %68 : vector<128xf32> to vector<128x1xf32>
    %cst_32 = arith.constant 2.560000e+02 : f32
    %70 = vector.broadcast %cst_32 : f32 to vector<128x1xf32>
    %71 = arith.divf %69, %70 : vector<128x1xf32>
    %72 = vector.broadcast %71 : vector<128x1xf32> to vector<128x256xf32>
    %73 = arith.subf %65, %72 : vector<128x256xf32>
    %74 = arith.mulf %73, %73 : vector<128x256xf32>
    %cst_33 = arith.constant dense<0.000000e+00> : vector<128xf32>
    %75 = vector.multi_reduction <add>, %74, %cst_33 [1] : vector<128x256xf32> to vector<128xf32>
    %76 = vector.shape_cast %75 : vector<128xf32> to vector<128x1xf32>
    %cst_34 = arith.constant 2.560000e+02 : f32
    %77 = vector.broadcast %cst_34 : f32 to vector<128x1xf32>
    %78 = arith.divf %76, %77 : vector<128x1xf32>
    %cst_35 = arith.constant 9.99999974E-6 : f32
    %79 = vector.broadcast %cst_35 : f32 to vector<128x1xf32>
    %80 = arith.addf %78, %79 : vector<128x1xf32>
    %81 = math.rsqrt %80 : vector<128x1xf32>
    %82 = vector.broadcast %81 : vector<128x1xf32> to vector<128x256xf32>
    %83 = arith.mulf %73, %82 : vector<128x256xf32>
    %84 = vector.broadcast %66 : vector<1x256xf32> to vector<128x256xf32>
    %85 = arith.mulf %83, %84 : vector<128x256xf32>
    %86 = vector.broadcast %67 : vector<1x256xf32> to vector<128x256xf32>
    %87 = arith.addf %85, %86 : vector<128x256xf32>
    %cst_36 = arith.constant 0.000000e+00 : f32
    %88 = vector.broadcast %cst_36 : f32 to vector<128x256xf32>
    %89 = arith.maximumf %87, %88 : vector<128x256xf32>
    %90 = arith.truncf %89 : vector<128x256xf32> to vector<128x256xbf16>
    %c0_37 = arith.constant 0 : index
    %c0_38 = arith.constant 0 : index
    %91 = vector.load %arg6[%c0_37, %c0_38] : memref<256x128xbf16, #tpu.memory_space<vmem>>, vector<256x128xbf16>
    %cst_39 = arith.constant dense<0.000000e+00> : vector<128x128xf32>
    %92 = tpu.matmul %90, %91, %cst_39 {dimension_numbers = #tpu.dot_dimension_numbers<[1], [0], [0], [1], [0, 0, 1, 1], [], []>} : vector<128x256xbf16>, vector<256x128xbf16>, vector<128x128xf32> -> vector<128x128xf32>
    %c9 = arith.constant 9 : index
    %c0_40 = arith.constant 0 : index
    %93 = vector.load %arg2[%c9, %c0_40] : memref<16x512xf32, #tpu.memory_space<vmem>>, vector<1x128xf32>
    %94 = vector.broadcast %93 : vector<1x128xf32> to vector<128x128xf32>
    %95 = arith.addf %92, %94 : vector<128x128xf32>
    %96 = arith.mulf %95, %95 : vector<128x128xf32>
    %cst_41 = arith.constant dense<0.000000e+00> : vector<128xf32>
    %97 = vector.multi_reduction <add>, %96, %cst_41 [1] : vector<128x128xf32> to vector<128xf32>
    %98 = vector.shape_cast %97 : vector<128xf32> to vector<128x1xf32>
    %cst_42 = arith.constant 1.000000e-24 : f32
    %99 = vector.broadcast %cst_42 : f32 to vector<128x1xf32>
    %100 = arith.maximumf %98, %99 : vector<128x1xf32>
    %101 = math.rsqrt %100 : vector<128x1xf32>
    %102 = vector.broadcast %101 : vector<128x1xf32> to vector<128x128xf32>
    %103 = arith.mulf %95, %102 : vector<128x128xf32>
    %c0_43 = arith.constant 0 : index
    %c0_44 = arith.constant 0 : index
    %104 = vector.load %arg7[%c0_43, %c0_44] : memref<128x128xf32, #tpu.memory_space<vmem>>, vector<128x128xf32>
    tpu.vector_store %arg7[%c0_43, %c0_44], %103 {strides = array<i32>} : memref<128x128xf32, #tpu.memory_space<vmem>>, vector<128x128xf32>,
    return
  }
  func.func @transform_0(%arg0: i32) -> (i32, i32) {
    %c0_i32 = arith.constant 0 : i32
    %c0_i32_0 = arith.constant 0 : i32
    return %arg0, %c0_i32 : i32, i32
  }
  func.func @transform_1(%arg0: i32) -> (i32, i32) {
    %c0_i32 = arith.constant 0 : i32
    %c0_i32_0 = arith.constant 0 : i32
    %c0_i32_1 = arith.constant 0 : i32
    return %c0_i32, %c0_i32_0 : i32, i32
  }
  func.func @transform_2(%arg0: i32) -> (i32, i32) {
    %c0_i32 = arith.constant 0 : i32
    %c0_i32_0 = arith.constant 0 : i32
    %c0_i32_1 = arith.constant 0 : i32
    return %c0_i32, %c0_i32_0 : i32, i32
  }
  func.func @transform_3(%arg0: i32) -> (i32, i32) {
    %c0_i32 = arith.constant 0 : i32
    %c0_i32_0 = arith.constant 0 : i32
    %c0_i32_1 = arith.constant 0 : i32
    return %c0_i32, %c0_i32_0 : i32, i32
  }
  func.func @transform_4(%arg0: i32) -> (i32, i32) {
    %c0_i32 = arith.constant 0 : i32
    %c0_i32_0 = arith.constant 0 : i32
    %c0_i32_1 = arith.constant 0 : i32
    return %c0_i32, %c0_i32_0 : i32, i32
  }
  func.func @transform_5(%arg0: i32) -> (i32, i32) {
    %c0_i32 = arith.constant 0 : i32
    %c0_i32_0 = arith.constant 0 : i32
    %c0_i32_1 = arith.constant 0 : i32
    return %c0_i32, %c0_i32_0 : i32, i32
  }
  func.func @transform_6(%arg0: i32) -> (i32, i32) {
    %c0_i32 = arith.constant 0 : i32
    %c0_i32_0 = arith.constant 0 : i32
    return %arg0, %c0_i32 : i32, i32
  }
}

</mosaic_0001>

<bundles_post_ra>
// kernel: fwd.1
= control target key start
LH: loop header
LB: loop body
LE: loop exit
PB: predicated region body
PF: predicated region fallthrough
CT: control target
= control target key end

     0   :  { %11 = vsyncpa [#allocation3], 0  ;;  %s6250_s0 = inlined_call_operand.vmem [shape: bf16[128,128], index: 0, kind: input, shape index: {}]   ;;  %s6251_s1 = inlined_call_operand.hbm [shape: f32[16,512], index: 1, kind: input, shape index: {}]   ;;  %s6252_s2 = inlined_call_operand.vmem [shape: bf16[128,256], index: 2, kind: input, shape index: {}]   ;;  %s6253_s3 = inlined_call_operand.hbm [shape: bf16[256,512], index: 3, kind: input, shape index: {}]   ;;  %s6254_s4 = inlined_call_operand.hbm [shape: bf16[512,256], index: 4, kind: input, shape index: {}]   ;;  %s6255_s5 = inlined_call_operand.vmem [shape: bf16[256,128], index: 5, kind: input, shape index: {}]   ;;  %s6256_s6 = inlined_call_operand.vmem [shape: f32[128,128], index: 6, kind: output, shape index: {}]  }
   0x1   :  { %12 = vsyncpa [#allocation5], 0  ;;  %s4170_s21 = smov [#allocation4]   ;;  %s4100_s25 = scalar_lea.hbm %s6253_s3, 8192 }
   0x2   :  { %s34_s22 = sshll.u32 %s4170_s21, 4  ;;  %p4101_p0 = scmp.ne.s32.totalorder %s6253_s3, %s4100_s25  ;;  %s35_s22 = int_to_ptr.vmem [resolvable:$true] %s34_s22 }
   0x3   :  { %p4104_p1 = scmp.lt.u32.totalorder %s4100_s25, %s6253_s3 }
   0x5   :  { %p4106_p2 = pnand %p4104_p1, %p4101_p0 }
   0x7   :  { %4109 = shalt.err (!%p4106_p2)
}
   0x8   :  { %s4110_s30 = scalar_lea.vmem %s35_s22, 8192  ;;  %p4115_p4 = scmp.lt.s32.totalorder %s35_s22, %s35_s22 }
   0x9   :  { %p4111_p3 = scmp.ne.s32.totalorder %s35_s22, %s4110_s30  ;;  %p4116_p5 = scmp.lt.s32.totalorder %s4110_s30, %s4110_s30 }
   0xb   :  { %p4117_p6 = por %p4116_p5, %p4115_p4 }
   0xd   :  { %p4118_p7 = pnand %p4117_p6, %p4111_p3 }
   0xf   :  { %4121 = shalt.err (!%p4118_p7)
}
  0x10   :  { %s4171_s7 = smov 256   ;;  %s4172_s8 = smov 16  }
  0x11   :  { %40 = dma.hbm_to_vmem [thread:$0]  %s6253_s3, 8192, %s35_s22, [#allocation5], %s4171_s7, %s4171_s7, %s4172_s8  }
  0x12   :  { %s4173_s11 = smov [#allocation2]   ;;  %s4122_s15 = scalar_lea.hbm %s6251_s1, 1024 }
  0x13   :  { %s20_s12 = sshll.u32 %s4173_s11, 4  ;;  %p4123_p8 = scmp.ne.s32.totalorder %s6251_s1, %s4122_s15  ;;  %s21_s12 = int_to_ptr.vmem [resolvable:$true] %s20_s12 }
  0x14   :  { %p4126_p9 = scmp.lt.u32.totalorder %s4122_s15, %s6251_s1 }
  0x16   :  { %p4128_p10 = pnand %p4126_p9, %p4123_p8 }
  0x18   :  { %4131 = shalt.err (!%p4128_p10)
}
  0x19   :  { %s4132_s20 = scalar_lea.vmem %s21_s12, 1024  ;;  %p4137_p12 = scmp.lt.s32.totalorder %s21_s12, %s21_s12 }
  0x1a   :  { %p4133_p11 = scmp.ne.s32.totalorder %s21_s12, %s4132_s20  ;;  %p4138_p13 = scmp.lt.s32.totalorder %s4132_s20, %s4132_s20 }
  0x1c   :  { %p4139_p0 = por %p4138_p13, %p4137_p12 }
  0x1e   :  { %p4140_p1 = pnand %p4139_p0, %p4133_p11 }
  0x20   :  { %4143 = shalt.err (!%p4140_p1)
}
  0x21   :  { %s4174_s3 = smov 512   ;;  %s4175_s21 = smov 32  }
  0x22   :  { %26 = dma.hbm_to_vmem [thread:$0]  %s6251_s1, 1024, %s21_s12, [#allocation3], %s4174_s3, %s4174_s3, %s4175_s21  }
  0x23   :  { %s4176_s24 = smov [#allocation6]   ;;  %s4144_s28 = scalar_lea.hbm %s6254_s4, 8192 }
  0x24   :  { %s46_s25 = sshll.u32 %s4176_s24, 4  ;;  %p4145_p2 = scmp.ne.s32.totalorder %s6254_s4, %s4144_s28  ;;  %s47_s25 = int_to_ptr.vmem [resolvable:$true] %s46_s25 }
  0x25   :  { %p4148_p3 = scmp.lt.u32.totalorder %s4144_s28, %s6254_s4 }
  0x27   :  { %p4150_p4 = pnand %p4148_p3, %p4145_p2 }
  0x29   :  { %4153 = shalt.err (!%p4150_p4)
}
  0x2a   :  { %s4154_s9 = scalar_lea.vmem %s47_s25, 8192  ;;  %p4159_p6 = scmp.lt.s32.totalorder %s47_s25, %s47_s25 }
  0x2b   :  { %p4155_p5 = scmp.ne.s32.totalorder %s47_s25, %s4154_s9  ;;  %p4160_p7 = scmp.lt.s32.totalorder %s4154_s9, %s4154_s9 }
  0x2d   :  { %p4161_p8 = por %p4160_p7, %p4159_p6 }
  0x2f   :  { %p4162_p9 = pnand %p4161_p8, %p4155_p5 }
  0x31   :  { %4165 = shalt.err (!%p4162_p9)
}
  0x32   :  { %s4177_s1 = smov 128   ;;  %s4178_s10 = smov 8  }
  0x33   :  { %52 = dma.hbm_to_vmem [thread:$0]  %s6254_s4, 8192, %s47_s25, [#allocation5], %s4177_s1, %s4177_s1, %s4178_s10  }
  0x34   :  { %4166 = dma.done.wait [#allocation3], 1024  }
  0x35   :  { %4167 = vsyncadd [#allocation3], 4294966272 }
  0x36   :  { %4168 = dma.done.wait [#allocation5], 16384  }
  0x37   :  { %4169 = vsyncadd [#allocation5], 4294950912  ;;  %v4179_v0 = vmov 0   ;;  %v3732_v1 = vld [vmem:[%s6252_s2 + $0x4] ss:$8 sps:$4 sm:$0xff]   ;;  %v3758_v19 = vld [vmem:[%s6250_s0 + $0x10] sm:$0xff]   ;;  %v99_v25 = vlaneseq }
  0x38   :  { %269 = vmatprep.mubr.bf16.mxu0 %v4179_v0  ;;  %v3734_v2 = vld [vmem:[%s6252_s2] ss:$8 sps:$4 sm:$0xff]   ;;  %237 = vmatprep.subr.bf16.mxu0 %v3732_v1  ;;  %v3735_v3 = vld [vmem:[%s6252_s2 + $0x14] ss:$8 sps:$4 sm:$0xff]   ;;  %v3737_v4 = vld [vmem:[%s6252_s2 + $0x10] ss:$8 sps:$4 sm:$0xff]  }
  0x39   :  { %238 = vmatpush1.bf16.msra.mxu0 %v3734_v2  ;;  %v3738_v5 = vld [vmem:[%s6252_s2 + $0x24] ss:$8 sps:$4 sm:$0xff]   ;;  %v3740_v6 = vld [vmem:[%s6252_s2 + $0x20] ss:$8 sps:$4 sm:$0xff]   ;;  %v3741_v7 = vld [vmem:[%s6252_s2 + $0x34] ss:$8 sps:$4 sm:$0xff]  }
  0x3a   :  { %239 = vmatprep.subr.bf16.mxu0 %v3735_v3  ;;  %v3743_v8 = vld [vmem:[%s6252_s2 + $0x30] ss:$8 sps:$4 sm:$0xff]   ;;  %v3744_v9 = vld [vmem:[%s6252_s2 + $0x44] ss:$8 sps:$4 sm:$0xff]   ;;  %v3746_v10 = vld [vmem:[%s6252_s2 + $0x40] ss:$8 sps:$4 sm:$0xff]  }
  0x3b   :  { %v3747_v11 = vld [vmem:[%s6252_s2 + $0x54] ss:$8 sps:$4 sm:$0xff]   ;;  %v3749_v12 = vld [vmem:[%s6252_s2 + $0x50] ss:$8 sps:$4 sm:$0xff]   ;;  %v3750_v13 = vld [vmem:[%s6252_s2 + $0x64] ss:$8 sps:$4 sm:$0xff]  }
  0x3c   :  { %v3752_v14 = vld [vmem:[%s6252_s2 + $0x60] ss:$8 sps:$4 sm:$0xff]   ;;  %v3753_v15 = vld [vmem:[%s6252_s2 + $0x74] ss:$8 sps:$4 sm:$0xff]   ;;  %v3755_v16 = vld [vmem:[%s6252_s2 + $0x70] ss:$8 sps:$4 sm:$0xff]  }
  0x3d   :  { %240 = vmatpush1.bf16.msra.mxu0 %v3737_v4  ;;  %v3756_v17 = vld [vmem:[%s6250_s0] sm:$0xff]   ;;  %v3757_v18 = vld [vmem:[%s6250_s0 + $0x8] sm:$0xff]   ;;  %v3759_v20 = vld [vmem:[%s6250_s0 + $0x18] sm:$0xff]   ;;  %v4323_v26 = vshrl.u32 %v99_v25, 7 }
  0x3e   :  { %241 = vmatprep.subr.bf16.mxu0 %v3738_v5  ;;  %v3760_v21 = vld [vmem:[%s6250_s0 + $0x20] sm:$0xff]   ;;  %v3761_v22 = vld [vmem:[%s6250_s0 + $0x28] sm:$0xff]   ;;  %v3762_v23 = vld [vmem:[%s6250_s0 + $0x30] sm:$0xff]  }
  0x3f   :  { %v3763_v24 = vld [vmem:[%s6250_s0 + $0x38] sm:$0xff]   ;;  %v4326_v27 = vsub.s32 0, %v4323_v26  ;;  %v97_v28 = vld [vmem:[#allocation2] ss:$8 sm:$0x3]  ;;  %v4329_v29 = vsub.s32 1, %v4323_v26 }
  0x41   :  { %242 = vmatpush1.bf16.msra.mxu0 %v3740_v6  ;;  %6309 = vst [vmem:[#allocation9_spill] sm:$0xff] %v4326_v27  ;;  %6310 = vst [vmem:[#allocation10_spill] sm:$0xff] %v4329_v29  ;;  %v4332_v30 = vrot.slane %v97_v28, %v4326_v27  ;;  %v4335_v31 = vrot.slane %v97_v28, %v4329_v29 }
  0x42   :  { %243 = vmatprep.subr.bf16.mxu0 %v3741_v7 }
  0x45   :  { %244 = vmatpush1.bf16.msra.mxu0 %v3743_v8 }
  0x46   :  { %245 = vmatprep.subr.bf16.mxu0 %v3744_v9 }
  0x49   :  { %246 = vmatpush1.bf16.msra.mxu0 %v3746_v10 }
  0x4a   :  { %247 = vmatprep.subr.bf16.mxu0 %v3747_v11 }
  0x4d   :  { %248 = vmatpush1.bf16.msra.mxu0 %v3749_v12 }
  0x4e   :  { %249 = vmatprep.subr.bf16.mxu0 %v3750_v13 }
  0x51   :  { %250 = vmatpush1.bf16.msra.mxu0 %v3752_v14 }
  0x52   :  { %251 = vmatprep.subr.bf16.mxu0 %v3753_v15 }
  0x55   :  { %252 = vmatpush1.bf16.msra.mxu0 %v3755_v16 }
  0x58   :  { %270 = vmatmul.mubr.bf16.vlgmr.msra.gmra.mrb[0].mxu0 %v3756_v17 }
  0x59   :  { %279 = vmatprep.mubr.bf16.mxu0 %v4179_v0 }
  0x60   :  { %280 = vmatmul.mubr.bf16.gmra.mrb[4].mxu0 %v3757_v18 }
  0x61   :  { %289 = vmatprep.mubr.bf16.mxu0 %v4179_v0 }
  0x68   :  { %290 = vmatmul.mubr.bf16.gmra.mrb[8].mxu0 %v3758_v19 }
  0x69   :  { %299 = vmatprep.mubr.bf16.mxu0 %v4179_v0 }
  0x70   :  { %300 = vmatmul.mubr.bf16.gmra.mrb[12].mxu0 %v3759_v20 }
  0x71   :  { %309 = vmatprep.mubr.bf16.mxu0 %v4179_v0 }
  0x78   :  { %310 = vmatmul.mubr.bf16.gmra.mrb[16].mxu0 %v3760_v21 }
  0x79   :  { %319 = vmatprep.mubr.bf16.mxu0 %v4179_v0 }
  0x80   :  { %320 = vmatmul.mubr.bf16.gmra.mrb[20].mxu0 %v3761_v22 }
  0x81   :  { %329 = vmatprep.mubr.bf16.mxu0 %v4179_v0 }
  0x88   :  { %330 = vmatmul.mubr.bf16.gmra.mrb[24].mxu0 %v3762_v23 }
  0x89   :  { %339 = vmatprep.mubr.bf16.mxu0 %v4179_v0 }
  0x90   :  { %340 = vmatmul.mubr.bf16.gmra.mrb[28].mxu0 %v3763_v24 }
 0x12b   :  { %v271_v32 = vpop.f32.mrb[0].mxu0 }
 0x12c   :  { %v4338_v33 = vadd.f32 %v271_v32, %v4332_v30  ;;  %v273_v34 = vpop.f32.mrb[1].mxu0 }
 0x12d   :  { %v4341_v35 = vadd.f32 %v273_v34, %v4335_v31  ;;  %v275_v36 = vpop.f32.mrb[2].mxu0 }
 0x12e   :  { %v277_v37 = vpop.f32.mrb[3].mxu0  ;;  %v4344_v38 = vadd.f32 %v275_v36, %v4332_v30 }
 0x12f   :  { %v4347_v39 = vadd.f32 %v277_v37, %v4335_v31  ;;  %v354_v40 = vadd.f32 %v4341_v35, %v4338_v33 }
 0x131   :  { %355 = vadd.xlane.f32.xlu0 %v354_v40  ;;  %v357_v42 = vadd.f32 %v4347_v39, %v4344_v38 }
 0x133   :  { %v281_v41 = vpop.f32.mrb[4].mxu0 }
 0x134   :  { %v4354_v43 = vadd.f32 %v281_v41, %v4332_v30  ;;  %v283_v44 = vpop.f32.mrb[5].mxu0 }
 0x135   :  { %v4357_v45 = vadd.f32 %v283_v44, %v4335_v31  ;;  %v285_v46 = vpop.f32.mrb[6].mxu0  ;;  %358 = vadd.xlane.f32.xlu0 %v357_v42 }
 0x136   :  { %v287_v47 = vpop.f32.mrb[7].mxu0  ;;  %v4360_v48 = vadd.f32 %v285_v46, %v4332_v30 }
 0x137   :  { %v4363_v49 = vadd.f32 %v287_v47, %v4335_v31  ;;  %v360_v50 = vadd.f32 %v4357_v45, %v4354_v43 }
 0x139   :  { %361 = vadd.xlane.f32.xlu1 %v360_v50  ;;  %v363_v52 = vadd.f32 %v4363_v49, %v4360_v48 }
 0x13b   :  { %v291_v51 = vpop.f32.mrb[8].mxu0 }
 0x13c   :  { %v4370_v53 = vadd.f32 %v291_v51, %v4332_v30  ;;  %v293_v54 = vpop.f32.mrb[9].mxu0 }
 0x13d   :  { %v4373_v55 = vadd.f32 %v293_v54, %v4335_v31  ;;  %v295_v56 = vpop.f32.mrb[10].mxu0  ;;  %364 = vadd.xlane.f32.xlu1 %v363_v52 }
 0x13e   :  { %v4376_v57 = vadd.f32 %v295_v56, %v4332_v30  ;;  %v297_v58 = vpop.f32.mrb[11].mxu0 }
 0x13f   :  { %v4379_v59 = vadd.f32 %v297_v58, %v4335_v31  ;;  %v366_v60 = vadd.f32 %v4373_v55, %v4370_v53 }
 0x141   :  { %367 = vadd.xlane.f32.xlu0 %v366_v60  ;;  %v369_v61 = vadd.f32 %v4379_v59, %v4376_v57 }
 0x143   :  { %v301_v62 = vpop.f32.mrb[12].mxu0  ;;  %370 = vadd.xlane.f32.xlu1 %v369_v61 }
 0x144   :  { %v4386_v63 = vadd.f32 %v301_v62, %v4332_v30  ;;  %v303_v0 = vpop.f32.mrb[13].mxu0 }
 0x145   :  { %v4389_v1 = vadd.f32 %v303_v0, %v4335_v31  ;;  %v305_v2 = vpop.f32.mrb[14].mxu0 }
 0x146   :  { %v4392_v3 = vadd.f32 %v305_v2, %v4332_v30  ;;  %v307_v4 = vpop.f32.mrb[15].mxu0 }
 0x147   :  { %v4395_v5 = vadd.f32 %v307_v4, %v4335_v31  ;;  %v372_v6 = vadd.f32 %v4389_v1, %v4386_v63  ;;  %v3764_v4 = vld [vmem:[#allocation4 + $0x4] ss:$16 sps:$4 sm:$0xff]  }
 0x148   :  { %1152 = vmatprep.subr.bf16.mxu1 %v3764_v4  ;;  %v3810_v4 = vld [vmem:[#allocation4 + $0xec] ss:$16 sps:$4 sm:$0xff]  }
 0x149   :  { %373 = vadd.xlane.f32.xlu0 %v372_v6  ;;  %v375_v7 = vadd.f32 %v4395_v5, %v4392_v3  ;;  %v3766_v6 = vld [vmem:[#allocation4 + $0x8] ss:$16 sps:$4 sm:$0xff]  }
 0x14b   :  { %v311_v8 = vpop.f32.mrb[16].mxu0  ;;  %376 = vadd.xlane.f32.xlu1 %v375_v7  ;;  %v3768_v7 = vld [vmem:[#allocation4 + $0xc] ss:$16 sps:$4 sm:$0xff]  }
 0x14c   :  { %v4402_v9 = vadd.f32 %v311_v8, %v4332_v30  ;;  %v313_v10 = vpop.f32.mrb[17].mxu0  ;;  %v3769_v8 = vld [vmem:[#allocation4] ss:$16 sps:$4 sm:$0xff]   ;;  %1265 = vmatprep.subr.bf16.mxu0 %v3768_v7 }
 0x14d   :  { %v4405_v11 = vadd.f32 %v313_v10, %v4335_v31  ;;  %v315_v12 = vpop.f32.mrb[18].mxu0  ;;  %v3770_v10 = vld [vmem:[#allocation4 + $0x24] ss:$16 sps:$4 sm:$0xff]   ;;  %1153 = vmatpush1.bf16.msra.mxu1 %v3769_v8  ;;  %1266 = vmatpush1.bf16.msra.mxu0 %v3766_v6  ;;  %v3808_v6 = vld [vmem:[#allocation4 + $0xe8] ss:$16 sps:$4 sm:$0xff]  }
 0x14e   :  { %v4408_v13 = vadd.f32 %v315_v12, %v4332_v30  ;;  %v317_v14 = vpop.f32.mrb[19].mxu0  ;;  %v3775_v12 = vld [vmem:[#allocation4 + $0x20] ss:$16 sps:$4 sm:$0xff]   ;;  %1154 = vmatprep.subr.bf16.mxu1 %v3770_v10  ;;  %v3812_v8 = vld [vmem:[#allocation4 + $0x104] ss:$16 sps:$4 sm:$0xff]  }
 0x14f   :  { %v4411_v15 = vadd.f32 %v317_v14, %v4335_v31  ;;  %v378_v16 = vadd.f32 %v4405_v11, %v4402_v9  ;;  %v3776_v14 = vld [vmem:[#allocation4 + $0x44] ss:$16 sps:$4 sm:$0xff]   ;;  %v3811_v7 = vld [vmem:[#allocation4 + $0xe0] ss:$16 sps:$4 sm:$0xff]   ;;  %v3816_v10 = vld [vmem:[#allocation4 + $0x10c] ss:$16 sps:$4 sm:$0xff]  }
 0x151   :  { %379 = vadd.xlane.f32.xlu0 %v378_v16  ;;  %v381_v17 = vadd.f32 %v4411_v15, %v4408_v13  ;;  %v3780_v16 = vld [vmem:[#allocation4 + $0x4c] ss:$16 sps:$4 sm:$0xff]   ;;  %1155 = vmatpush1.bf16.msra.mxu1 %v3775_v12 }
 0x152   :  { %1156 = vmatprep.subr.bf16.mxu1 %v3776_v14 }
 0x153   :  { %v321_v18 = vpop.f32.mrb[20].mxu0  ;;  %382 = vadd.xlane.f32.xlu1 %v381_v17  ;;  %v3778_v17 = vld [vmem:[#allocation4 + $0x48] ss:$16 sps:$4 sm:$0xff]  }
 0x154   :  { %v4418_v19 = vadd.f32 %v321_v18, %v4332_v30  ;;  %v323_v20 = vpop.f32.mrb[21].mxu0  ;;  %v3781_v18 = vld [vmem:[#allocation4 + $0x40] ss:$16 sps:$4 sm:$0xff]  }
 0x155   :  { %v4421_v21 = vadd.f32 %v323_v20, %v4335_v31  ;;  %v325_v22 = vpop.f32.mrb[22].mxu0  ;;  %v3782_v20 = vld [vmem:[#allocation4 + $0x64] ss:$16 sps:$4 sm:$0xff]   ;;  %1157 = vmatpush1.bf16.msra.mxu1 %v3781_v18 }
 0x156   :  { %v4424_v23 = vadd.f32 %v325_v22, %v4332_v30  ;;  %v327_v24 = vpop.f32.mrb[23].mxu0  ;;  %v3786_v22 = vld [vmem:[#allocation4 + $0x6c] ss:$16 sps:$4 sm:$0xff]   ;;  %1158 = vmatprep.subr.bf16.mxu1 %v3782_v20 }
 0x157   :  { %v4427_v25 = vadd.f32 %v327_v24, %v4335_v31  ;;  %v384_v28 = vadd.f32 %v4421_v21, %v4418_v19  ;;  %v3784_v24 = vld [vmem:[#allocation4 + $0x68] ss:$16 sps:$4 sm:$0xff]  }
 0x159   :  { %385 = vadd.xlane.f32.xlu0 %v384_v28  ;;  %v387_v32 = vadd.f32 %v4427_v25, %v4424_v23  ;;  %v3787_v28 = vld [vmem:[#allocation4 + $0x60] ss:$16 sps:$4 sm:$0xff]  }
 0x15a   :  { %1159 = vmatpush1.bf16.msra.mxu1 %v3787_v28 }
 0x15b   :  { %v331_v34 = vpop.f32.mrb[24].mxu0  ;;  %388 = vadd.xlane.f32.xlu1 %v387_v32  ;;  %v3788_v32 = vld [vmem:[#allocation4 + $0x84] ss:$16 sps:$4 sm:$0xff]  }
 0x15c   :  { %v4434_v36 = vadd.f32 %v331_v34, %v4332_v30  ;;  %v333_v37 = vpop.f32.mrb[25].mxu0  ;;  %v3792_v34 = vld [vmem:[#allocation4 + $0x8c] ss:$16 sps:$4 sm:$0xff]   ;;  %1160 = vmatprep.subr.bf16.mxu1 %v3788_v32 }
 0x15d   :  { %v4437_v40 = vadd.f32 %v333_v37, %v4335_v31  ;;  %v335_v41 = vpop.f32.mrb[26].mxu0  ;;  %v3790_v37 = vld [vmem:[#allocation4 + $0x88] ss:$16 sps:$4 sm:$0xff]  }
 0x15e   :  { %v4440_v42 = vadd.f32 %v335_v41, %v4332_v30  ;;  %v337_v44 = vpop.f32.mrb[27].mxu0  ;;  %v3793_v41 = vld [vmem:[#allocation4 + $0x80] ss:$16 sps:$4 sm:$0xff]  }
 0x15f   :  { %v4443_v46 = vadd.f32 %v337_v44, %v4335_v31  ;;  %v390_v47 = vadd.f32 %v4437_v40, %v4434_v36  ;;  %v3794_v44 = vld [vmem:[#allocation4 + $0xa4] ss:$16 sps:$4 sm:$0xff]   ;;  %1161 = vmatpush1.bf16.msra.mxu1 %v3793_v41 }
 0x160   :  { %1162 = vmatprep.subr.bf16.mxu1 %v3794_v44 }
 0x161   :  { %391 = vadd.xlane.f32.xlu0 %v390_v47  ;;  %v393_v50 = vadd.f32 %v4443_v46, %v4440_v42  ;;  %v3798_v47 = vld [vmem:[#allocation4 + $0xac] ss:$16 sps:$4 sm:$0xff]  }
 0x163   :  { %v341_v51 = vpop.f32.mrb[28].mxu0  ;;  %394 = vadd.xlane.f32.xlu1 %v393_v50  ;;  %v3796_v50 = vld [vmem:[#allocation4 + $0xa8] ss:$16 sps:$4 sm:$0xff]  }
 0x164   :  { %v4450_v52 = vadd.f32 %v341_v51, %v4332_v30  ;;  %v343_v54 = vpop.f32.mrb[29].mxu0  ;;  %v3799_v51 = vld [vmem:[#allocation4 + $0xa0] ss:$16 sps:$4 sm:$0xff]  }
 0x165   :  { %v4453_v56 = vadd.f32 %v343_v54, %v4335_v31  ;;  %v345_v58 = vpop.f32.mrb[30].mxu0  ;;  %v3800_v54 = vld [vmem:[#allocation4 + $0xc4] ss:$16 sps:$4 sm:$0xff]   ;;  %1163 = vmatpush1.bf16.msra.mxu1 %v3799_v51 }
 0x166   :  { %v4456_v60 = vadd.f32 %v345_v58, %v4332_v30  ;;  %v347_v61 = vpop.f32.mrb[31].mxu0  ;;  %v3774_v30 = vld [vmem:[#allocation4 + $0x2c] ss:$16 sps:$4 sm:$0xff]   ;;  %1164 = vmatprep.subr.bf16.mxu1 %v3800_v54 }
 0x167   :  { %v4459_v62 = vadd.f32 %v347_v61, %v4335_v31  ;;  %v396_v0 = vadd.f32 %v4453_v56, %v4450_v52  ;;  %v3772_v31 = vld [vmem:[#allocation4 + $0x28] ss:$16 sps:$4 sm:$0xff]   ;;  %1267 = vmatprep.subr.bf16.mxu0 %v3774_v30  ;;  %v3804_v58 = vld [vmem:[#allocation4 + $0xcc] ss:$16 sps:$4 sm:$0xff]  }
 0x168   :  { %1268 = vmatpush1.bf16.msra.mxu0 %v3772_v31  ;;  %v3802_v61 = vld [vmem:[#allocation4 + $0xc8] ss:$16 sps:$4 sm:$0xff]   ;;  %v3817_v31 = vld [vmem:[#allocation4 + $0x100] ss:$16 sps:$4 sm:$0xff]  }
 0x169   :  { %397 = vadd.xlane.f32.xlu0 %v396_v0  ;;  %v399_v2 = vadd.f32 %v4459_v62, %v4456_v60  ;;  %1269 = vmatprep.subr.bf16.mxu0 %v3780_v16  ;;  %v3805_v0 = vld [vmem:[#allocation4 + $0xc0] ss:$16 sps:$4 sm:$0xff]   ;;  %v3814_v30 = vld [vmem:[#allocation4 + $0x108] ss:$16 sps:$4 sm:$0xff]  }
 0x16a   :  { %1165 = vmatpush1.bf16.msra.mxu1 %v3805_v0 }
 0x16b   :  { %400 = vadd.xlane.f32.xlu1 %v399_v2  ;;  %v3806_v2 = vld [vmem:[#allocation4 + $0xe4] ss:$16 sps:$4 sm:$0xff]  }
 0x16c   :  { %1270 = vmatpush1.bf16.msra.mxu0 %v3778_v17  ;;  %1166 = vmatprep.subr.bf16.mxu1 %v3806_v2 }
 0x16d   :  { %1271 = vmatprep.subr.bf16.mxu0 %v3786_v22 }
 0x16e   :  { %1167 = vmatpush1.bf16.msra.mxu1 %v3811_v7 }
 0x16f   :  { %1168 = vmatprep.subr.bf16.mxu1 %v3812_v8 }
 0x170   :  { %1272 = vmatpush1.bf16.msra.mxu0 %v3784_v24 }
 0x171   :  { %1273 = vmatprep.subr.bf16.mxu0 %v3792_v34 }
 0x172   :  { %1169 = vmatpush1.bf16.msra.mxu1 %v3817_v31 }
 0x174   :  { %1274 = vmatpush1.bf16.msra.mxu0 %v3790_v37 }
 0x175   :  { %1275 = vmatprep.subr.bf16.mxu0 %v3798_v47 }
 0x178   :  { %1276 = vmatpush1.bf16.msra.mxu0 %v3796_v50 }
 0x179   :  { %1277 = vmatprep.subr.bf16.mxu0 %v3804_v58 }
 0x17c   :  { %1278 = vmatpush1.bf16.msra.mxu0 %v3802_v61 }
 0x17d   :  { %1279 = vmatprep.subr.bf16.mxu0 %v3810_v4 }
 0x180   :  { %1280 = vmatpush1.bf16.msra.mxu0 %v3808_v6 }
 0x181   :  { %1281 = vmatprep.subr.bf16.mxu0 %v3816_v10 }
 0x184   :  { %1282 = vmatpush1.bf16.msra.mxu0 %v3814_v30 }
 0x1be   :  { %v356_v12 = vpop.xlane.xlu0 %355 }
 0x1bf   :  { %v403_v14 = vmul.f32 0.00390625, %v356_v12 }
 0x1c1   :  { %v4466_v16 = vsub.f32 %v4338_v33, %v403_v14  ;;  %v4469_v17 = vsub.f32 %v4341_v35, %v403_v14 }
 0x1c2   :  { %v359_v18 = vpop.xlane.xlu0 %358 }
 0x1c3   :  { %v404_v20 = vmul.f32 0.00390625, %v359_v18  ;;  %v451_v22 = vmul.f32 %v4466_v16, %v4466_v16  ;;  %v452_v24 = vmul.f32 %v4469_v17, %v4469_v17  ;;  %v3818_v18 = vld [vmem:[#allocation4 + $0x124] ss:$16 sps:$4 sm:$0xff]  }
 0x1c4   :  { %1170 = vmatprep.subr.bf16.mxu1 %v3818_v18  ;;  %v3836_v18 = vld [vmem:[#allocation4 + $0x184] ss:$16 sps:$4 sm:$0xff]  }
 0x1c5   :  { %v4476_v28 = vsub.f32 %v4344_v38, %v404_v20  ;;  %v4479_v32 = vsub.f32 %v4347_v39, %v404_v20  ;;  %v483_v34 = vadd.f32 %v452_v24, %v451_v22  ;;  %v3820_v22 = vld [vmem:[#allocation4 + $0x128] ss:$16 sps:$4 sm:$0xff]  }
 0x1c6   :  { %v362_v33 = vpop.xlane.xlu1 %361 }
 0x1c7   :  { %v405_v37 = vmul.f32 0.00390625, %v362_v33  ;;  %484 = vadd.xlane.f32.xlu0 %v483_v34  ;;  %v453_v35 = vmul.f32 %v4476_v28, %v4476_v28  ;;  %v454_v41 = vmul.f32 %v4479_v32, %v4479_v32 }
 0x1c9   :  { %v4486_v44 = vsub.f32 %v4354_v43, %v405_v37  ;;  %v4489_v47 = vsub.f32 %v4357_v45, %v405_v37  ;;  %v486_v38 = vadd.f32 %v454_v41, %v453_v35 }
 0x1ca   :  { %v365_v50 = vpop.xlane.xlu1 %364 }
 0x1cb   :  { %v406_v39 = vmul.f32 0.00390625, %v365_v50  ;;  %487 = vadd.xlane.f32.xlu1 %v486_v38  ;;  %v455_v51 = vmul.f32 %v4486_v44, %v4486_v44  ;;  %v456_v54 = vmul.f32 %v4489_v47, %v4489_v47  ;;  %v3824_v38 = vld [vmem:[#allocation4 + $0x144] ss:$16 sps:$4 sm:$0xff]   ;;  %v3828_v50 = vld [vmem:[#allocation4 + $0x14c] ss:$16 sps:$4 sm:$0xff]  }
 0x1cd   :  { %v4496_v58 = vsub.f32 %v4360_v48, %v406_v39  ;;  %v4499_v61 = vsub.f32 %v4363_v49, %v406_v39  ;;  %v489_v43 = vadd.f32 %v456_v54, %v455_v51  ;;  %v3826_v39 = vld [vmem:[#allocation4 + $0x148] ss:$16 sps:$4 sm:$0xff]   ;;  %v3829_v51 = vld [vmem:[#allocation4 + $0x140] ss:$16 sps:$4 sm:$0xff]  }
 0x1ce   :  { %v368_v0 = vpop.xlane.xlu0 %367 }
 0x1cf   :  { %v407_v45 = vmul.f32 0.00390625, %v368_v0  ;;  %490 = vadd.xlane.f32.xlu0 %v489_v43  ;;  %v457_v2 = vmul.f32 %v4496_v58, %v4496_v58  ;;  %v458_v4 = vmul.f32 %v4499_v61, %v4499_v61 }
 0x1d0   :  { %v371_v6 = vpop.xlane.xlu1 %370 }
 0x1d1   :  { %v4506_v7 = vsub.f32 %v4370_v53, %v407_v45  ;;  %v4509_v48 = vsub.f32 %v4373_v55, %v407_v45  ;;  %v408_v8 = vmul.f32 0.00390625, %v371_v6  ;;  %v492_v49 = vadd.f32 %v458_v4, %v457_v2  ;;  %v3830_v2 = vld [vmem:[#allocation4 + $0x164] ss:$16 sps:$4 sm:$0xff]   ;;  %v3832_v6 = vld [vmem:[#allocation4 + $0x168] ss:$16 sps:$4 sm:$0xff]  }
 0x1d3   :  { %v4512_v10 = vsub.f32 %v4376_v57, %v408_v8  ;;  %v4515_v30 = vsub.f32 %v4379_v59, %v408_v8  ;;  %493 = vadd.xlane.f32.xlu1 %v492_v49  ;;  %v459_v31 = vmul.f32 %v4506_v7, %v4506_v7  ;;  %v460_v12 = vmul.f32 %v4509_v48, %v4509_v48  ;;  %v3822_v57 = vld [vmem:[#allocation4 + $0x12c] ss:$16 sps:$4 sm:$0xff]   ;;  %v3823_v59 = vld [vmem:[#allocation4 + $0x120] ss:$16 sps:$4 sm:$0xff]  }
 0x1d4   :  { %1283 = vmatprep.subr.bf16.mxu0 %v3822_v57  ;;  %1171 = vmatpush1.bf16.msra.mxu1 %v3823_v59  ;;  %v3835_v8 = vld [vmem:[#allocation4 + $0x160] ss:$16 sps:$4 sm:$0xff]   ;;  %v3840_v57 = vld [vmem:[#allocation4 + $0x18c] ss:$16 sps:$4 sm:$0xff]  }
 0x1d5   :  { %v495_v53 = vadd.f32 %v460_v12, %v459_v31  ;;  %v461_v55 = vmul.f32 %v4512_v10, %v4512_v10  ;;  %v462_v14 = vmul.f32 %v4515_v30, %v4515_v30  ;;  %1284 = vmatpush1.bf16.msra.mxu0 %v3820_v22  ;;  %1172 = vmatprep.subr.bf16.mxu1 %v3824_v38  ;;  %v3841_v22 = vld [vmem:[#allocation4 + $0x180] ss:$16 sps:$4 sm:$0xff]  }
 0x1d6   :  { %v374_v20 = vpop.xlane.xlu0 %373  ;;  %1285 = vmatprep.subr.bf16.mxu0 %v3828_v50  ;;  %v3844_v50 = vld [vmem:[#allocation4 + $0x1a8] ss:$16 sps:$4 sm:$0xff]  }
 0x1d7   :  { %v409_v24 = vmul.f32 0.00390625, %v374_v20  ;;  %496 = vadd.xlane.f32.xlu0 %v495_v53  ;;  %v498_v34 = vadd.f32 %v462_v14, %v461_v55  ;;  %v3838_v20 = vld [vmem:[#allocation4 + $0x188] ss:$16 sps:$4 sm:$0xff]  }
 0x1d8   :  { %v377_v33 = vpop.xlane.xlu1 %376  ;;  %1173 = vmatpush1.bf16.msra.mxu1 %v3829_v51 }
 0x1d9   :  { %v4526_v37 = vsub.f32 %v4386_v63, %v409_v24  ;;  %v4529_v35 = vsub.f32 %v4389_v1, %v409_v24  ;;  %v410_v41 = vmul.f32 0.00390625, %v377_v33  ;;  %499 = vadd.xlane.f32.xlu1 %v498_v34  ;;  %1286 = vmatpush1.bf16.msra.mxu0 %v3826_v39  ;;  %v3847_v39 = vld [vmem:[#allocation4 + $0x1a0] ss:$16 sps:$4 sm:$0xff]  }
 0x1da   :  { %1174 = vmatprep.subr.bf16.mxu1 %v3830_v2  ;;  %v3848_v2 = vld [vmem:[#allocation4 + $0x1c4] ss:$16 sps:$4 sm:$0xff]  }
 0x1db   :  { %v4532_v54 = vsub.f32 %v4392_v3, %v410_v41  ;;  %v4535_v43 = vsub.f32 %v4395_v5, %v410_v41  ;;  %v463_v63 = vmul.f32 %v4526_v37, %v4526_v37  ;;  %v464_v1 = vmul.f32 %v4529_v35, %v4529_v35  ;;  %v3834_v5 = vld [vmem:[#allocation4 + $0x16c] ss:$16 sps:$4 sm:$0xff]   ;;  %v3842_v41 = vld [vmem:[#allocation4 + $0x1a4] ss:$16 sps:$4 sm:$0xff]  }
 0x1dc   :  { %1287 = vmatprep.subr.bf16.mxu0 %v3834_v5  ;;  %1175 = vmatpush1.bf16.msra.mxu1 %v3835_v8  ;;  %v3852_v5 = vld [vmem:[#allocation4 + $0x1cc] ss:$16 sps:$4 sm:$0xff]  }
 0x1dd   :  { %v501_v0 = vadd.f32 %v464_v1, %v463_v63  ;;  %v465_v45 = vmul.f32 %v4532_v54, %v4532_v54  ;;  %v466_v3 = vmul.f32 %v4535_v43, %v4535_v43  ;;  %1288 = vmatpush1.bf16.msra.mxu0 %v3832_v6  ;;  %1176 = vmatprep.subr.bf16.mxu1 %v3836_v18  ;;  %v3853_v6 = vld [vmem:[#allocation4 + $0x1c0] ss:$16 sps:$4 sm:$0xff]  }
 0x1de   :  { %v380_v4 = vpop.xlane.xlu0 %379  ;;  %1289 = vmatprep.subr.bf16.mxu0 %v3840_v57  ;;  %v3856_v57 = vld [vmem:[#allocation4 + $0x1e8] ss:$16 sps:$4 sm:$0xff]  }
 0x1df   :  { %v411_v49 = vmul.f32 0.00390625, %v380_v4  ;;  %502 = vadd.xlane.f32.xlu0 %v501_v0  ;;  %v504_v31 = vadd.f32 %v466_v3, %v465_v45  ;;  %v3850_v4 = vld [vmem:[#allocation4 + $0x1c8] ss:$16 sps:$4 sm:$0xff]  }
 0x1e0   :  { %v383_v12 = vpop.xlane.xlu1 %382  ;;  %1177 = vmatpush1.bf16.msra.mxu1 %v3841_v22 }
 0x1e1   :  { %v4546_v53 = vsub.f32 %v4402_v9, %v411_v49  ;;  %v4549_v55 = vsub.f32 %v4405_v11, %v411_v49  ;;  %v412_v14 = vmul.f32 0.00390625, %v383_v12  ;;  %505 = vadd.xlane.f32.xlu1 %v504_v31  ;;  %1290 = vmatpush1.bf16.msra.mxu0 %v3838_v20  ;;  %v3859_v20 = vld [vmem:[#allocation4 + $0x1e0] ss:$16 sps:$4 sm:$0xff]  }
 0x1e2   :  { %1178 = vmatprep.subr.bf16.mxu1 %v3842_v41 }
 0x1e3   :  { %v4552_v59 = vsub.f32 %v4408_v13, %v412_v14  ;;  %v4555_v24 = vsub.f32 %v4411_v15, %v412_v14  ;;  %v467_v9 = vmul.f32 %v4546_v53, %v4546_v53  ;;  %v468_v11 = vmul.f32 %v4549_v55, %v4549_v55  ;;  %v3846_v15 = vld [vmem:[#allocation4 + $0x1ac] ss:$16 sps:$4 sm:$0xff]   ;;  %v3854_v14 = vld [vmem:[#allocation4 + $0x1e4] ss:$16 sps:$4 sm:$0xff]  }
 0x1e4   :  { %1291 = vmatprep.subr.bf16.mxu0 %v3846_v15  ;;  %1179 = vmatpush1.bf16.msra.mxu1 %v3847_v39 }
 0x1e5   :  { %v507_v34 = vadd.f32 %v468_v11, %v467_v9  ;;  %v469_v33 = vmul.f32 %v4552_v59, %v4552_v59  ;;  %v470_v13 = vmul.f32 %v4555_v24, %v4555_v24  ;;  %1292 = vmatpush1.bf16.msra.mxu0 %v3844_v50  ;;  %1180 = vmatprep.subr.bf16.mxu1 %v3848_v2 }
 0x1e6   :  { %v386_v38 = vpop.xlane.xlu0 %385  ;;  %1293 = vmatprep.subr.bf16.mxu0 %v3852_v5 }
 0x1e7   :  { %v413_v51 = vmul.f32 0.00390625, %v386_v38  ;;  %508 = vadd.xlane.f32.xlu0 %v507_v34  ;;  %v510_v63 = vadd.f32 %v470_v13, %v469_v33 }
 0x1e8   :  { %v389_v1 = vpop.xlane.xlu1 %388  ;;  %1181 = vmatpush1.bf16.msra.mxu1 %v3853_v6 }
 0x1e9   :  { %v4566_v0 = vsub.f32 %v4418_v19, %v413_v51  ;;  %v4569_v45 = vsub.f32 %v4421_v21, %v413_v51  ;;  %v414_v3 = vmul.f32 0.00390625, %v389_v1  ;;  %511 = vadd.xlane.f32.xlu1 %v510_v63  ;;  %1294 = vmatpush1.bf16.msra.mxu0 %v3850_v4 }
 0x1ea   :  { %1182 = vmatprep.subr.bf16.mxu1 %v3854_v14 }
 0x1eb   :  { %v4572_v8 = vsub.f32 %v4424_v23, %v414_v3  ;;  %v4575_v49 = vsub.f32 %v4427_v25, %v414_v3  ;;  %v471_v19 = vmul.f32 %v4566_v0, %v4566_v0  ;;  %v472_v21 = vmul.f32 %v4569_v45, %v4569_v45  ;;  %v3858_v25 = vld [vmem:[#allocation4 + $0x1ec] ss:$16 sps:$4 sm:$0xff]  }
 0x1ec   :  { %1295 = vmatprep.subr.bf16.mxu0 %v3858_v25  ;;  %1183 = vmatpush1.bf16.msra.mxu1 %v3859_v20 }
 0x1ed   :  { %v513_v31 = vadd.f32 %v472_v21, %v471_v19  ;;  %v473_v12 = vmul.f32 %v4572_v8, %v4572_v8  ;;  %v474_v23 = vmul.f32 %v4575_v49, %v4575_v49  ;;  %1296 = vmatpush1.bf16.msra.mxu0 %v3856_v57 }
 0x1ee   :  { %v392_v18 = vpop.xlane.xlu0 %391 }
 0x1ef   :  { %v415_v22 = vmul.f32 0.00390625, %v392_v18  ;;  %514 = vadd.xlane.f32.xlu0 %v513_v31  ;;  %v516_v9 = vadd.f32 %v474_v23, %v473_v12 }
 0x1f0   :  { %v395_v11 = vpop.xlane.xlu1 %394 }
 0x1f1   :  { %v4586_v34 = vsub.f32 %v4434_v36, %v415_v22  ;;  %v4589_v33 = vsub.f32 %v4437_v40, %v415_v22  ;;  %v416_v13 = vmul.f32 0.00390625, %v395_v11  ;;  %517 = vadd.xlane.f32.xlu1 %v516_v9  ;;  %v351_v22 = vld [vmem:[#allocation2 + $0x1] ss:$8 sm:$0x3] }
 0x1f3   :  { %v4592_v41 = vsub.f32 %v4440_v42, %v416_v13  ;;  %v4595_v15 = vsub.f32 %v4443_v46, %v416_v13  ;;  %v475_v38 = vmul.f32 %v4586_v34, %v4586_v34  ;;  %v476_v50 = vmul.f32 %v4589_v33, %v4589_v33  ;;  %v353_v13 = vld [vmem:[#allocation2 + $0x2] ss:$8 sm:$0x3] }
 0x1f5   :  { %v519_v36 = vadd.f32 %v476_v50, %v475_v38  ;;  %v477_v40 = vmul.f32 %v4592_v41, %v4592_v41  ;;  %v478_v39 = vmul.f32 %v4595_v15, %v4595_v15  ;;  %v4626_v38 = vrot.slane %v351_v22, %v4326_v27 }
 0x1f6   :  { %v398_v51 = vpop.xlane.xlu0 %397  ;;  %v4629_v50 = vrot.slane %v351_v22, %v4329_v29 }
 0x1f7   :  { %v417_v63 = vmul.f32 0.00390625, %v398_v51  ;;  %520 = vadd.xlane.f32.xlu0 %v519_v36  ;;  %v522_v42 = vadd.f32 %v478_v39, %v477_v40 }
 0x1f8   :  { %v401_v1 = vpop.xlane.xlu1 %400 }
 0x1f9   :  { %v4606_v46 = vsub.f32 %v4450_v52, %v417_v63  ;;  %v4609_v3 = vsub.f32 %v4453_v56, %v417_v63  ;;  %v418_v2 = vmul.f32 0.00390625, %v401_v1  ;;  %523 = vadd.xlane.f32.xlu1 %v522_v42  ;;  %v4634_v1 = vrot.slane %v353_v13, %v4326_v27 }
 0x1fb   :  { %v4612_v5 = vsub.f32 %v4456_v60, %v418_v2  ;;  %v4615_v4 = vsub.f32 %v4459_v62, %v418_v2  ;;  %v479_v6 = vmul.f32 %v4606_v46, %v4606_v46  ;;  %v480_v19 = vmul.f32 %v4609_v3, %v4609_v3 }
 0x1fc   :  { %v4637_v2 = vrot.slane %v353_v13, %v4329_v29 }
 0x1fd   :  { %v525_v21 = vadd.f32 %v480_v19, %v479_v6  ;;  %v481_v52 = vmul.f32 %v4612_v5, %v4612_v5  ;;  %v482_v56 = vmul.f32 %v4615_v4, %v4615_v4 }
 0x1ff   :  { %526 = vadd.xlane.f32.xlu0 %v525_v21  ;;  %v528_v31 = vadd.f32 %v482_v56, %v481_v52 }
 0x201   :  { %529 = vadd.xlane.f32.xlu1 %v528_v31 }
 0x254   :  { %v485_v60 = vpop.xlane.xlu0 %484 }
 0x255   :  { %v531_v12 = vmul.f32 0.00390625, %v485_v60 }
 0x257   :  { %v547_v62 = vadd.f32 1e-05, %v531_v12 }
 0x258   :  { %v488_v23 = vpop.xlane.xlu1 %487 }
 0x259   :  { %3972 = vrsqrt.f32 %v547_v62  ;;  %v532_v14 = vmul.f32 0.00390625, %v488_v23 }
 0x25b   :  { %v548_v25 = vadd.f32 1e-05, %v532_v14 }
 0x25c   :  { %v491_v18 = vpop.xlane.xlu0 %490 }
 0x25d   :  { %3974 = vrsqrt.f32 %v548_v25  ;;  %v533_v57 = vmul.f32 0.00390625, %v491_v18 }
 0x25f   :  { %v549_v20 = vadd.f32 1e-05, %v533_v57 }
 0x260   :  { %v494_v9 = vpop.xlane.xlu1 %493 }
 0x261   :  { %3976 = vrsqrt.f32 %v549_v20  ;;  %v534_v11 = vmul.f32 0.00390625, %v494_v9 }
 0x263   :  { %v3973_v36 = vpop.eup %3972  ;;  %v550_v40 = vadd.f32 1e-05, %v534_v11 }
 0x264   :  { %v497_v39 = vpop.xlane.xlu0 %496  ;;  %v580_v51 = vmul.f32 %v3973_v36, %v4469_v17  ;;  %v579_v63 = vmul.f32 %v3973_v36, %v4466_v16 }
 0x265   :  { %3978 = vrsqrt.f32 %v550_v40  ;;  %v535_v42 = vmul.f32 0.00390625, %v497_v39 }
 0x266   :  { %v500_v6 = vpop.xlane.xlu1 %499  ;;  %v623_v19 = vmul.f32 %v4629_v50, %v580_v51  ;;  %v622_v21 = vmul.f32 %v4626_v38, %v579_v63 }
 0x267   :  { %v3975_v52 = vpop.eup %3974  ;;  %v551_v56 = vadd.f32 1e-05, %v535_v42  ;;  %v536_v31 = vmul.f32 0.00390625, %v500_v6 }
 0x268   :  { %v582_v17 = vmul.f32 %v3975_v52, %v4479_v32  ;;  %v581_v16 = vmul.f32 %v3975_v52, %v4476_v28  ;;  %v666_v12 = vadd.f32 %v4637_v2, %v623_v19  ;;  %v665_v62 = vadd.f32 %v4634_v1, %v622_v21 }
 0x269   :  { %3980 = vrsqrt.f32 %v551_v56  ;;  %v552_v60 = vadd.f32 1e-05, %v536_v31 }
 0x26a   :  { %v625_v23 = vmul.f32 %v4629_v50, %v582_v17  ;;  %v624_v14 = vmul.f32 %v4626_v38, %v581_v16  ;;  %v698_v9 = vmax.f32 %v666_v12, 0.0  ;;  %v697_v11 = vmax.f32 %v665_v62, 0.0 }
 0x26b   :  { %v3977_v25 = vpop.eup %3976  ;;  %3982 = vrsqrt.f32 %v552_v60 }
 0x26c   :  { %v503_v18 = vpop.xlane.xlu0 %502  ;;  %v668_v57 = vadd.f32 %v4637_v2, %v625_v23  ;;  %v667_v20 = vadd.f32 %v4634_v1, %v624_v14  ;;  %v584_v32 = vmul.f32 %v3977_v25, %v4489_v47  ;;  %v583_v28 = vmul.f32 %v3977_v25, %v4486_v44 }
 0x26d   :  { %v537_v22 = vmul.f32 0.00390625, %v503_v18 }
 0x26e   :  { %v506_v13 = vpop.xlane.xlu1 %505  ;;  %v700_v36 = vmax.f32 %v668_v57, 0.0  ;;  %v699_v40 = vmax.f32 %v667_v20, 0.0  ;;  %v627_v39 = vmul.f32 %v4629_v50, %v584_v32  ;;  %v626_v51 = vmul.f32 %v4626_v38, %v583_v28 }
 0x26f   :  { %v3979_v63 = vpop.eup %3978  ;;  %v553_v42 = vadd.f32 1e-05, %v537_v22  ;;  %v538_v6 = vmul.f32 0.00390625, %v506_v13 }
 0x270   :  { %v730_v19 = vpack.c.bf16 %v700_v36, %v698_v9  ;;  %v729_v21 = vpack.c.bf16 %v699_v40, %v697_v11  ;;  %v586_v52 = vmul.f32 %v3979_v63, %v4499_v61  ;;  %v670_v47 = vadd.f32 %v4637_v2, %v627_v39 }
 0x271   :  { %3984 = vrsqrt.f32 %v553_v42  ;;  %v554_v44 = vadd.f32 1e-05, %v538_v6  ;;  %v585_v56 = vmul.f32 %v3979_v63, %v4496_v58  ;;  %v669_v31 = vadd.f32 %v4634_v1, %v626_v51 }
 0x272   :  { %1184 = vmatprep.mubr.bf16.mxu1 %v730_v19  ;;  %1297 = vmatprep.mubr.bf16.mxu0 %v730_v19  ;;  %v629_v17 = vmul.f32 %v4629_v50, %v586_v52  ;;  %v702_v25 = vmax.f32 %v670_v47, 0.0 }
 0x273   :  { %v3981_v16 = vpop.eup %3980  ;;  %3986 = vrsqrt.f32 %v554_v44  ;;  %1185 = vmatmul.mubr.bf16.vlgmr.msra.gmra.mrb[0].mxu1 %v729_v21  ;;  %1298 = vmatmul.mubr.bf16.vlgmr.msra.gmra.mrb[32].mxu0 %v729_v21  ;;  %v628_v60 = vmul.f32 %v4626_v38, %v585_v56  ;;  %v701_v57 = vmax.f32 %v669_v31, 0.0 }
 0x274   :  { %v509_v12 = vpop.xlane.xlu0 %508  ;;  %v672_v61 = vadd.f32 %v4637_v2, %v629_v17  ;;  %v588_v62 = vmul.f32 %v3981_v16, %v4509_v48  ;;  %v587_v23 = vmul.f32 %v3981_v16, %v4506_v7 }
 0x275   :  { %v3983_v58 = vpop.eup %3982  ;;  %v539_v14 = vmul.f32 0.00390625, %v509_v12  ;;  %v671_v18 = vadd.f32 %v4634_v1, %v628_v60 }
 0x276   :  { %v512_v20 = vpop.xlane.xlu1 %511  ;;  %v704_v32 = vmax.f32 %v672_v61, 0.0  ;;  %v590_v28 = vmul.f32 %v3983_v58, %v4515_v30  ;;  %v631_v22 = vmul.f32 %v4629_v50, %v588_v62  ;;  %v589_v9 = vmul.f32 %v3983_v58, %v4512_v10 }
 0x277   :  { %v555_v11 = vadd.f32 1e-05, %v539_v14  ;;  %v540_v13 = vmul.f32 0.00390625, %v512_v20  ;;  %v703_v36 = vmax.f32 %v671_v18, 0.0  ;;  %v630_v48 = vmul.f32 %v4626_v38, %v587_v23 }
 0x278   :  { %v732_v7 = vpack.c.bf16 %v704_v32, %v702_v25  ;;  %v633_v40 = vmul.f32 %v4629_v50, %v590_v28  ;;  %v674_v39 = vadd.f32 %v4637_v2, %v631_v22  ;;  %v632_v51 = vmul.f32 %v4626_v38, %v589_v9 }
 0x279   :  { %3988 = vrsqrt.f32 %v555_v11  ;;  %v556_v63 = vadd.f32 1e-05, %v540_v13  ;;  %v731_v42 = vpack.c.bf16 %v703_v36, %v701_v57  ;;  %v673_v10 = vadd.f32 %v4634_v1, %v630_v48 }
 0x27a   :  { %1194 = vmatprep.mubr.bf16.mxu1 %v732_v7  ;;  %1307 = vmatprep.mubr.bf16.mxu0 %v732_v7  ;;  %v676_v30 = vadd.f32 %v4637_v2, %v633_v40  ;;  %v675_v6 = vadd.f32 %v4634_v1, %v632_v51  ;;  %v706_v52 = vmax.f32 %v674_v39, 0.0 }
 0x27b   :  { %v3985_v19 = vpop.eup %3984  ;;  %3990 = vrsqrt.f32 %v556_v63  ;;  %1195 = vmatmul.mubr.bf16.gmra.mrb[4].mxu1 %v731_v42  ;;  %1308 = vmatmul.mubr.bf16.gmra.mrb[36].mxu0 %v731_v42  ;;  %v705_v61 = vmax.f32 %v673_v10, 0.0 }
 0x27c   :  { %v515_v21 = vpop.xlane.xlu0 %514  ;;  %v708_v47 = vmax.f32 %v676_v30, 0.0  ;;  %v592_v44 = vmul.f32 %v3985_v19, %v4529_v35  ;;  %v591_v56 = vmul.f32 %v3985_v19, %v4526_v37  ;;  %v707_v16 = vmax.f32 %v675_v6, 0.0 }
 0x27d   :  { %v3987_v31 = vpop.eup %3986  ;;  %v541_v17 = vmul.f32 0.00390625, %v515_v21 }
 0x27e   :  { %v518_v60 = vpop.xlane.xlu1 %517  ;;  %v734_v12 = vpack.c.bf16 %v708_v47, %v706_v52  ;;  %v594_v62 = vmul.f32 %v3987_v31, %v4535_v43  ;;  %v635_v23 = vmul.f32 %v4629_v50, %v592_v44  ;;  %v593_v25 = vmul.f32 %v3987_v31, %v4532_v54 }
 0x27f   :  { %v557_v58 = vadd.f32 1e-05, %v541_v17  ;;  %v542_v14 = vmul.f32 0.00390625, %v518_v60  ;;  %v634_v18 = vmul.f32 %v4626_v38, %v591_v56  ;;  %v733_v20 = vpack.c.bf16 %v707_v16, %v705_v61 }
 0x280   :  { %1204 = vmatprep.mubr.bf16.mxu1 %v734_v12  ;;  %1317 = vmatprep.mubr.bf16.mxu0 %v734_v12  ;;  %v637_v37 = vmul.f32 %v4629_v50, %v594_v62  ;;  %v678_v35 = vadd.f32 %v4637_v2, %v635_v23  ;;  %v636_v32 = vmul.f32 %v4626_v38, %v593_v25 }
 0x281   :  { %3992 = vrsqrt.f32 %v557_v58  ;;  %v558_v57 = vadd.f32 1e-05, %v542_v14  ;;  %v677_v54 = vadd.f32 %v4634_v1, %v634_v18 }
 0x282   :  { %v680_v43 = vadd.f32 %v4637_v2, %v637_v37  ;;  %v679_v22 = vadd.f32 %v4634_v1, %v636_v32  ;;  %v710_v11 = vmax.f32 %v678_v35, 0.0 }
 0x283   :  { %v3989_v28 = vpop.eup %3988  ;;  %3994 = vrsqrt.f32 %v558_v57  ;;  %1205 = vmatmul.mubr.bf16.gmra.mrb[8].mxu1 %v733_v20  ;;  %1318 = vmatmul.mubr.bf16.gmra.mrb[40].mxu0 %v733_v20  ;;  %v709_v21 = vmax.f32 %v677_v54, 0.0 }
 0x284   :  { %v521_v9 = vpop.xlane.xlu0 %520  ;;  %v712_v13 = vmax.f32 %v680_v43, 0.0  ;;  %v596_v36 = vmul.f32 %v3989_v28, %v4549_v55  ;;  %v595_v48 = vmul.f32 %v3989_v28, %v4546_v53  ;;  %v711_v39 = vmax.f32 %v679_v22, 0.0 }
 0x285   :  { %v3991_v7 = vpop.eup %3990  ;;  %v543_v40 = vmul.f32 0.00390625, %v521_v9 }
 0x286   :  { %v524_v51 = vpop.xlane.xlu1 %523  ;;  %v736_v63 = vpack.c.bf16 %v712_v13, %v710_v11  ;;  %v598_v42 = vmul.f32 %v3991_v7, %v4555_v24  ;;  %v639_v30 = vmul.f32 %v4629_v50, %v596_v36  ;;  %v597_v10 = vmul.f32 %v3991_v7, %v4552_v59 }
 0x287   :  { %v559_v6 = vadd.f32 1e-05, %v543_v40  ;;  %v544_v19 = vmul.f32 0.00390625, %v524_v51  ;;  %v638_v52 = vmul.f32 %v4626_v38, %v595_v48  ;;  %v735_v24 = vpack.c.bf16 %v711_v39, %v709_v21 }
 0x288   :  { %1214 = vmatprep.mubr.bf16.mxu1 %v736_v63  ;;  %1327 = vmatprep.mubr.bf16.mxu0 %v736_v63  ;;  %v641_v53 = vmul.f32 %v4629_v50, %v598_v42  ;;  %v682_v55 = vadd.f32 %v4637_v2, %v639_v30  ;;  %v640_v47 = vmul.f32 %v4626_v38, %v597_v10 }
 0x289   :  { %3996 = vrsqrt.f32 %v559_v6  ;;  %v560_v44 = vadd.f32 1e-05, %v544_v19  ;;  %v681_v59 = vadd.f32 %v4634_v1, %v638_v52 }
 0x28a   :  { %v684_v56 = vadd.f32 %v4637_v2, %v641_v53  ;;  %v683_v31 = vadd.f32 %v4634_v1, %v640_v47  ;;  %v714_v60 = vmax.f32 %v682_v55, 0.0 }
 0x28b   :  { %v3993_v17 = vpop.eup %3992  ;;  %3998 = vrsqrt.f32 %v560_v44  ;;  %1215 = vmatmul.mubr.bf16.gmra.mrb[12].mxu1 %v735_v24  ;;  %1328 = vmatmul.mubr.bf16.gmra.mrb[44].mxu0 %v735_v24  ;;  %v713_v37 = vmax.f32 %v681_v59, 0.0 }
 0x28c   :  { %v527_v16 = vpop.xlane.xlu0 %526  ;;  %v716_v12 = vmax.f32 %v684_v56, 0.0  ;;  %v600_v61 = vmul.f32 %v3993_v17, %v4569_v45  ;;  %v599_v62 = vmul.f32 %v3993_v17, %v4566_v0  ;;  %v715_v14 = vmax.f32 %v683_v31, 0.0 }
 0x28d   :  { %v3995_v23 = vpop.eup %3994  ;;  %v545_v58 = vmul.f32 0.00390625, %v527_v16 }
 0x28e   :  { %v530_v25 = vpop.xlane.xlu1 %529  ;;  %v738_v18 = vpack.c.bf16 %v716_v12, %v714_v60  ;;  %v602_v35 = vmul.f32 %v3995_v23, %v4575_v49  ;;  %v643_v57 = vmul.f32 %v4629_v50, %v600_v61  ;;  %v601_v43 = vmul.f32 %v3995_v23, %v4572_v8 }
 0x28f   :  { %v561_v20 = vadd.f32 1e-05, %v545_v58  ;;  %v546_v32 = vmul.f32 0.00390625, %v530_v25  ;;  %v642_v28 = vmul.f32 %v4626_v38, %v599_v62  ;;  %v737_v22 = vpack.c.bf16 %v715_v14, %v713_v37 }
 0x290   :  { %1224 = vmatprep.mubr.bf16.mxu1 %v738_v18  ;;  %1337 = vmatprep.mubr.bf16.mxu0 %v738_v18  ;;  %v645_v0 = vmul.f32 %v4629_v50, %v602_v35  ;;  %v686_v45 = vadd.f32 %v4637_v2, %v643_v57  ;;  %v644_v9 = vmul.f32 %v4626_v38, %v601_v43 }
 0x291   :  { %4000 = vrsqrt.f32 %v561_v20  ;;  %v562_v54 = vadd.f32 1e-05, %v546_v32  ;;  %v685_v8 = vadd.f32 %v4634_v1, %v642_v28  ;;  %v810_v20 = vld [vmem:[#allocation2 + $0x3] ss:$8 sm:$0xf] }
 0x292   :  { %v688_v49 = vadd.f32 %v4637_v2, %v645_v0  ;;  %v687_v13 = vadd.f32 %v4634_v1, %v644_v9  ;;  %v718_v36 = vmax.f32 %v686_v45, 0.0  ;;  %v4740_v32 = vrot.slane %v810_v20, %v4329_v29 }
 0x293   :  { %v3997_v11 = vpop.eup %3996  ;;  %4002 = vrsqrt.f32 %v562_v54  ;;  %1225 = vmatmul.mubr.bf16.gmra.mrb[16].mxu1 %v737_v22  ;;  %1338 = vmatmul.mubr.bf16.gmra.mrb[48].mxu0 %v737_v22  ;;  %v717_v6 = vmax.f32 %v685_v8, 0.0 }
 0x294   :  { %v720_v48 = vmax.f32 %v688_v49, 0.0  ;;  %v604_v7 = vmul.f32 %v3997_v11, %v4589_v33  ;;  %v603_v40 = vmul.f32 %v3997_v11, %v4586_v34  ;;  %v719_v51 = vmax.f32 %v687_v13, 0.0 }
 0x295   :  { %v3999_v39 = vpop.eup %3998 }
 0x296   :  { %v740_v63 = vpack.c.bf16 %v720_v48, %v718_v36  ;;  %v606_v42 = vmul.f32 %v3999_v39, %v4595_v15  ;;  %v647_v30 = vmul.f32 %v4629_v50, %v604_v7  ;;  %v605_v10 = vmul.f32 %v3999_v39, %v4592_v41 }
 0x297   :  { %v646_v19 = vmul.f32 %v4626_v38, %v603_v40  ;;  %v739_v52 = vpack.c.bf16 %v719_v51, %v717_v6 }
 0x298   :  { %1234 = vmatprep.mubr.bf16.mxu1 %v740_v63  ;;  %1347 = vmatprep.mubr.bf16.mxu0 %v740_v63  ;;  %v649_v21 = vmul.f32 %v4629_v50, %v606_v42  ;;  %v690_v33 = vadd.f32 %v4637_v2, %v647_v30  ;;  %v648_v34 = vmul.f32 %v4626_v38, %v605_v10 }
 0x299   :  { %v689_v41 = vadd.f32 %v4634_v1, %v646_v19 }
 0x29a   :  { %v692_v53 = vadd.f32 %v4637_v2, %v649_v21  ;;  %v691_v15 = vadd.f32 %v4634_v1, %v648_v34  ;;  %v722_v47 = vmax.f32 %v690_v33, 0.0 }
 0x29b   :  { %v4001_v55 = vpop.eup %4000  ;;  %1235 = vmatmul.mubr.bf16.gmra.mrb[20].mxu1 %v739_v52  ;;  %1348 = vmatmul.mubr.bf16.gmra.mrb[52].mxu0 %v739_v52  ;;  %v721_v12 = vmax.f32 %v689_v41, 0.0 }
 0x29c   :  { %v724_v44 = vmax.f32 %v692_v53, 0.0  ;;  %v608_v24 = vmul.f32 %v4001_v55, %v4609_v3  ;;  %v607_v56 = vmul.f32 %v4001_v55, %v4606_v46  ;;  %v723_v31 = vmax.f32 %v691_v15, 0.0 }
 0x29d   :  { %v4003_v59 = vpop.eup %4002 }
 0x29e   :  { %v742_v17 = vpack.c.bf16 %v724_v44, %v722_v47  ;;  %v610_v16 = vmul.f32 %v4003_v59, %v4615_v4  ;;  %v651_v60 = vmul.f32 %v4629_v50, %v608_v24  ;;  %v609_v61 = vmul.f32 %v4003_v59, %v4612_v5 }
 0x29f   :  { %v650_v62 = vmul.f32 %v4626_v38, %v607_v56  ;;  %v741_v58 = vpack.c.bf16 %v723_v31, %v721_v12 }
 0x2a0   :  { %1244 = vmatprep.mubr.bf16.mxu1 %v742_v17  ;;  %1357 = vmatprep.mubr.bf16.mxu0 %v742_v17  ;;  %v653_v23 = vmul.f32 %v4629_v50, %v610_v16  ;;  %v694_v3 = vadd.f32 %v4637_v2, %v651_v60  ;;  %v652_v46 = vmul.f32 %v4626_v38, %v609_v61  ;;  %v4734_v38 = vsub.s32 2, %v4323_v26 }
 0x2a1   :  { %v693_v4 = vadd.f32 %v4634_v1, %v650_v62 }
 0x2a2   :  { %v696_v14 = vadd.f32 %v4637_v2, %v653_v23  ;;  %v695_v25 = vadd.f32 %v4634_v1, %v652_v46  ;;  %v726_v5 = vmax.f32 %v694_v3, 0.0  ;;  %6311 = vst [vmem:[#allocation11_spill] sm:$0xff] %v4734_v38  ;;  %v4737_v2 = vrot.slane %v810_v20, %v4326_v27 }
 0x2a3   :  { %1245 = vmatmul.mubr.bf16.gmra.mrb[24].mxu1 %v741_v58  ;;  %1358 = vmatmul.mubr.bf16.gmra.mrb[56].mxu0 %v741_v58  ;;  %v725_v57 = vmax.f32 %v693_v4, 0.0  ;;  %v4743_v1 = vsub.s32 3, %v4323_v26  ;;  %v4746_v28 = vrot.slane %v810_v20, %v4734_v38 }
 0x2a4   :  { %v728_v18 = vmax.f32 %v696_v14, 0.0  ;;  %v727_v37 = vmax.f32 %v695_v25, 0.0 }
 0x2a5   :  { %6312 = vst [vmem:[#allocation12_spill] sm:$0xff] %v4743_v1  ;;  %v4755_v49 = vrot.slane %v810_v20, %v4743_v1 }
 0x2a6   :  { %v744_v35 = vpack.c.bf16 %v728_v18, %v726_v5  ;;  %v743_v50 = vpack.c.bf16 %v727_v37, %v725_v57 }
 0x2a8   :  { %1254 = vmatprep.mubr.bf16.mxu1 %v744_v35  ;;  %1367 = vmatprep.mubr.bf16.mxu0 %v744_v35 }
 0x2ab   :  { %1255 = vmatmul.mubr.bf16.gmra.mrb[28].mxu1 %v743_v50  ;;  %1368 = vmatmul.mubr.bf16.gmra.mrb[60].mxu0 %v743_v50 }
 0x346   :  { %v1186_v43 = vpop.f32.mrb[0].mxu1  ;;  %v1299_v0 = vpop.f32.mrb[32].mxu0 }
 0x347   :  { %v4749_v45 = vadd.f32 %v1186_v43, %v4737_v2  ;;  %v1188_v54 = vpop.f32.mrb[1].mxu1  ;;  %v1301_v22 = vpop.f32.mrb[33].mxu0  ;;  %v4761_v48 = vadd.f32 %v1299_v0, %v4746_v28 }
 0x348   :  { %v4752_v9 = vadd.f32 %v1188_v54, %v4740_v32  ;;  %v1190_v11 = vpop.f32.mrb[2].mxu1  ;;  %v1303_v8 = vpop.f32.mrb[34].mxu0  ;;  %v4769_v39 = vadd.f32 %v1301_v22, %v4755_v49 }
 0x349   :  { %v4758_v26 = vadd.f32 %v1190_v11, %v4737_v2  ;;  %v1192_v13 = vpop.f32.mrb[3].mxu1  ;;  %v1305_v36 = vpop.f32.mrb[35].mxu0  ;;  %v4772_v51 = vadd.f32 %v1303_v8, %v4746_v28 }
 0x34a   :  { %v1382_v7 = vadd.f32 %v4752_v9, %v4749_v45  ;;  %v4766_v40 = vadd.f32 %v1192_v13, %v4740_v32  ;;  %v4778_v30 = vadd.f32 %v1305_v36, %v4755_v49 }
 0x34c   :  { %v1387_v63 = vadd.f32 %v4766_v40, %v4758_v26  ;;  %v1383_v42 = vadd.f32 %v1382_v7, %v4761_v48 }
 0x34e   :  { %v1196_v10 = vpop.f32.mrb[4].mxu1  ;;  %v1309_v6 = vpop.f32.mrb[36].mxu0  ;;  %v1384_v19 = vadd.f32 %v1383_v42, %v4769_v39  ;;  %v1388_v21 = vadd.f32 %v1387_v63, %v4772_v51 }
 0x34f   :  { %v4783_v33 = vadd.f32 %v1196_v10, %v4737_v2  ;;  %v1198_v34 = vpop.f32.mrb[5].mxu1  ;;  %v1311_v52 = vpop.f32.mrb[37].mxu0  ;;  %v4793_v56 = vadd.f32 %v1309_v6, %v4746_v28 }
 0x350   :  { %v4786_v53 = vadd.f32 %v1198_v34, %v4740_v32  ;;  %1385 = vadd.xlane.f32.xlu0 %v1384_v19  ;;  %v1200_v15 = vpop.f32.mrb[6].mxu1  ;;  %v1313_v55 = vpop.f32.mrb[38].mxu0  ;;  %v1389_v41 = vadd.f32 %v1388_v21, %v4778_v30  ;;  %v4801_v17 = vadd.f32 %v1311_v52, %v4755_v49 }
 0x351   :  { %v4790_v47 = vadd.f32 %v1200_v15, %v4737_v2  ;;  %v1202_v44 = vpop.f32.mrb[7].mxu1  ;;  %v1315_v24 = vpop.f32.mrb[39].mxu0  ;;  %v4804_v16 = vadd.f32 %v1313_v55, %v4746_v28 }
 0x352   :  { %v1392_v59 = vadd.f32 %v4786_v53, %v4783_v33  ;;  %v4798_v31 = vadd.f32 %v1202_v44, %v4740_v32  ;;  %1390 = vadd.xlane.f32.xlu1 %v1389_v41  ;;  %v4810_v61 = vadd.f32 %v1315_v24, %v4755_v49 }
 0x354   :  { %v1397_v60 = vadd.f32 %v4798_v31, %v4790_v47  ;;  %v1393_v12 = vadd.f32 %v1392_v59, %v4793_v56 }
 0x356   :  { %v1206_v62 = vpop.f32.mrb[8].mxu1  ;;  %v1319_v23 = vpop.f32.mrb[40].mxu0  ;;  %v1394_v3 = vadd.f32 %v1393_v12, %v4801_v17  ;;  %v1398_v58 = vadd.f32 %v1397_v60, %v4804_v16 }
 0x357   :  { %v4815_v46 = vadd.f32 %v1206_v62, %v4737_v2  ;;  %v1208_v14 = vpop.f32.mrb[9].mxu1  ;;  %v1321_v4 = vpop.f32.mrb[41].mxu0  ;;  %v4825_v20 = vadd.f32 %v1319_v23, %v4746_v28 }
 0x358   :  { %v4818_v25 = vadd.f32 %v1208_v14, %v4740_v32  ;;  %1395 = vadd.xlane.f32.xlu0 %v1394_v3  ;;  %v1210_v5 = vpop.f32.mrb[10].mxu1  ;;  %v1323_v18 = vpop.f32.mrb[42].mxu0  ;;  %v1399_v37 = vadd.f32 %v1398_v58, %v4810_v61  ;;  %v4833_v54 = vadd.f32 %v1321_v4, %v4755_v49 }
 0x359   :  { %v4822_v35 = vadd.f32 %v1210_v5, %v4737_v2  ;;  %v1212_v57 = vpop.f32.mrb[11].mxu1  ;;  %v1325_v50 = vpop.f32.mrb[43].mxu0  ;;  %v4836_v22 = vadd.f32 %v1323_v18, %v4746_v28 }
 0x35a   :  { %v1402_v43 = vadd.f32 %v4818_v25, %v4815_v46  ;;  %v4830_v0 = vadd.f32 %v1212_v57, %v4740_v32  ;;  %1400 = vadd.xlane.f32.xlu1 %v1399_v37  ;;  %v4842_v13 = vadd.f32 %v1325_v50, %v4755_v49 }
 0x35c   :  { %v1407_v11 = vadd.f32 %v4830_v0, %v4822_v35  ;;  %v1403_v8 = vadd.f32 %v1402_v43, %v4825_v20 }
 0x35e   :  { %v1216_v36 = vpop.f32.mrb[12].mxu1  ;;  %v1329_v7 = vpop.f32.mrb[44].mxu0  ;;  %v1404_v63 = vadd.f32 %v1403_v8, %v4833_v54  ;;  %v1408_v42 = vadd.f32 %v1407_v11, %v4836_v22 }
 0x35f   :  { %v4847_v10 = vadd.f32 %v1216_v36, %v4737_v2  ;;  %v1218_v6 = vpop.f32.mrb[13].mxu1  ;;  %v1331_v19 = vpop.f32.mrb[45].mxu0  ;;  %v4857_v24 = vadd.f32 %v1329_v7, %v4746_v28 }
 0x360   :  { %v4850_v21 = vadd.f32 %v1218_v6, %v4740_v32  ;;  %1405 = vadd.xlane.f32.xlu0 %v1404_v63  ;;  %v1220_v34 = vpop.f32.mrb[14].mxu1  ;;  %v1333_v52 = vpop.f32.mrb[46].mxu0  ;;  %v1409_v15 = vadd.f32 %v1408_v42, %v4842_v13  ;;  %v4865_v12 = vadd.f32 %v1331_v19, %v4755_v49 }
 0x361   :  { %v4854_v55 = vadd.f32 %v1220_v34, %v4737_v2  ;;  %v1222_v41 = vpop.f32.mrb[15].mxu1  ;;  %v1335_v44 = vpop.f32.mrb[47].mxu0  ;;  %v4868_v62 = vadd.f32 %v1333_v52, %v4746_v28 }
 0x362   :  { %v1412_v59 = vadd.f32 %v4850_v21, %v4847_v10  ;;  %v4862_v60 = vadd.f32 %v1222_v41, %v4740_v32  ;;  %1410 = vadd.xlane.f32.xlu1 %v1409_v15  ;;  %v4874_v58 = vadd.f32 %v1335_v44, %v4755_v49 }
 0x364   :  { %v1417_v23 = vadd.f32 %v4862_v60, %v4854_v55  ;;  %v1413_v3 = vadd.f32 %v1412_v59, %v4857_v24 }
 0x366   :  { %v1226_v14 = vpop.f32.mrb[16].mxu1  ;;  %v1339_v4 = vpop.f32.mrb[48].mxu0  ;;  %v1414_v5 = vadd.f32 %v1413_v3, %v4865_v12  ;;  %v1418_v18 = vadd.f32 %v1417_v23, %v4868_v62 }
 0x367   :  { %v4879_v37 = vadd.f32 %v1226_v14, %v4737_v2  ;;  %v1228_v57 = vpop.f32.mrb[17].mxu1  ;;  %v1341_v50 = vpop.f32.mrb[49].mxu0  ;;  %v4889_v6 = vadd.f32 %v1339_v4, %v4746_v28 }
 0x368   :  { %v4882_v43 = vadd.f32 %v1228_v57, %v4740_v32  ;;  %1415 = vadd.xlane.f32.xlu0 %v1414_v5  ;;  %v1230_v11 = vpop.f32.mrb[18].mxu1  ;;  %v1343_v8 = vpop.f32.mrb[50].mxu0  ;;  %v1419_v36 = vadd.f32 %v1418_v18, %v4874_v58  ;;  %v4897_v52 = vadd.f32 %v1341_v50, %v4755_v49 }
 0x369   :  { %v4886_v7 = vadd.f32 %v1230_v11, %v4737_v2  ;;  %v1232_v63 = vpop.f32.mrb[19].mxu1  ;;  %v1345_v42 = vpop.f32.mrb[51].mxu0  ;;  %v4900_v15 = vadd.f32 %v1343_v8, %v4746_v28 }
 0x36a   :  { %v1422_v19 = vadd.f32 %v4882_v43, %v4879_v37  ;;  %v4894_v34 = vadd.f32 %v1232_v63, %v4740_v32  ;;  %1420 = vadd.xlane.f32.xlu1 %v1419_v36  ;;  %v4906_v59 = vadd.f32 %v1345_v42, %v4755_v49 }
 0x36c   :  { %v1427_v41 = vadd.f32 %v4894_v34, %v4886_v7  ;;  %v1423_v44 = vadd.f32 %v1422_v19, %v4889_v6 }
 0x36e   :  { %v1236_v23 = vpop.f32.mrb[20].mxu1  ;;  %v1349_v3 = vpop.f32.mrb[52].mxu0  ;;  %v1424_v14 = vadd.f32 %v1423_v44, %v4897_v52  ;;  %v1428_v4 = vadd.f32 %v1427_v41, %v4900_v15 }
 0x36f   :  { %v4911_v5 = vadd.f32 %v1236_v23, %v4737_v2  ;;  %v1238_v18 = vpop.f32.mrb[21].mxu1  ;;  %v1351_v57 = vpop.f32.mrb[53].mxu0  ;;  %v4921_v41 = vadd.f32 %v1349_v3, %v4746_v28 }
 0x370   :  { %v4914_v50 = vadd.f32 %v1238_v18, %v4740_v32  ;;  %1425 = vadd.xlane.f32.xlu0 %v1424_v14  ;;  %v1240_v11 = vpop.f32.mrb[22].mxu1  ;;  %v1353_v8 = vpop.f32.mrb[54].mxu0  ;;  %v1429_v36 = vadd.f32 %v1428_v4, %v4906_v59  ;;  %v4929_v14 = vadd.f32 %v1351_v57, %v4755_v49 }
 0x371   :  { %v4918_v63 = vadd.f32 %v1240_v11, %v4737_v2  ;;  %v1242_v42 = vpop.f32.mrb[23].mxu1  ;;  %v1355_v19 = vpop.f32.mrb[55].mxu0  ;;  %6314 = vst [vmem:[#allocation14_spill] sm:$0xff] %v4921_v41  ;;  %v4932_v4 = vadd.f32 %v1353_v8, %v4746_v28 }
 0x372   :  { %v1432_v44 = vadd.f32 %v4914_v50, %v4911_v5  ;;  %v4926_v23 = vadd.f32 %v1242_v42, %v4740_v32  ;;  %1430 = vadd.xlane.f32.xlu1 %v1429_v36  ;;  %6316 = vst [vmem:[#allocation16_spill] sm:$0xff] %v4929_v14  ;;  %v4938_v3 = vadd.f32 %v1355_v19, %v4755_v49 }
 0x373   :  { %6313 = vst [vmem:[#allocation13_spill] sm:$0xff] %v4918_v63  ;;  %6317 = vst [vmem:[#allocation17_spill] sm:$0xff] %v4932_v4 }
 0x374   :  { %6315 = vst [vmem:[#allocation15_spill] sm:$0xff] %v4926_v23  ;;  %v1437_v18 = vadd.f32 %v4926_v23, %v4918_v63  ;;  %v1433_v11 = vadd.f32 %v1432_v44, %v4921_v41  ;;  %6318 = vst [vmem:[#allocation18_spill] sm:$0xff] %v4938_v3 }
 0x376   :  { %v1246_v38 = vpop.f32.mrb[24].mxu1  ;;  %v1359_v1 = vpop.f32.mrb[56].mxu0  ;;  %v1434_v42 = vadd.f32 %v1433_v11, %v4929_v14  ;;  %v1438_v36 = vadd.f32 %v1437_v18, %v4932_v4 }
 0x377   :  { %v4943_v57 = vadd.f32 %v1246_v38, %v4737_v2  ;;  %v1248_v27 = vpop.f32.mrb[25].mxu1  ;;  %v1361_v8 = vpop.f32.mrb[57].mxu0  ;;  %v4953_v18 = vadd.f32 %v1359_v1, %v4746_v28 }
 0x378   :  { %v4946_v29 = vadd.f32 %v1248_v27, %v4740_v32  ;;  %1435 = vadd.xlane.f32.xlu0 %v1434_v42  ;;  %v1250_v23 = vpop.f32.mrb[26].mxu1  ;;  %v1363_v44 = vpop.f32.mrb[58].mxu0  ;;  %v1439_v19 = vadd.f32 %v1438_v36, %v4938_v3  ;;  %v4961_v27 = vadd.f32 %v1361_v8, %v4755_v49 }
 0x379   :  { %6319 = vst [vmem:[#allocation19_spill] sm:$0xff] %v4943_v57  ;;  %v4950_v63 = vadd.f32 %v1250_v23, %v4737_v2  ;;  %v1252_v41 = vpop.f32.mrb[27].mxu1  ;;  %v1365_v11 = vpop.f32.mrb[59].mxu0  ;;  %6322 = vst [vmem:[#allocation22_spill] sm:$0xff] %v4953_v18  ;;  %v4964_v42 = vadd.f32 %v1363_v44, %v4746_v28 }
 0x37a   :  { %6320 = vst [vmem:[#allocation20_spill] sm:$0xff] %v4946_v29  ;;  %v1442_v38 = vadd.f32 %v4946_v29, %v4943_v57  ;;  %v4958_v4 = vadd.f32 %v1252_v41, %v4740_v32  ;;  %1440 = vadd.xlane.f32.xlu1 %v1439_v19  ;;  %v4970_v1 = vadd.f32 %v1365_v11, %v4755_v49 }
 0x37b   :  { %6321 = vst [vmem:[#allocation21_spill] sm:$0xff] %v4950_v63  ;;  %6324 = vst [vmem:[#allocation24_spill] sm:$0xff] %v4964_v42 }
 0x37c   :  { %6323 = vst [vmem:[#allocation23_spill] sm:$0xff] %v4958_v4  ;;  %v1447_v23 = vadd.f32 %v4958_v4, %v4950_v63  ;;  %v1443_v36 = vadd.f32 %v1442_v38, %v4953_v18 }
 0x37e   :  { %v1256_v3 = vpop.f32.mrb[28].mxu1  ;;  %v1369_v29 = vpop.f32.mrb[60].mxu0  ;;  %v1444_v41 = vadd.f32 %v1443_v36, %v4961_v27  ;;  %v1448_v19 = vadd.f32 %v1447_v23, %v4964_v42 }
 0x37f   :  { %v4975_v8 = vadd.f32 %v1256_v3, %v4737_v2  ;;  %v1258_v57 = vpop.f32.mrb[29].mxu1  ;;  %v1371_v44 = vpop.f32.mrb[61].mxu0  ;;  %v4985_v23 = vadd.f32 %v1369_v29, %v4746_v28 }
 0x380   :  { %v4978_v14 = vadd.f32 %v1258_v57, %v4740_v32  ;;  %1445 = vadd.xlane.f32.xlu0 %v1444_v41  ;;  %v1260_v4 = vpop.f32.mrb[30].mxu1  ;;  %v1373_v38 = vpop.f32.mrb[62].mxu0  ;;  %v1449_v11 = vadd.f32 %v1448_v19, %v4970_v1  ;;  %v4993_v57 = vadd.f32 %v1371_v44, %v4755_v49  ;;  %v3860_v44 = vld [vmem:[#allocation6] ss:$8 sps:$4 sm:$0xff]  }
 0x381   :  { %v4982_v63 = vadd.f32 %v1260_v4, %v4737_v2  ;;  %v1262_v18 = vpop.f32.mrb[31].mxu1  ;;  %v1375_v36 = vpop.f32.mrb[63].mxu0  ;;  %v4996_v41 = vadd.f32 %v1373_v38, %v4746_v28  ;;  %v3865_v28 = vld [vmem:[#allocation6 + $0x14] ss:$8 sps:$4 sm:$0xff]   ;;  %v3863_v38 = vld [vmem:[#allocation6 + $0x10] ss:$8 sps:$4 sm:$0xff]  }
 0x382   :  { %v1452_v3 = vadd.f32 %v4978_v14, %v4975_v8  ;;  %v4990_v42 = vadd.f32 %v1262_v18, %v4740_v32  ;;  %1450 = vadd.xlane.f32.xlu1 %v1449_v11  ;;  %v5002_v29 = vadd.f32 %v1375_v36, %v4755_v49  ;;  %v3862_v11 = vld [vmem:[#allocation6 + $0x4] ss:$8 sps:$4 sm:$0xff]   ;;  %v3871_v49 = vld [vmem:[#allocation6 + $0x34] ss:$8 sps:$4 sm:$0xff]   ;;  %v3869_v36 = vld [vmem:[#allocation6 + $0x30] ss:$8 sps:$4 sm:$0xff]  }
 0x383   :  { %2462 = vmatprep.subr.bf16.mxu1 %v3862_v11  ;;  %v3883_v11 = vld [vmem:[#allocation6 + $0x74] ss:$8 sps:$4 sm:$0xff]  }
 0x384   :  { %6325 = vst [vmem:[#allocation25_spill] sm:$0xff] %v4990_v42  ;;  %v1457_v2 = vadd.f32 %v4990_v42, %v4982_v63  ;;  %v1453_v4 = vadd.f32 %v1452_v3, %v4985_v23  ;;  %2463 = vmatpush1.bf16.msra.mxu1 %v3860_v44  ;;  %v3868_v42 = vld [vmem:[#allocation6 + $0x24] ss:$8 sps:$4 sm:$0xff]   ;;  %v3866_v3 = vld [vmem:[#allocation6 + $0x20] ss:$8 sps:$4 sm:$0xff]  }
 0x385   :  { %2464 = vmatprep.subr.bf16.mxu1 %v3865_v28  ;;  %v3878_v44 = vld [vmem:[#allocation6 + $0x60] ss:$8 sps:$4 sm:$0xff]   ;;  %v3881_v28 = vld [vmem:[#allocation6 + $0x70] ss:$8 sps:$4 sm:$0xff]  }
 0x386   :  { %v1454_v19 = vadd.f32 %v1453_v4, %v4993_v57  ;;  %v1458_v32 = vadd.f32 %v1457_v2, %v4996_v41  ;;  %v3874_v2 = vld [vmem:[#allocation6 + $0x44] ss:$8 sps:$4 sm:$0xff]   ;;  %v3872_v4 = vld [vmem:[#allocation6 + $0x40] ss:$8 sps:$4 sm:$0xff]  }
 0x388   :  { %1455 = vadd.xlane.f32.xlu0 %v1454_v19  ;;  %v1459_v18 = vadd.f32 %v1458_v32, %v5002_v29  ;;  %2465 = vmatpush1.bf16.msra.mxu1 %v3863_v38  ;;  %v3877_v19 = vld [vmem:[#allocation6 + $0x54] ss:$8 sps:$4 sm:$0xff]   ;;  %v3875_v32 = vld [vmem:[#allocation6 + $0x50] ss:$8 sps:$4 sm:$0xff]   ;;  %v3884_v38 = vld [vmem:[#allocation6 + $0x80] ss:$8 sps:$4 sm:$0xff]  }
 0x389   :  { %2466 = vmatprep.subr.bf16.mxu1 %v3868_v42  ;;  %v3886_v42 = vld [vmem:[#allocation6 + $0x84] ss:$8 sps:$4 sm:$0xff]  }
 0x38a   :  { %1460 = vadd.xlane.f32.xlu1 %v1459_v18  ;;  %v3880_v18 = vld [vmem:[#allocation6 + $0x64] ss:$8 sps:$4 sm:$0xff]  }
 0x38c   :  { %2467 = vmatpush1.bf16.msra.mxu1 %v3866_v3  ;;  %v3889_v3 = vld [vmem:[#allocation6 + $0x94] ss:$8 sps:$4 sm:$0xff]  }
 0x38d   :  { %2468 = vmatprep.subr.bf16.mxu1 %v3871_v49  ;;  %v3887_v49 = vld [vmem:[#allocation6 + $0x90] ss:$8 sps:$4 sm:$0xff]  }
 0x390   :  { %2469 = vmatpush1.bf16.msra.mxu1 %v3869_v36 }
 0x391   :  { %2470 = vmatprep.subr.bf16.mxu1 %v3874_v2 }
 0x394   :  { %2471 = vmatpush1.bf16.msra.mxu1 %v3872_v4 }
 0x395   :  { %2472 = vmatprep.subr.bf16.mxu1 %v3877_v19 }
 0x398   :  { %2473 = vmatpush1.bf16.msra.mxu1 %v3875_v32 }
 0x399   :  { %2474 = vmatprep.subr.bf16.mxu1 %v3880_v18 }
 0x39c   :  { %2475 = vmatpush1.bf16.msra.mxu1 %v3878_v44 }
 0x39d   :  { %2476 = vmatprep.subr.bf16.mxu1 %v3883_v11 }
 0x3a0   :  { %2477 = vmatpush1.bf16.msra.mxu1 %v3881_v28 }
 0x3a1   :  { %2478 = vmatprep.subr.bf16.mxu1 %v3886_v42 }
 0x3a4   :  { %2479 = vmatpush1.bf16.msra.mxu1 %v3884_v38 }
 0x3a5   :  { %2480 = vmatprep.subr.bf16.mxu1 %v3889_v3 }
 0x3a8   :  { %2481 = vmatpush1.bf16.msra.mxu1 %v3887_v49 }
 0x3dd   :  { %v1386_v36 = vpop.xlane.xlu0 %1385 }
 0x3de   :  { %v1463_v2 = vmul.f32 0.001953125, %v1386_v36 }
 0x3df   :  { %v1391_v4 = vpop.xlane.xlu1 %1390 }
 0x3e0   :  { %v5008_v19 = vsub.f32 %v4749_v45, %v1463_v2  ;;  %v5011_v32 = vsub.f32 %v4752_v9, %v1463_v2  ;;  %v1464_v18 = vmul.f32 0.001953125, %v1391_v4  ;;  %v5014_v44 = vsub.f32 %v4761_v48, %v1463_v2 }
 0x3e1   :  { %v5017_v11 = vsub.f32 %v4769_v39, %v1463_v2 }
 0x3e2   :  { %6326 = vst [vmem:[#allocation26_spill] sm:$0xff] %v5008_v19  ;;  %6327 = vst [vmem:[#allocation27_spill] sm:$0xff] %v5014_v44  ;;  %v5020_v28 = vsub.f32 %v4758_v26, %v1464_v18  ;;  %v5023_v42 = vsub.f32 %v4766_v40, %v1464_v18  ;;  %v1543_v45 = vmul.f32 %v5008_v19, %v5008_v19 }
 0x3e3   :  { %v1544_v9 = vmul.f32 %v5011_v32, %v5011_v32  ;;  %v5030_v38 = vsub.f32 %v4772_v51, %v1464_v18  ;;  %v1545_v48 = vmul.f32 %v5014_v44, %v5014_v44  ;;  %v5039_v49 = vsub.f32 %v4778_v30, %v1464_v18 }
 0x3e4   :  { %6328 = vst [vmem:[#allocation28_spill] sm:$0xff] %v5020_v28  ;;  %6329 = vst [vmem:[#allocation29_spill] sm:$0xff] %v5023_v42  ;;  %v1547_v26 = vmul.f32 %v5020_v28, %v5020_v28  ;;  %v1548_v40 = vmul.f32 %v5023_v42, %v5023_v42  ;;  %v1546_v2 = vmul.f32 %v5017_v11, %v5017_v11 }
 0x3e5   :  { %v1607_v39 = vadd.f32 %v1544_v9, %v1543_v45  ;;  %v1396_v3 = vpop.xlane.xlu0 %1395  ;;  %v1549_v45 = vmul.f32 %v5030_v38, %v5030_v38  ;;  %v1550_v30 = vmul.f32 %v5039_v49, %v5039_v49 }
 0x3e6   :  { %v1465_v36 = vmul.f32 0.001953125, %v1396_v3  ;;  %v1612_v4 = vadd.f32 %v1548_v40, %v1547_v26 }
 0x3e7   :  { %v1608_v51 = vadd.f32 %v1607_v39, %v1545_v48  ;;  %v1401_v19 = vpop.xlane.xlu1 %1400 }
 0x3e8   :  { %v5046_v9 = vsub.f32 %v4783_v33, %v1465_v36  ;;  %v5049_v28 = vsub.f32 %v4786_v53, %v1465_v36  ;;  %v1466_v42 = vmul.f32 0.001953125, %v1401_v19  ;;  %v1613_v18 = vadd.f32 %v1612_v4, %v1549_v45 }
 0x3e9   :  { %v1609_v44 = vadd.f32 %v1608_v51, %v1546_v2  ;;  %v5054_v3 = vsub.f32 %v4793_v56, %v1465_v36  ;;  %v5057_v48 = vsub.f32 %v4801_v17, %v1465_v36 }
 0x3ea   :  { %v5060_v39 = vsub.f32 %v4790_v47, %v1466_v42  ;;  %v5063_v33 = vsub.f32 %v4798_v31, %v1466_v42  ;;  %v1551_v53 = vmul.f32 %v5046_v9, %v5046_v9  ;;  %v1552_v19 = vmul.f32 %v5049_v28, %v5049_v28 }
 0x3eb   :  { %1610 = vadd.xlane.f32.xlu0 %v1609_v44  ;;  %v1614_v26 = vadd.f32 %v1613_v18, %v1550_v30  ;;  %v5070_v56 = vsub.f32 %v4804_v16, %v1466_v42  ;;  %v1553_v17 = vmul.f32 %v5054_v3, %v5054_v3  ;;  %v5079_v36 = vsub.f32 %v4810_v61, %v1466_v42 }
 0x3ec   :  { %v1617_v40 = vadd.f32 %v1552_v19, %v1551_v53  ;;  %v1555_v47 = vmul.f32 %v5060_v39, %v5060_v39  ;;  %v1556_v31 = vmul.f32 %v5063_v33, %v5063_v33  ;;  %v1554_v16 = vmul.f32 %v5057_v48, %v5057_v48 }
 0x3ed   :  { %1615 = vadd.xlane.f32.xlu1 %v1614_v26  ;;  %v1406_v44 = vpop.xlane.xlu0 %1405  ;;  %v1557_v30 = vmul.f32 %v5070_v56, %v5070_v56  ;;  %v1558_v61 = vmul.f32 %v5079_v36, %v5079_v36 }
 0x3ee   :  { %v1467_v2 = vmul.f32 0.001953125, %v1406_v44  ;;  %v1618_v51 = vadd.f32 %v1617_v40, %v1553_v17  ;;  %v1622_v4 = vadd.f32 %v1556_v31, %v1555_v47 }
 0x3ef   :  { %v1411_v45 = vpop.xlane.xlu1 %1410 }
 0x3f0   :  { %v5086_v18 = vsub.f32 %v4815_v46, %v1467_v2  ;;  %v5089_v53 = vsub.f32 %v4818_v25, %v1467_v2  ;;  %v1468_v19 = vmul.f32 0.001953125, %v1411_v45  ;;  %v1619_v26 = vadd.f32 %v1618_v51, %v1554_v16 }
 0x3f1   :  { %v1623_v42 = vadd.f32 %v1622_v4, %v1557_v30  ;;  %v5094_v44 = vsub.f32 %v4825_v20, %v1467_v2  ;;  %v5097_v17 = vsub.f32 %v4833_v54, %v1467_v2 }
 0x3f2   :  { %v5100_v40 = vsub.f32 %v4822_v35, %v1468_v19  ;;  %v5103_v46 = vsub.f32 %v4830_v0, %v1468_v19  ;;  %1620 = vadd.xlane.f32.xlu0 %v1619_v26  ;;  %v1559_v25 = vmul.f32 %v5086_v18, %v5086_v18  ;;  %v1560_v47 = vmul.f32 %v5089_v53, %v5089_v53 }
 0x3f3   :  { %v1624_v31 = vadd.f32 %v1623_v42, %v1558_v61  ;;  %v5110_v20 = vsub.f32 %v4836_v22, %v1468_v19  ;;  %v1561_v54 = vmul.f32 %v5094_v44, %v5094_v44  ;;  %v5119_v51 = vsub.f32 %v4842_v13, %v1468_v19 }
 0x3f4   :  { %v1627_v2 = vadd.f32 %v1560_v47, %v1559_v25  ;;  %v1563_v35 = vmul.f32 %v5100_v40, %v5100_v40  ;;  %v1564_v0 = vmul.f32 %v5103_v46, %v5103_v46  ;;  %v1562_v22 = vmul.f32 %v5097_v17, %v5097_v17 }
 0x3f5   :  { %1625 = vadd.xlane.f32.xlu1 %v1624_v31  ;;  %v1416_v16 = vpop.xlane.xlu0 %1415  ;;  %v1565_v61 = vmul.f32 %v5110_v20, %v5110_v20  ;;  %v1566_v13 = vmul.f32 %v5119_v51, %v5119_v51 }
 0x3f6   :  { %v1469_v4 = vmul.f32 0.001953125, %v1416_v16  ;;  %v1628_v45 = vadd.f32 %v1627_v2, %v1561_v54  ;;  %v1632_v30 = vadd.f32 %v1564_v0, %v1563_v35 }
 0x3f7   :  { %v1421_v26 = vpop.xlane.xlu1 %1420 }
 0x3f8   :  { %v5126_v42 = vsub.f32 %v4847_v10, %v1469_v4  ;;  %v5129_v25 = vsub.f32 %v4850_v21, %v1469_v4  ;;  %v1470_v47 = vmul.f32 0.001953125, %v1421_v26  ;;  %v1629_v31 = vadd.f32 %v1628_v45, %v1562_v22  ;;  %v3892_v22 = vld [vmem:[#allocation6 + $0xa4] ss:$8 sps:$4 sm:$0xff]   ;;  %v3890_v26 = vld [vmem:[#allocation6 + $0xa0] ss:$8 sps:$4 sm:$0xff]  }
 0x3f9   :  { %v1633_v19 = vadd.f32 %v1632_v30, %v1565_v61  ;;  %v5134_v16 = vsub.f32 %v4857_v24, %v1469_v4  ;;  %v5137_v54 = vsub.f32 %v4865_v12, %v1469_v4  ;;  %2482 = vmatprep.subr.bf16.mxu1 %v3892_v22 }
 0x3fa   :  { %v5140_v2 = vsub.f32 %v4854_v55, %v1470_v47  ;;  %v5143_v10 = vsub.f32 %v4862_v60, %v1470_v47  ;;  %1630 = vadd.xlane.f32.xlu0 %v1629_v31  ;;  %v1567_v21 = vmul.f32 %v5126_v42, %v5126_v42  ;;  %v1568_v35 = vmul.f32 %v5129_v25, %v5129_v25 }
 0x3fb   :  { %6330 = vst [vmem:[#allocation30_spill] sm:$0xff] %v5134_v16  ;;  %6331 = vst [vmem:[#allocation31_spill] sm:$0xff] %v5137_v54  ;;  %v1634_v0 = vadd.f32 %v1633_v19, %v1566_v13  ;;  %v5150_v24 = vsub.f32 %v4868_v62, %v1470_v47  ;;  %v1569_v12 = vmul.f32 %v5134_v16, %v5134_v16  ;;  %2483 = vmatpush1.bf16.msra.mxu1 %v3890_v26  ;;  %v3895_v16 = vld [vmem:[#allocation6 + $0xb4] ss:$8 sps:$4 sm:$0xff]  }
 0x3fc   :  { %v1637_v4 = vadd.f32 %v1568_v35, %v1567_v21  ;;  %v1571_v55 = vmul.f32 %v5140_v2, %v5140_v2  ;;  %v1572_v60 = vmul.f32 %v5143_v10, %v5143_v10  ;;  %v5159_v30 = vsub.f32 %v4874_v58, %v1470_v47  ;;  %v3893_v35 = vld [vmem:[#allocation6 + $0xb0] ss:$8 sps:$4 sm:$0xff]   ;;  %2484 = vmatprep.subr.bf16.mxu1 %v3895_v16 }
 0x3fd   :  { %6332 = vst [vmem:[#allocation32_spill] sm:$0xff] %v5150_v24  ;;  %1635 = vadd.xlane.f32.xlu1 %v1634_v0  ;;  %v1426_v45 = vpop.xlane.xlu0 %1425  ;;  %v1570_v62 = vmul.f32 %v5137_v54, %v5137_v54  ;;  %v1573_v21 = vmul.f32 %v5150_v24, %v5150_v24  ;;  %v3907_v24 = vld [vmem:[#allocation6 + $0xf4] ss:$8 sps:$4 sm:$0xff]  }
 0x3fe   :  { %6333 = vst [vmem:[#allocation33_spill] sm:$0xff] %v5159_v30  ;;  %v1471_v61 = vmul.f32 0.001953125, %v1426_v45  ;;  %v1638_v31 = vadd.f32 %v1637_v4, %v1569_v12  ;;  %v1642_v13 = vadd.f32 %v1572_v60, %v1571_v55  ;;  %v1574_v12 = vmul.f32 %v5159_v30, %v5159_v30 }
 0x3ff   :  { %v1431_v19 = vpop.xlane.xlu1 %1430  ;;  %2485 = vmatpush1.bf16.msra.mxu1 %v3893_v35 }
 0x400   :  { %v5166_v0 = vsub.f32 %v4879_v37, %v1471_v61  ;;  %v5169_v58 = vsub.f32 %v4882_v43, %v1471_v61  ;;  %v1472_v47 = vmul.f32 0.001953125, %v1431_v19  ;;  %v1639_v45 = vadd.f32 %v1638_v31, %v1570_v62  ;;  %v3896_v19 = vld [vmem:[#allocation6 + $0xc0] ss:$8 sps:$4 sm:$0xff]  }
 0x401   :  { %v1643_v4 = vadd.f32 %v1642_v13, %v1573_v21  ;;  %v5174_v55 = vsub.f32 %v4889_v6, %v1471_v61  ;;  %v5177_v60 = vsub.f32 %v4897_v52, %v1471_v61  ;;  %v3898_v61 = vld [vmem:[#allocation6 + $0xc4] ss:$8 sps:$4 sm:$0xff]  }
 0x402   :  { %v5180_v22 = vsub.f32 %v4886_v7, %v1472_v47  ;;  %v5183_v37 = vsub.f32 %v4894_v34, %v1472_v47  ;;  %1640 = vadd.xlane.f32.xlu0 %v1639_v45  ;;  %v1575_v43 = vmul.f32 %v5166_v0, %v5166_v0  ;;  %v1576_v26 = vmul.f32 %v5169_v58, %v5169_v58 }
 0x403   :  { %6334 = vst [vmem:[#allocation34_spill] sm:$0xff] %v5174_v55  ;;  %6335 = vst [vmem:[#allocation35_spill] sm:$0xff] %v5177_v60  ;;  %v1644_v62 = vadd.f32 %v1643_v4, %v1574_v12  ;;  %v5190_v6 = vsub.f32 %v4900_v15, %v1472_v47  ;;  %v1577_v52 = vmul.f32 %v5174_v55, %v5174_v55  ;;  %2486 = vmatprep.subr.bf16.mxu1 %v3898_v61  ;;  %v6340_v61 = vld [vmem:[#allocation16_spill] sm:$0xff] }
 0x404   :  { %v1647_v7 = vadd.f32 %v1576_v26, %v1575_v43  ;;  %v1579_v34 = vmul.f32 %v5180_v22, %v5180_v22  ;;  %v1580_v16 = vmul.f32 %v5183_v37, %v5183_v37  ;;  %v5199_v13 = vsub.f32 %v4906_v59, %v1472_v47  ;;  %2487 = vmatpush1.bf16.msra.mxu1 %v3896_v19  ;;  %v3899_v43 = vld [vmem:[#allocation6 + $0xd0] ss:$8 sps:$4 sm:$0xff]   ;;  %v3901_v26 = vld [vmem:[#allocation6 + $0xd4] ss:$8 sps:$4 sm:$0xff]   ;;  %v6342_v19 = vld [vmem:[#allocation13_spill] sm:$0xff] }
 0x405   :  { %6336 = vst [vmem:[#allocation36_spill] sm:$0xff] %v5190_v6  ;;  %1645 = vadd.xlane.f32.xlu1 %v1644_v62  ;;  %v1436_v31 = vpop.xlane.xlu0 %1435  ;;  %v1578_v21 = vmul.f32 %v5177_v60, %v5177_v60  ;;  %v1581_v4 = vmul.f32 %v5190_v6, %v5190_v6  ;;  %2488 = vmatprep.subr.bf16.mxu1 %v3901_v26 }
 0x406   :  { %6337 = vst [vmem:[#allocation37_spill] sm:$0xff] %v5199_v13  ;;  %v1473_v15 = vmul.f32 0.001953125, %v1436_v31  ;;  %v1648_v35 = vadd.f32 %v1647_v7, %v1577_v52  ;;  %v1652_v45 = vadd.f32 %v1580_v16, %v1579_v34  ;;  %v1582_v52 = vmul.f32 %v5199_v13, %v5199_v13  ;;  %v6338_v34 = vld [vmem:[#allocation14_spill] sm:$0xff]  ;;  %v3905_v13 = vld [vmem:[#allocation6 + $0xf0] ss:$8 sps:$4 sm:$0xff]  }
 0x407   :  { %v1441_v12 = vpop.xlane.xlu1 %1440 }
 0x408   :  { %v5206_v62 = vsub.f32 %v4911_v5, %v1473_v15  ;;  %v5209_v59 = vsub.f32 %v4914_v50, %v1473_v15  ;;  %v1474_v47 = vmul.f32 0.001953125, %v1441_v12  ;;  %v1649_v31 = vadd.f32 %v1648_v35, %v1578_v21  ;;  %v6343_v5 = vld [vmem:[#allocation15_spill] sm:$0xff]  ;;  %2489 = vmatpush1.bf16.msra.mxu1 %v3899_v43 }
 0x409   :  { %v1653_v7 = vadd.f32 %v1652_v45, %v1581_v4  ;;  %v5214_v16 = vsub.f32 %v6338_v34, %v1473_v15  ;;  %v5217_v6 = vsub.f32 %v6340_v61, %v1473_v15  ;;  %v6344_v45 = vld [vmem:[#allocation17_spill] sm:$0xff] }
 0x40a   :  { %v5220_v55 = vsub.f32 %v6342_v19, %v1474_v47  ;;  %v5223_v60 = vsub.f32 %v6343_v5, %v1474_v47  ;;  %1650 = vadd.xlane.f32.xlu0 %v1649_v31  ;;  %v1583_v50 = vmul.f32 %v5206_v62, %v5206_v62  ;;  %v1584_v21 = vmul.f32 %v5209_v59, %v5209_v59  ;;  %v3904_v34 = vld [vmem:[#allocation6 + $0xe4] ss:$8 sps:$4 sm:$0xff]  }
 0x40b   :  { %6339 = vst [vmem:[#allocation14_spill] sm:$0xff] %v5214_v16  ;;  %6341 = vst [vmem:[#allocation16_spill] sm:$0xff] %v5217_v6  ;;  %v1654_v35 = vadd.f32 %v1653_v7, %v1582_v52  ;;  %v5230_v12 = vsub.f32 %v6344_v45, %v1474_v47  ;;  %v1585_v15 = vmul.f32 %v5214_v16, %v5214_v16  ;;  %v6346_v19 = vld [vmem:[#allocation18_spill] sm:$0xff]  ;;  %2490 = vmatprep.subr.bf16.mxu1 %v3904_v34 }
 0x40c   :  { %v1657_v4 = vadd.f32 %v1584_v21, %v1583_v50  ;;  %v1587_v26 = vmul.f32 %v5220_v55, %v5220_v55  ;;  %v1588_v31 = vmul.f32 %v5223_v60, %v5223_v60  ;;  %v5239_v5 = vsub.f32 %v6346_v19, %v1474_v47  ;;  %v3902_v52 = vld [vmem:[#allocation6 + $0xe0] ss:$8 sps:$4 sm:$0xff]   ;;  %v6349_v47 = vld [vmem:[#allocation20_spill] sm:$0xff] }
 0x40d   :  { %6345 = vst [vmem:[#allocation13_spill] sm:$0xff] %v5230_v12  ;;  %1655 = vadd.xlane.f32.xlu1 %v1654_v35  ;;  %v1446_v61 = vpop.xlane.xlu0 %1445  ;;  %v1586_v43 = vmul.f32 %v5217_v6, %v5217_v6  ;;  %v1589_v21 = vmul.f32 %v5230_v12, %v5230_v12  ;;  %2491 = vmatpush1.bf16.msra.mxu1 %v3902_v52  ;;  %v6348_v35 = vld [vmem:[#allocation19_spill] sm:$0xff]  ;;  %v6353_v52 = vld [vmem:[#allocation21_spill] sm:$0xff] }
 0x40e   :  { %6347 = vst [vmem:[#allocation15_spill] sm:$0xff] %v5239_v5  ;;  %v1475_v7 = vmul.f32 0.001953125, %v1446_v61  ;;  %v1658_v45 = vadd.f32 %v1657_v4, %v1585_v15  ;;  %v1662_v16 = vadd.f32 %v1588_v31, %v1587_v26  ;;  %v1590_v15 = vmul.f32 %v5239_v5, %v5239_v5  ;;  %v6350_v26 = vld [vmem:[#allocation22_spill] sm:$0xff]  ;;  %2492 = vmatprep.subr.bf16.mxu1 %v3907_v24 }
 0x40f   :  { %v1451_v50 = vpop.xlane.xlu1 %1450 }
 0x410   :  { %v5246_v30 = vsub.f32 %v6348_v35, %v1475_v7  ;;  %v5249_v19 = vsub.f32 %v6349_v47, %v1475_v7  ;;  %v1476_v61 = vmul.f32 0.001953125, %v1451_v50  ;;  %v1659_v54 = vadd.f32 %v1658_v45, %v1586_v43  ;;  %v6355_v35 = vld [vmem:[#allocation23_spill] sm:$0xff]  ;;  %v6356_v50 = vld [vmem:[#allocation24_spill] sm:$0xff]  ;;  %v3910_v47 = vld [vmem:[#allocation6 + $0x104] ss:$8 sps:$4 sm:$0xff]  }
 0x411   :  { %v1663_v4 = vadd.f32 %v1662_v16, %v1589_v21  ;;  %v5254_v31 = vsub.f32 %v6350_v26, %v1475_v7  ;;  %v5257_v34 = vsub.f32 %v4961_v27, %v1475_v7  ;;  %2493 = vmatpush1.bf16.msra.mxu1 %v3905_v13 }
 0x412   :  { %v5260_v12 = vsub.f32 %v6353_v52, %v1476_v61  ;;  %v5263_v6 = vsub.f32 %v6355_v35, %v1476_v61  ;;  %1660 = vadd.xlane.f32.xlu0 %v1659_v54  ;;  %v1591_v43 = vmul.f32 %v5246_v30, %v5246_v30  ;;  %v1592_v16 = vmul.f32 %v5249_v19, %v5249_v19 }
 0x413   :  { %6351 = vst [vmem:[#allocation17_spill] sm:$0xff] %v5254_v31  ;;  %6352 = vst [vmem:[#allocation18_spill] sm:$0xff] %v5257_v34  ;;  %v1664_v45 = vadd.f32 %v1663_v4, %v1590_v15  ;;  %v5270_v21 = vsub.f32 %v6356_v50, %v1476_v61  ;;  %v1593_v27 = vmul.f32 %v5254_v31, %v5254_v31  ;;  %2575 = vmatprep.subr.bf16.mxu1 %v3910_v47 }
 0x414   :  { %6354 = vst [vmem:[#allocation19_spill] sm:$0xff] %v5260_v12  ;;  %v1667_v24 = vadd.f32 %v1592_v16, %v1591_v43  ;;  %v1595_v7 = vmul.f32 %v5260_v12, %v5260_v12  ;;  %v1596_v54 = vmul.f32 %v5263_v6, %v5263_v6  ;;  %v5279_v52 = vsub.f32 %v4970_v1, %v1476_v61 }
 0x415   :  { %6357 = vst [vmem:[#allocation20_spill] sm:$0xff] %v5270_v21  ;;  %1665 = vadd.xlane.f32.xlu1 %v1664_v45  ;;  %v1456_v26 = vpop.xlane.xlu0 %1455  ;;  %v1594_v13 = vmul.f32 %v5257_v34, %v5257_v34  ;;  %v1597_v16 = vmul.f32 %v5270_v21, %v5270_v21  ;;  %v6373_v34 = vld [vmem:[#allocation27_spill] sm:$0xff] }
 0x416   :  { %6358 = vst [vmem:[#allocation22_spill] sm:$0xff] %v5279_v52  ;;  %v1477_v15 = vmul.f32 0.001953125, %v1456_v26  ;;  %v1668_v4 = vadd.f32 %v1667_v24, %v1593_v27  ;;  %v1672_v35 = vadd.f32 %v1596_v54, %v1595_v7  ;;  %v1598_v61 = vmul.f32 %v5279_v52, %v5279_v52 }
 0x417   :  { %v1461_v43 = vpop.xlane.xlu1 %1460 }
 0x418   :  { %v5286_v50 = vsub.f32 %v4975_v8, %v1477_v15  ;;  %v5289_v45 = vsub.f32 %v4978_v14, %v1477_v15  ;;  %v1478_v31 = vmul.f32 0.001953125, %v1461_v43  ;;  %v1669_v1 = vadd.f32 %v1668_v4, %v1594_v13  ;;  %v6364_v8 = vld [vmem:[#allocation25_spill] sm:$0xff] }
 0x419   :  { %v1673_v26 = vadd.f32 %v1672_v35, %v1597_v16  ;;  %v5294_v27 = vsub.f32 %v4985_v23, %v1477_v15  ;;  %v5297_v24 = vsub.f32 %v4993_v57, %v1477_v15 }
 0x41a   :  { %6359 = vst [vmem:[#allocation21_spill] sm:$0xff] %v5286_v50  ;;  %6360 = vst [vmem:[#allocation23_spill] sm:$0xff] %v5289_v45  ;;  %v5300_v7 = vsub.f32 %v4982_v63, %v1478_v31  ;;  %v5303_v54 = vsub.f32 %v6364_v8, %v1478_v31  ;;  %1670 = vadd.xlane.f32.xlu0 %v1669_v1  ;;  %v1599_v14 = vmul.f32 %v5286_v50, %v5286_v50 }
 0x41b   :  { %6361 = vst [vmem:[#allocation24_spill] sm:$0xff] %v5294_v27  ;;  %6362 = vst [vmem:[#allocation38_spill] sm:$0xff] %v5297_v24  ;;  %v1600_v47 = vmul.f32 %v5289_v45, %v5289_v45  ;;  %v1674_v13 = vadd.f32 %v1673_v26, %v1598_v61  ;;  %v1601_v23 = vmul.f32 %v5294_v27, %v5294_v27 }
 0x41c   :  { %6363 = vst [vmem:[#allocation39_spill] sm:$0xff] %v5300_v7  ;;  %6365 = vst [vmem:[#allocation25_spill] sm:$0xff] %v5303_v54  ;;  %v5312_v57 = vsub.f32 %v4996_v41, %v1478_v31  ;;  %v5315_v63 = vsub.f32 %v5002_v29, %v1478_v31  ;;  %v1603_v4 = vmul.f32 %v5300_v7, %v5300_v7  ;;  %v6374_v7 = vld [vmem:[#allocation29_spill] sm:$0xff] }
 0x41d   :  { %v1677_v15 = vadd.f32 %v1600_v47, %v1599_v14  ;;  %v1604_v35 = vmul.f32 %v5303_v54, %v5303_v54  ;;  %1675 = vadd.xlane.f32.xlu1 %v1674_v13  ;;  %v1602_v43 = vmul.f32 %v5297_v24, %v5297_v24  ;;  %v6375_v54 = vld [vmem:[#allocation28_spill] sm:$0xff] }
 0x41e   :  { %6366 = vst [vmem:[#allocation40_spill] sm:$0xff] %v5312_v57  ;;  %6367 = vst [vmem:[#allocation41_spill] sm:$0xff] %v5315_v63  ;;  %v1605_v1 = vmul.f32 %v5312_v57, %v5312_v57  ;;  %v1606_v29 = vmul.f32 %v5315_v63, %v5315_v63  ;;  %v1379_v57 = vld [vmem:[#allocation2 + $0x4] ss:$8 sm:$0xf] }
 0x41f   :  { %v1678_v16 = vadd.f32 %v1677_v15, %v1601_v23  ;;  %v1682_v41 = vadd.f32 %v1604_v35, %v1603_v4 }
 0x421   :  { %v1679_v61 = vadd.f32 %v1678_v16, %v1602_v43  ;;  %v1683_v31 = vadd.f32 %v1682_v41, %v1605_v1  ;;  %v1381_v43 = vld [vmem:[#allocation2 + $0x5] ss:$8 sm:$0xf] }
 0x422   :  { %v6368_v41 = vld [vmem:[#allocation10_spill] sm:$0xff] }
 0x423   :  { %1680 = vadd.xlane.f32.xlu0 %v1679_v61  ;;  %v1684_v26 = vadd.f32 %v1683_v31, %v1606_v29  ;;  %v5328_v61 = vrot.slane %v1379_v57, %v6368_v41  ;;  %v6369_v29 = vld [vmem:[#allocation9_spill] sm:$0xff] }
 0x424   :  { %v5331_v31 = vrot.slane %v1379_v57, %v6369_v29 }
 0x425   :  { %1685 = vadd.xlane.f32.xlu1 %v1684_v26  ;;  %v6370_v26 = vld [vmem:[#allocation12_spill] sm:$0xff] }
 0x478   :  { %v1611_v8 = vpop.xlane.xlu0 %1610 }
 0x479   :  { %v1687_v14 = vmul.f32 0.001953125, %v1611_v8  ;;  %v5334_v8 = vrot.slane %v1379_v57, %v6370_v26 }
 0x47a   :  { %v1616_v13 = vpop.xlane.xlu1 %1615 }
 0x47b   :  { %v1703_v47 = vadd.f32 1e-05, %v1687_v14  ;;  %v1688_v27 = vmul.f32 0.001953125, %v1616_v13  ;;  %v5340_v14 = vrot.slane %v1381_v43, %v6369_v29 }
 0x47d   :  { %4004 = vrsqrt.f32 %v1703_v47  ;;  %v1704_v24 = vadd.f32 1e-05, %v1688_v27  ;;  %v5343_v47 = vrot.slane %v1381_v43, %v6370_v26 }
 0x47f   :  { %4006 = vrsqrt.f32 %v1704_v24  ;;  %v1621_v23 = vpop.xlane.xlu0 %1620  ;;  %v5337_v24 = vrot.slane %v1381_v43, %v6368_v41 }
 0x480   :  { %v1689_v15 = vmul.f32 0.001953125, %v1621_v23 }
 0x482   :  { %v1705_v4 = vadd.f32 1e-05, %v1689_v15  ;;  %v1626_v35 = vpop.xlane.xlu1 %1625  ;;  %v6371_v15 = vld [vmem:[#allocation26_spill] sm:$0xff] }
 0x483   :  { %v1690_v16 = vmul.f32 0.001953125, %v1626_v35 }
 0x484   :  { %4008 = vrsqrt.f32 %v1705_v4 }
 0x485   :  { %v1706_v1 = vadd.f32 1e-05, %v1690_v16  ;;  %v6372_v16 = vld [vmem:[#allocation11_spill] sm:$0xff] }
 0x486   :  { %v5349_v63 = vrot.slane %v1379_v57, %v6372_v16  ;;  %v5352_v41 = vrot.slane %v1381_v43, %v6372_v16 }
 0x487   :  { %v4005_v27 = vpop.eup %4004  ;;  %4010 = vrsqrt.f32 %v1706_v1  ;;  %v1631_v13 = vpop.xlane.xlu0 %1630 }
 0x488   :  { %v1736_v23 = vmul.f32 %v4005_v27, %v5011_v32  ;;  %v1735_v4 = vmul.f32 %v4005_v27, %v6371_v15  ;;  %v1738_v35 = vmul.f32 %v4005_v27, %v5017_v11  ;;  %v1691_v21 = vmul.f32 0.001953125, %v1631_v13 }
 0x489   :  { %v4007_v29 = vpop.eup %4006  ;;  %v1737_v32 = vmul.f32 %v4005_v27, %v6373_v34 }
 0x48a   :  { %v1821_v52 = vmul.f32 %v5328_v61, %v1736_v23  ;;  %v1820_v26 = vmul.f32 %v5331_v31, %v1735_v4  ;;  %v1823_v1 = vmul.f32 %v5334_v8, %v1738_v35  ;;  %v1707_v5 = vadd.f32 1e-05, %v1691_v21  ;;  %v1636_v15 = vpop.xlane.xlu1 %1635 }
 0x48b   :  { %v1740_v11 = vmul.f32 %v4007_v29, %v6374_v7  ;;  %v1739_v57 = vmul.f32 %v4007_v29, %v6375_v54  ;;  %v1742_v50 = vmul.f32 %v4007_v29, %v5039_v49  ;;  %v1692_v43 = vmul.f32 0.001953125, %v1636_v15 }
 0x48c   :  { %v1906_v13 = vadd.f32 %v5337_v24, %v1821_v52  ;;  %v1905_v16 = vadd.f32 %v5340_v14, %v1820_v26  ;;  %v1908_v23 = vadd.f32 %v5343_v47, %v1823_v1  ;;  %4012 = vrsqrt.f32 %v1707_v5 }
 0x48d   :  { %v1825_v4 = vmul.f32 %v5328_v61, %v1740_v11  ;;  %v1824_v34 = vmul.f32 %v5331_v31, %v1739_v57  ;;  %v1827_v21 = vmul.f32 %v5334_v8, %v1742_v50  ;;  %v1708_v27 = vadd.f32 1e-05, %v1692_v43 }
 0x48e   :  { %v1970_v7 = vmax.f32 %v1906_v13, 0.0  ;;  %v1969_v35 = vmax.f32 %v1905_v16, 0.0  ;;  %v1972_v54 = vmax.f32 %v1908_v23, 0.0  ;;  %v5367_v45 = vpop.eup %4008  ;;  %v1741_v5 = vmul.f32 %v4007_v29, %v5030_v38 }
 0x48f   :  { %v1910_v49 = vadd.f32 %v5337_v24, %v1825_v4  ;;  %v1909_v52 = vadd.f32 %v5340_v14, %v1824_v34  ;;  %v1912_v26 = vadd.f32 %v5343_v47, %v1827_v21  ;;  %4014 = vrsqrt.f32 %v1708_v27  ;;  %v1641_v1 = vpop.xlane.xlu0 %1640 }
 0x490   :  { %v1744_v15 = vmul.f32 %v5367_v45, %v5049_v28  ;;  %v1743_v50 = vmul.f32 %v5367_v45, %v5046_v9  ;;  %v1822_v11 = vmul.f32 %v5349_v63, %v1737_v32  ;;  %v1693_v57 = vmul.f32 0.001953125, %v1641_v1  ;;  %v3908_v9 = vld [vmem:[#allocation6 + $0x100] ss:$8 sps:$4 sm:$0xff]  }
 0x491   :  { %v1974_v43 = vmax.f32 %v1910_v49, 0.0  ;;  %v1973_v13 = vmax.f32 %v1909_v52, 0.0  ;;  %v1976_v16 = vmax.f32 %v1912_v26, 0.0  ;;  %v5378_v23 = vpop.eup %4010  ;;  %v1826_v29 = vmul.f32 %v5349_v63, %v1741_v5  ;;  %v3913_v52 = vld [vmem:[#allocation6 + $0x114] ss:$8 sps:$4 sm:$0xff]  }
 0x492   :  { %v1829_v4 = vmul.f32 %v5328_v61, %v1744_v15  ;;  %v1828_v38 = vmul.f32 %v5331_v31, %v1743_v50  ;;  %v1907_v34 = vadd.f32 %v5352_v41, %v1822_v11  ;;  %v1709_v28 = vadd.f32 1e-05, %v1693_v57  ;;  %v1646_v21 = vpop.xlane.xlu1 %1645 }
 0x493   :  { %v2034_v27 = vpack.c.bf16 %v1974_v43, %v1970_v7  ;;  %v2033_v12 = vpack.c.bf16 %v1973_v13, %v1969_v35  ;;  %v1748_v32 = vmul.f32 %v5378_v23, %v5063_v33  ;;  %v1694_v49 = vmul.f32 0.001953125, %v1646_v21 }
 0x494   :  { %v1914_v26 = vadd.f32 %v5337_v24, %v1829_v4  ;;  %v1747_v1 = vmul.f32 %v5378_v23, %v5060_v39  ;;  %v1913_v15 = vadd.f32 %v5340_v14, %v1828_v38  ;;  %4016 = vrsqrt.f32 %v1709_v28  ;;  %v3911_v39 = vld [vmem:[#allocation6 + $0x110] ss:$8 sps:$4 sm:$0xff]  }
 0x495   :  { %2494 = vmatprep.mubr.bf16.mxu1 %v2034_v27  ;;  %v1833_v5 = vmul.f32 %v5328_v61, %v1748_v32  ;;  %v5391_v50 = vpack.c.bf16 %v1976_v16, %v1972_v54  ;;  %v1911_v7 = vadd.f32 %v5352_v41, %v1826_v29  ;;  %v1710_v35 = vadd.f32 1e-05, %v1694_v49  ;;  %v3916_v29 = vld [vmem:[#allocation6 + $0x124] ss:$8 sps:$4 sm:$0xff]  }
 0x496   :  { %2495 = vmatmul.mubr.bf16.vlgmr.msra.gmra.mrb[32].mxu1 %v2033_v12  ;;  %v1978_v33 = vmax.f32 %v1914_v26, 0.0  ;;  %v1832_v11 = vmul.f32 %v5331_v31, %v1747_v1  ;;  %v1977_v57 = vmax.f32 %v1913_v15, 0.0  ;;  %v5395_v43 = vpop.eup %4012  ;;  %v1971_v4 = vmax.f32 %v1907_v34, 0.0 }
 0x497   :  { %2576 = vmatpush1.bf16.msra.mxu1 %v3908_v9  ;;  %v1918_v13 = vadd.f32 %v5337_v24, %v1833_v5  ;;  %v1975_v38 = vmax.f32 %v1911_v7, 0.0  ;;  %v1746_v54 = vmul.f32 %v5367_v45, %v5057_v48  ;;  %4018 = vrsqrt.f32 %v1710_v35  ;;  %v1651_v16 = vpop.xlane.xlu0 %1650  ;;  %v3914_v5 = vld [vmem:[#allocation6 + $0x120] ss:$8 sps:$4 sm:$0xff]  }
 0x498   :  { %2577 = vmatprep.subr.bf16.mxu1 %v3913_v52  ;;  %v1917_v12 = vadd.f32 %v5340_v14, %v1832_v11  ;;  %v1752_v28 = vmul.f32 %v5395_v43, %v5089_v53  ;;  %v1751_v21 = vmul.f32 %v5395_v43, %v5086_v18  ;;  %v1695_v27 = vmul.f32 0.001953125, %v1651_v16 }
 0x499   :  { %v1982_v9 = vmax.f32 %v1918_v13, 0.0  ;;  %v5405_v32 = vpack.c.bf16 %v1975_v38, %v1971_v4  ;;  %v1750_v34 = vmul.f32 %v5378_v23, %v5079_v36  ;;  %v5409_v48 = vpop.eup %4014  ;;  %v1831_v1 = vmul.f32 %v5334_v8, %v1746_v54  ;;  %v3919_v13 = vld [vmem:[#allocation6 + $0x134] ss:$8 sps:$4 sm:$0xff]  }
 0x49a   :  { %v1981_v49 = vmax.f32 %v1917_v12, 0.0  ;;  %v1837_v52 = vmul.f32 %v5328_v61, %v1752_v28  ;;  %v1836_v26 = vmul.f32 %v5331_v31, %v1751_v21  ;;  %v1711_v53 = vadd.f32 1e-05, %v1695_v27  ;;  %v1656_v15 = vpop.xlane.xlu1 %1655  ;;  %v3917_v12 = vld [vmem:[#allocation6 + $0x130] ss:$8 sps:$4 sm:$0xff]  }
 0x49b   :  { %2578 = vmatpush1.bf16.msra.mxu1 %v3911_v39  ;;  %v2038_v18 = vpack.c.bf16 %v1982_v9, %v1978_v33  ;;  %v1756_v7 = vmul.f32 %v5409_v48, %v5103_v46  ;;  %v1755_v36 = vmul.f32 %v5409_v48, %v5100_v40  ;;  %v1696_v35 = vmul.f32 0.001953125, %v1656_v15 }
 0x49c   :  { %2579 = vmatprep.subr.bf16.mxu1 %v3916_v29  ;;  %v2037_v11 = vpack.c.bf16 %v1981_v49, %v1977_v57  ;;  %v1922_v4 = vadd.f32 %v5337_v24, %v1837_v52  ;;  %v1921_v38 = vadd.f32 %v5340_v14, %v1836_v26  ;;  %4020 = vrsqrt.f32 %v1711_v53  ;;  %v3922_v49 = vld [vmem:[#allocation6 + $0x144] ss:$8 sps:$4 sm:$0xff]  }
 0x49d   :  { %2504 = vmatprep.mubr.bf16.mxu1 %v2038_v18  ;;  %v1841_v39 = vmul.f32 %v5328_v61, %v1756_v7  ;;  %v1840_v33 = vmul.f32 %v5331_v31, %v1755_v36  ;;  %v1835_v54 = vmul.f32 %v5334_v8, %v1750_v34  ;;  %v1712_v46 = vadd.f32 1e-05, %v1696_v35 }
 0x49e   :  { %2505 = vmatmul.mubr.bf16.gmra.mrb[36].mxu1 %v2037_v11  ;;  %v1986_v16 = vmax.f32 %v1922_v4, 0.0  ;;  %v1985_v40 = vmax.f32 %v1921_v38, 0.0  ;;  %v1916_v29 = vadd.f32 %v5343_v47, %v1831_v1  ;;  %v5424_v57 = vpop.eup %4016  ;;  %v1745_v9 = vmul.f32 %v5367_v45, %v5054_v3 }
 0x49f   :  { %2580 = vmatpush1.bf16.msra.mxu1 %v3914_v5  ;;  %v1926_v28 = vadd.f32 %v5337_v24, %v1841_v39  ;;  %v1925_v21 = vadd.f32 %v5340_v14, %v1840_v33  ;;  %v1920_v27 = vadd.f32 %v5343_v47, %v1835_v54  ;;  %4022 = vrsqrt.f32 %v1712_v46  ;;  %v1661_v34 = vpop.xlane.xlu0 %1660  ;;  %v3925_v33 = vld [vmem:[#allocation6 + $0x154] ss:$8 sps:$4 sm:$0xff]  }
 0x4a0   :  { %2581 = vmatprep.subr.bf16.mxu1 %v3919_v13  ;;  %v1760_v52 = vmul.f32 %v5424_v57, %v5129_v25  ;;  %v1759_v26 = vmul.f32 %v5424_v57, %v5126_v42  ;;  %v1980_v1 = vmax.f32 %v1916_v29, 0.0  ;;  %v1697_v53 = vmul.f32 0.001953125, %v1661_v34  ;;  %v3920_v13 = vld [vmem:[#allocation6 + $0x140] ss:$8 sps:$4 sm:$0xff]  }
 0x4a1   :  { %v1990_v15 = vmax.f32 %v1926_v28, 0.0  ;;  %v1989_v18 = vmax.f32 %v1925_v21, 0.0  ;;  %v1984_v5 = vmax.f32 %v1920_v27, 0.0  ;;  %v5435_v7 = vpop.eup %4018  ;;  %v1749_v45 = vmul.f32 %v5378_v23, %v5070_v56 }
 0x4a2   :  { %v1845_v36 = vmul.f32 %v5328_v61, %v1760_v52  ;;  %v1844_v3 = vmul.f32 %v5331_v31, %v1759_v26  ;;  %v1830_v35 = vmul.f32 %v5349_v63, %v1745_v9  ;;  %v1713_v25 = vadd.f32 1e-05, %v1697_v53  ;;  %v1666_v11 = vpop.xlane.xlu1 %1665  ;;  %v3928_v26 = vld [vmem:[#allocation6 + $0x164] ss:$8 sps:$4 sm:$0xff]  }
 0x4a3   :  { %2582 = vmatpush1.bf16.msra.mxu1 %v3917_v12  ;;  %v2042_v42 = vpack.c.bf16 %v1990_v15, %v1986_v16  ;;  %v2041_v4 = vpack.c.bf16 %v1989_v18, %v1985_v40  ;;  %v1764_v38 = vmul.f32 %v5435_v7, %v5143_v10  ;;  %v1698_v39 = vmul.f32 0.001953125, %v1666_v11 }
 0x4a4   :  { %2583 = vmatprep.subr.bf16.mxu1 %v3922_v49  ;;  %v1930_v54 = vadd.f32 %v5337_v24, %v1845_v36  ;;  %v1763_v46 = vmul.f32 %v5435_v7, %v5140_v2  ;;  %v1929_v56 = vadd.f32 %v5340_v14, %v1844_v3  ;;  %4024 = vrsqrt.f32 %v1713_v25  ;;  %v3923_v2 = vld [vmem:[#allocation6 + $0x150] ss:$8 sps:$4 sm:$0xff]  }
 0x4a5   :  { %2514 = vmatprep.mubr.bf16.mxu1 %v2042_v42  ;;  %v1849_v23 = vmul.f32 %v5328_v61, %v1764_v38  ;;  %v5449_v16 = vpack.c.bf16 %v1984_v5, %v1980_v1  ;;  %v1834_v40 = vmul.f32 %v5349_v63, %v1749_v45  ;;  %v1714_v29 = vadd.f32 1e-05, %v1698_v39 }
 0x4a6   :  { %2515 = vmatmul.mubr.bf16.gmra.mrb[40].mxu1 %v2041_v4  ;;  %v1994_v10 = vmax.f32 %v1930_v54, 0.0  ;;  %v1848_v12 = vmul.f32 %v5331_v31, %v1763_v46  ;;  %v1993_v28 = vmax.f32 %v1929_v56, 0.0  ;;  %v5453_v21 = vpop.eup %4020  ;;  %v1915_v9 = vadd.f32 %v5352_v41, %v1830_v35  ;;  %v3926_v4 = vld [vmem:[#allocation6 + $0x160] ss:$8 sps:$4 sm:$0xff]   ;;  %v3931_v54 = vld [vmem:[#allocation6 + $0x174] ss:$8 sps:$4 sm:$0xff]  }
 0x4a7   :  { %2584 = vmatpush1.bf16.msra.mxu1 %v3920_v13  ;;  %v1934_v27 = vadd.f32 %v5337_v24, %v1849_v23  ;;  %v1919_v34 = vadd.f32 %v5352_v41, %v1834_v40  ;;  %v1754_v49 = vmul.f32 %v5395_v43, %v5097_v17  ;;  %4026 = vrsqrt.f32 %v1714_v29  ;;  %v1671_v52 = vpop.xlane.xlu0 %1670 }
 0x4a8   :  { %2585 = vmatprep.subr.bf16.mxu1 %v3925_v33  ;;  %v1933_v1 = vadd.f32 %v5340_v14, %v1848_v12  ;;  %v1768_v53 = vmul.f32 %v5453_v21, %v5169_v58  ;;  %v1767_v15 = vmul.f32 %v5453_v21, %v5166_v0  ;;  %v1699_v18 = vmul.f32 0.001953125, %v1671_v52 }
 0x4a9   :  { %v1998_v5 = vmax.f32 %v1934_v27, 0.0  ;;  %v1979_v36 = vmax.f32 %v1915_v9, 0.0  ;;  %v1983_v3 = vmax.f32 %v1919_v34, 0.0  ;;  %v5465_v45 = vpop.eup %4022  ;;  %v1758_v11 = vmul.f32 %v5409_v48, %v5119_v51 }
 0x4aa   :  { %v1997_v35 = vmax.f32 %v1933_v1, 0.0  ;;  %v1853_v17 = vmul.f32 %v5328_v61, %v1768_v53  ;;  %v1852_v25 = vmul.f32 %v5331_v31, %v1767_v15  ;;  %v1715_v42 = vadd.f32 1e-05, %v1699_v18  ;;  %v1676_v58 = vpop.xlane.xlu1 %1675 }
 0x4ab   :  { %2586 = vmatpush1.bf16.msra.mxu1 %v3923_v2  ;;  %v2046_v13 = vpack.c.bf16 %v1998_v5, %v1994_v10  ;;  %v1772_v0 = vmul.f32 %v5465_v45, %v5183_v37  ;;  %v1771_v38 = vmul.f32 %v5465_v45, %v5180_v22  ;;  %v1700_v39 = vmul.f32 0.001953125, %v1676_v58 }
 0x4ac   :  { %2587 = vmatprep.subr.bf16.mxu1 %v3928_v26  ;;  %v2045_v33 = vpack.c.bf16 %v1997_v35, %v1993_v28  ;;  %v1938_v46 = vadd.f32 %v5337_v24, %v1853_v17  ;;  %v1937_v56 = vadd.f32 %v5340_v14, %v1852_v25  ;;  %4028 = vrsqrt.f32 %v1715_v42  ;;  %v3929_v28 = vld [vmem:[#allocation6 + $0x170] ss:$8 sps:$4 sm:$0xff]   ;;  %v3934_v26 = vld [vmem:[#allocation6 + $0x184] ss:$8 sps:$4 sm:$0xff]   ;;  %v3932_v42 = vld [vmem:[#allocation6 + $0x180] ss:$8 sps:$4 sm:$0xff]  }
 0x4ad   :  { %2524 = vmatprep.mubr.bf16.mxu1 %v2046_v13  ;;  %v1857_v51 = vmul.f32 %v5328_v61, %v1772_v0  ;;  %v1856_v23 = vmul.f32 %v5331_v31, %v1771_v38  ;;  %v5479_v40 = vpack.c.bf16 %v1983_v3, %v1979_v36  ;;  %v1716_v37 = vadd.f32 1e-05, %v1700_v39  ;;  %v3937_v13 = vld [vmem:[#allocation6 + $0x194] ss:$8 sps:$4 sm:$0xff]  }
 0x4ae   :  { %2525 = vmatmul.mubr.bf16.gmra.mrb[44].mxu1 %v2045_v33  ;;  %v2002_v29 = vmax.f32 %v1938_v46, 0.0  ;;  %v2001_v22 = vmax.f32 %v1937_v56, 0.0  ;;  %v1839_v10 = vmul.f32 %v5334_v8, %v1754_v49  ;;  %v5482_v12 = vpop.eup %4024  ;;  %v1843_v9 = vmul.f32 %v5334_v8, %v1758_v11 }
 0x4af   :  { %2588 = vmatpush1.bf16.msra.mxu1 %v3926_v4  ;;  %v1942_v2 = vadd.f32 %v5337_v24, %v1857_v51  ;;  %v1941_v27 = vadd.f32 %v5340_v14, %v1856_v23  ;;  %v1753_v34 = vmul.f32 %v5395_v43, %v5094_v44  ;;  %4030 = vrsqrt.f32 %v1716_v37 }
 0x4b0   :  { %2589 = vmatprep.subr.bf16.mxu1 %v3931_v54  ;;  %v1681_v52 = vpop.xlane.xlu0 %1680  ;;  %v1776_v49 = vmul.f32 %v5482_v12, %v5209_v59  ;;  %v1775_v1 = vmul.f32 %v5482_v12, %v5206_v62  ;;  %v1924_v53 = vadd.f32 %v5343_v47, %v1839_v10  ;;  %v1928_v36 = vadd.f32 %v5343_v47, %v1843_v9  ;;  %v3940_v10 = vld [vmem:[#allocation6 + $0x1a4] ss:$8 sps:$4 sm:$0xff]  }
 0x4b1   :  { %v1701_v15 = vmul.f32 0.001953125, %v1681_v52  ;;  %v2006_v18 = vmax.f32 %v1942_v2, 0.0  ;;  %v2005_v5 = vmax.f32 %v1941_v27, 0.0  ;;  %v5495_v3 = vpop.eup %4026  ;;  %v1757_v59 = vmul.f32 %v5409_v48, %v5110_v20  ;;  %v6376_v52 = vld [vmem:[#allocation31_spill] sm:$0xff] }
 0x4b2   :  { %v1686_v44 = vpop.xlane.xlu1 %1685  ;;  %v1861_v43 = vmul.f32 %v5328_v61, %v1776_v49  ;;  %v1860_v35 = vmul.f32 %v5331_v31, %v1775_v1  ;;  %v1988_v17 = vmax.f32 %v1924_v53, 0.0  ;;  %v1780_v4 = vmul.f32 %v5495_v3, %v5223_v60  ;;  %v6377_v49 = vld [vmem:[#allocation33_spill] sm:$0xff] }
 0x4b3   :  { %v1717_v25 = vadd.f32 1e-05, %v1701_v15  ;;  %2590 = vmatpush1.bf16.msra.mxu1 %v3929_v28  ;;  %v1702_v62 = vmul.f32 0.001953125, %v1686_v44  ;;  %v2050_v11 = vpack.c.bf16 %v2006_v18, %v2002_v29  ;;  %v2049_v58 = vpack.c.bf16 %v2005_v5, %v2001_v22 }
 0x4b4   :  { %2591 = vmatprep.subr.bf16.mxu1 %v3934_v26  ;;  %v1946_v0 = vadd.f32 %v5337_v24, %v1861_v43  ;;  %v1779_v38 = vmul.f32 %v5495_v3, %v5220_v55  ;;  %v1945_v39 = vadd.f32 %v5340_v14, %v1860_v35  ;;  %v1992_v48 = vmax.f32 %v1928_v36, 0.0  ;;  %v3935_v55 = vld [vmem:[#allocation6 + $0x190] ss:$8 sps:$4 sm:$0xff]  }
 0x4b5   :  { %4032 = vrsqrt.f32 %v1717_v25  ;;  %v1718_v20 = vadd.f32 1e-05, %v1702_v62  ;;  %2534 = vmatprep.mubr.bf16.mxu1 %v2050_v11  ;;  %v1838_v33 = vmul.f32 %v5349_v63, %v1753_v34  ;;  %v1865_v54 = vmul.f32 %v5328_v61, %v1780_v4  ;;  %v6378_v36 = vld [vmem:[#allocation19_spill] sm:$0xff] }
 0x4b6   :  { %2535 = vmatmul.mubr.bf16.gmra.mrb[48].mxu1 %v2049_v58  ;;  %v2010_v46 = vmax.f32 %v1946_v0, 0.0  ;;  %v1864_v56 = vmul.f32 %v5331_v31, %v1779_v38  ;;  %v2009_v60 = vmax.f32 %v1945_v39, 0.0  ;;  %v5510_v51 = vpop.eup %4028  ;;  %v5512_v23 = vpack.c.bf16 %v1992_v48, %v1988_v17 }
 0x4b7   :  { %4034 = vrsqrt.f32 %v1718_v20  ;;  %2592 = vmatpush1.bf16.msra.mxu1 %v3932_v42  ;;  %v1842_v37 = vmul.f32 %v5349_v63, %v1757_v59  ;;  %v1923_v29 = vadd.f32 %v5352_v41, %v1838_v33  ;;  %v1950_v22 = vadd.f32 %v5337_v24, %v1865_v54  ;;  %v3938_v59 = vld [vmem:[#allocation6 + $0x1a0] ss:$8 sps:$4 sm:$0xff]   ;;  %v3943_v42 = vld [vmem:[#allocation6 + $0x1b4] ss:$8 sps:$4 sm:$0xff]  }
 0x4b8   :  { %2593 = vmatprep.subr.bf16.mxu1 %v3937_v13  ;;  %v1949_v28 = vadd.f32 %v5340_v14, %v1864_v56  ;;  %v1784_v2 = vmul.f32 %v5510_v51, %v5249_v19  ;;  %v1783_v27 = vmul.f32 %v5510_v51, %v5246_v30  ;;  %v1762_v26 = vmul.f32 %v5424_v57, %v6376_v52  ;;  %v6379_v20 = vld [vmem:[#allocation30_spill] sm:$0xff] }
 0x4b9   :  { %v1927_v9 = vadd.f32 %v5352_v41, %v1842_v37  ;;  %v1987_v34 = vmax.f32 %v1923_v29, 0.0  ;;  %v1766_v1 = vmul.f32 %v5435_v7, %v6377_v49  ;;  %v5527_v53 = vpop.eup %4030  ;;  %v2014_v15 = vmax.f32 %v1950_v22, 0.0  ;;  %v3941_v37 = vld [vmem:[#allocation6 + $0x1b0] ss:$8 sps:$4 sm:$0xff]   ;;  %v6383_v49 = vld [vmem:[#allocation25_spill] sm:$0xff] }
 0x4ba   :  { %v2013_v18 = vmax.f32 %v1949_v28, 0.0  ;;  %v1869_v5 = vmul.f32 %v5328_v61, %v1784_v2  ;;  %v1868_v19 = vmul.f32 %v5331_v31, %v1783_v27  ;;  %v1788_v30 = vmul.f32 %v5527_v53, %v5263_v6  ;;  %v6381_v29 = vld [vmem:[#allocation23_spill] sm:$0xff] }
 0x4bb   :  { %2594 = vmatpush1.bf16.msra.mxu1 %v3935_v55  ;;  %v1787_v44 = vmul.f32 %v5527_v53, %v6378_v36  ;;  %v1991_v43 = vmax.f32 %v1927_v9, 0.0  ;;  %v1847_v35 = vmul.f32 %v5334_v8, %v1762_v26  ;;  %v2054_v17 = vpack.c.bf16 %v2014_v15, %v2010_v46 }
 0x4bc   :  { %2595 = vmatprep.subr.bf16.mxu1 %v3940_v10  ;;  %v2053_v25 = vpack.c.bf16 %v2013_v18, %v2009_v60  ;;  %v1954_v62 = vadd.f32 %v5337_v24, %v1869_v5  ;;  %v1953_v11 = vadd.f32 %v5340_v14, %v1868_v19  ;;  %v1873_v58 = vmul.f32 %v5328_v61, %v1788_v30  ;;  %v6380_v60 = vld [vmem:[#allocation32_spill] sm:$0xff]  ;;  %v6382_v10 = vld [vmem:[#allocation21_spill] sm:$0xff]  ;;  %v6384_v18 = vld [vmem:[#allocation39_spill] sm:$0xff] }
 0x4bd   :  { %v1872_v13 = vmul.f32 %v5331_v31, %v1787_v44  ;;  %v5540_v6 = vpack.c.bf16 %v1991_v43, %v1987_v34  ;;  %v1851_v4 = vmul.f32 %v5334_v8, %v1766_v1  ;;  %2544 = vmatprep.mubr.bf16.mxu1 %v2054_v17  ;;  %v1932_v39 = vadd.f32 %v5343_v47, %v1847_v35  ;;  %v3946_v34 = vld [vmem:[#allocation6 + $0x1c4] ss:$8 sps:$4 sm:$0xff]   ;;  %v3944_v35 = vld [vmem:[#allocation6 + $0x1c0] ss:$8 sps:$4 sm:$0xff]  }
 0x4be   :  { %v2018_v0 = vmax.f32 %v1954_v62, 0.0  ;;  %v2017_v38 = vmax.f32 %v1953_v11, 0.0  ;;  %v1761_v48 = vmul.f32 %v5424_v57, %v6379_v20  ;;  %2545 = vmatmul.mubr.bf16.gmra.mrb[52].mxu1 %v2053_v25  ;;  %v1958_v54 = vadd.f32 %v5337_v24, %v1873_v58  ;;  %v3949_v11 = vld [vmem:[#allocation6 + $0x1d4] ss:$8 sps:$4 sm:$0xff]  }
 0x4bf   :  { %v5546_v33 = vpop.eup %4032  ;;  %v1957_v46 = vadd.f32 %v5340_v14, %v1872_v13  ;;  %v1936_v56 = vadd.f32 %v5343_v47, %v1851_v4  ;;  %v1765_v55 = vmul.f32 %v5435_v7, %v6380_v60  ;;  %2596 = vmatpush1.bf16.msra.mxu1 %v3938_v59  ;;  %v1996_v28 = vmax.f32 %v1932_v39, 0.0  ;;  %v6385_v13 = vld [vmem:[#allocation35_spill] sm:$0xff] }
 0x4c0   :  { %v1792_v22 = vmul.f32 %v5546_v33, %v6381_v29  ;;  %v1791_v57 = vmul.f32 %v5546_v33, %v6382_v10  ;;  %v1846_v2 = vmul.f32 %v5349_v63, %v1761_v48  ;;  %2597 = vmatprep.subr.bf16.mxu1 %v3943_v42  ;;  %v2022_v9 = vmax.f32 %v1958_v54, 0.0  ;;  %v6389_v10 = vld [vmem:[#allocation16_spill] sm:$0xff] }
 0x4c1   :  { %v5558_v27 = vpop.eup %4034  ;;  %v2021_v52 = vmax.f32 %v1957_v46, 0.0  ;;  %v2000_v26 = vmax.f32 %v1936_v56, 0.0  ;;  %v1850_v7 = vmul.f32 %v5349_v63, %v1765_v55  ;;  %v1770_v4 = vmul.f32 %v5453_v21, %v6385_v13  ;;  %v6387_v56 = vld [vmem:[#allocation34_spill] sm:$0xff]  ;;  %v3947_v55 = vld [vmem:[#allocation6 + $0x1d0] ss:$8 sps:$4 sm:$0xff]  }
 0x4c2   :  { %v1796_v1 = vmul.f32 %v5558_v27, %v6383_v49  ;;  %v1877_v15 = vmul.f32 %v5328_v61, %v1792_v22  ;;  %v1795_v5 = vmul.f32 %v5558_v27, %v6384_v18  ;;  %v1876_v19 = vmul.f32 %v5331_v31, %v1791_v57  ;;  %v6388_v22 = vld [vmem:[#allocation36_spill] sm:$0xff]  ;;  %v3952_v57 = vld [vmem:[#allocation6 + $0x1e4] ss:$8 sps:$4 sm:$0xff]  }
 0x4c3   :  { %v2058_v30 = vpack.c.bf16 %v2022_v9, %v2018_v0  ;;  %v2057_v36 = vpack.c.bf16 %v2021_v52, %v2017_v38  ;;  %v5567_v44 = vpack.c.bf16 %v2000_v26, %v1996_v28  ;;  %v1931_v43 = vadd.f32 %v5352_v41, %v1846_v2  ;;  %2598 = vmatpush1.bf16.msra.mxu1 %v3941_v37  ;;  %v6386_v0 = vld [vmem:[#allocation37_spill] sm:$0xff] }
 0x4c4   :  { %v1881_v17 = vmul.f32 %v5328_v61, %v1796_v1  ;;  %v1962_v59 = vadd.f32 %v5337_v24, %v1877_v15  ;;  %v1880_v25 = vmul.f32 %v5331_v31, %v1795_v5  ;;  %v1961_v62 = vadd.f32 %v5340_v14, %v1876_v19  ;;  %2599 = vmatprep.subr.bf16.mxu1 %v3946_v34  ;;  %v3950_v5 = vld [vmem:[#allocation6 + $0x1e0] ss:$8 sps:$4 sm:$0xff]  }
 0x4c5   :  { %2554 = vmatprep.mubr.bf16.mxu1 %v2058_v30  ;;  %v1935_v42 = vadd.f32 %v5352_v41, %v1850_v7  ;;  %v1995_v58 = vmax.f32 %v1931_v43, 0.0  ;;  %v1774_v38 = vmul.f32 %v5465_v45, %v6386_v0  ;;  %v1855_v54 = vmul.f32 %v5334_v8, %v1770_v4  ;;  %v6390_v7 = vld [vmem:[#allocation15_spill] sm:$0xff]  ;;  %v6393_v4 = vld [vmem:[#allocation18_spill] sm:$0xff] }
 0x4c6   :  { %v1966_v61 = vadd.f32 %v5337_v24, %v1881_v17  ;;  %v2026_v39 = vmax.f32 %v1962_v59, 0.0  ;;  %v1965_v20 = vadd.f32 %v5340_v14, %v1880_v25  ;;  %v2025_v31 = vmax.f32 %v1961_v62, 0.0  ;;  %2555 = vmatmul.mubr.bf16.gmra.mrb[56].mxu1 %v2057_v36  ;;  %v6391_v36 = vld [vmem:[#allocation14_spill] sm:$0xff]  ;;  %v6392_v62 = vld [vmem:[#allocation13_spill] sm:$0xff] }
 0x4c7   :  { %v1999_v48 = vmax.f32 %v1935_v42, 0.0  ;;  %v1859_v46 = vmul.f32 %v5334_v8, %v1774_v38  ;;  %v1769_v60 = vmul.f32 %v5453_v21, %v6387_v56  ;;  %2600 = vmatpush1.bf16.msra.mxu1 %v3944_v35  ;;  %v1773_v24 = vmul.f32 %v5465_v45, %v6388_v22  ;;  %v3955_v35 = vld [vmem:[#allocation6 + $0x1f4] ss:$8 sps:$4 sm:$0xff]  }
 0x4c8   :  { %v2030_v37 = vmax.f32 %v1966_v61, 0.0  ;;  %v2029_v29 = vmax.f32 %v1965_v20, 0.0  ;;  %v1778_v14 = vmul.f32 %v5482_v12, %v6389_v10  ;;  %2601 = vmatprep.subr.bf16.mxu1 %v3949_v11  ;;  %v1940_v2 = vadd.f32 %v5343_v47, %v1855_v54  ;;  %v6394_v61 = vld [vmem:[#allocation22_spill] sm:$0xff]  ;;  %v6395_v20 = vld [vmem:[#allocation17_spill] sm:$0xff] }
 0x4c9   :  { %v5589_v28 = vpack.c.bf16 %v1999_v48, %v1995_v58  ;;  %v1944_v9 = vadd.f32 %v5343_v47, %v1859_v46  ;;  %v1854_v21 = vmul.f32 %v5349_v63, %v1769_v60  ;;  %v1858_v26 = vmul.f32 %v5349_v63, %v1773_v24  ;;  %v6397_v10 = vld [vmem:[#allocation38_spill] sm:$0xff] }
 0x4ca   :  { %v2062_v34 = vpack.c.bf16 %v2030_v37, %v2026_v39  ;;  %v2061_v52 = vpack.c.bf16 %v2029_v29, %v2025_v31  ;;  %v1782_v45 = vmul.f32 %v5495_v3, %v6390_v7  ;;  %v2004_v49 = vmax.f32 %v1940_v2, 0.0  ;;  %v6396_v37 = vld [vmem:[#allocation20_spill] sm:$0xff] }
 0x4cb   :  { %v2008_v1 = vmax.f32 %v1944_v9, 0.0  ;;  %v1939_v15 = vadd.f32 %v5352_v41, %v1854_v21  ;;  %v1863_v18 = vmul.f32 %v5334_v8, %v1778_v14  ;;  %2602 = vmatpush1.bf16.msra.mxu1 %v3947_v55  ;;  %v1943_v19 = vadd.f32 %v5352_v41, %v1858_v26  ;;  %v6399_v26 = vld [vmem:[#allocation24_spill] sm:$0xff] }
 0x4cc   :  { %2564 = vmatprep.mubr.bf16.mxu1 %v2062_v34  ;;  %v1867_v30 = vmul.f32 %v5334_v8, %v1782_v45  ;;  %v1777_v43 = vmul.f32 %v5482_v12, %v6391_v36  ;;  %2603 = vmatprep.subr.bf16.mxu1 %v3952_v57  ;;  %v1781_v11 = vmul.f32 %v5495_v3, %v6392_v62  ;;  %v3953_v3 = vld [vmem:[#allocation6 + $0x1f0] ss:$8 sps:$4 sm:$0xff]   ;;  %v6398_v34 = vld [vmem:[#allocation41_spill] sm:$0xff] }
 0x4cd   :  { %v5603_v17 = vpack.c.bf16 %v2008_v1, %v2004_v49  ;;  %v2003_v59 = vmax.f32 %v1939_v15, 0.0  ;;  %v1948_v25 = vadd.f32 %v5343_v47, %v1863_v18  ;;  %v2007_v42 = vmax.f32 %v1943_v19, 0.0  ;;  %v6400_v19 = vld [vmem:[#allocation40_spill] sm:$0xff] }
 0x4ce   :  { %v1952_v58 = vadd.f32 %v5343_v47, %v1867_v30  ;;  %v1862_v13 = vmul.f32 %v5349_v63, %v1777_v43  ;;  %v1786_v0 = vmul.f32 %v5510_v51, %v6393_v4  ;;  %2565 = vmatmul.mubr.bf16.gmra.mrb[60].mxu1 %v2061_v52  ;;  %v1866_v38 = vmul.f32 %v5349_v63, %v1781_v11 }
 0x4cf   :  { %v2012_v12 = vmax.f32 %v1948_v25, 0.0  ;;  %v1790_v39 = vmul.f32 %v5527_v53, %v6394_v61  ;;  %v1785_v31 = vmul.f32 %v5510_v51, %v6395_v20  ;;  %2604 = vmatpush1.bf16.msra.mxu1 %v3950_v5  ;;  %2607 = vmatprep.mubr.bf16.mxu1 %v5391_v50  ;;  %v2051_v48 = vpack.c.bf16 %v2007_v42, %v2003_v59 }
 0x4d0   :  { %v2016_v54 = vmax.f32 %v1952_v58, 0.0  ;;  %v1947_v46 = vadd.f32 %v5352_v41, %v1862_v13  ;;  %v1871_v56 = vmul.f32 %v5334_v8, %v1786_v0  ;;  %2605 = vmatprep.subr.bf16.mxu1 %v3955_v35  ;;  %v1951_v60 = vadd.f32 %v5352_v41, %v1866_v38 }
 0x4d1   :  { %v1875_v55 = vmul.f32 %v5334_v8, %v1790_v39  ;;  %v1789_v29 = vmul.f32 %v5527_v53, %v6396_v37  ;;  %v1870_v51 = vmul.f32 %v5349_v63, %v1785_v31  ;;  %v1794_v14 = vmul.f32 %v5546_v33, %v6397_v10 }
 0x4d2   :  { %v2056_v22 = vpack.c.bf16 %v2016_v54, %v2012_v12  ;;  %v2011_v24 = vmax.f32 %v1947_v46, 0.0  ;;  %v1956_v50 = vadd.f32 %v5343_v47, %v1871_v56  ;;  %v2015_v57 = vmax.f32 %v1951_v60, 0.0 }
 0x4d3   :  { %v1960_v2 = vadd.f32 %v5343_v47, %v1875_v55  ;;  %v1874_v9 = vmul.f32 %v5349_v63, %v1789_v29  ;;  %v1955_v21 = vadd.f32 %v5352_v41, %v1870_v51  ;;  %2606 = vmatpush1.bf16.msra.mxu1 %v3953_v3  ;;  %v1798_v53 = vmul.f32 %v5558_v27, %v6398_v34 }
 0x4d4   :  { %v1879_v52 = vmul.f32 %v5334_v8, %v1794_v14  ;;  %v1793_v7 = vmul.f32 %v5546_v33, %v6399_v26  ;;  %v2055_v45 = vpack.c.bf16 %v2015_v57, %v2011_v24  ;;  %v2020_v49 = vmax.f32 %v1956_v50, 0.0 }
 0x4d5   :  { %v2024_v1 = vmax.f32 %v1960_v2, 0.0  ;;  %v1959_v15 = vadd.f32 %v5352_v41, %v1874_v9  ;;  %v1883_v18 = vmul.f32 %v5334_v8, %v1798_v53  ;;  %v1797_v30 = vmul.f32 %v5558_v27, %v6400_v19 }
 0x4d6   :  { %v1964_v5 = vadd.f32 %v5343_v47, %v1879_v52  ;;  %v1878_v36 = vmul.f32 %v5349_v63, %v1793_v7  ;;  %2608 = vmatmul.mubr.bf16.vlgmr.msra.gmra.mrb[32].mxu1 %v5405_v32  ;;  %v2019_v35 = vmax.f32 %v1955_v21, 0.0 }
 0x4d7   :  { %v2060_v43 = vpack.c.bf16 %v2024_v1, %v2020_v49  ;;  %v2023_v59 = vmax.f32 %v1959_v15, 0.0  ;;  %2617 = vmatprep.mubr.bf16.mxu1 %v5449_v16  ;;  %v1968_v33 = vadd.f32 %v5343_v47, %v1883_v18  ;;  %v1882_v25 = vmul.f32 %v5349_v63, %v1797_v30  ;;  %v2130_v63 = vld [vmem:[#allocation2 + $0x6] ss:$8 sm:$0x3] }
 0x4d8   :  { %v1963_v8 = vadd.f32 %v5352_v41, %v1878_v36  ;;  %v2028_v11 = vmax.f32 %v1964_v5, 0.0  ;;  %v6402_v16 = vld [vmem:[#allocation10_spill] sm:$0xff] }
 0x4d9   :  { %v2059_v62 = vpack.c.bf16 %v2023_v59, %v2019_v35  ;;  %v2032_v42 = vmax.f32 %v1968_v33, 0.0  ;;  %v1967_v27 = vadd.f32 %v5352_v41, %v1882_v25  ;;  %v6401_v41 = vld [vmem:[#allocation9_spill] sm:$0xff] }
 0x4da   :  { %v2027_v13 = vmax.f32 %v1963_v8, 0.0  ;;  %v5655_v47 = vrot.slane %v2130_v63, %v6401_v41 }
 0x4db   :  { %v2064_v58 = vpack.c.bf16 %v2032_v42, %v2028_v11  ;;  %v2031_v4 = vmax.f32 %v1967_v27, 0.0 }
 0x4dd   :  { %v2063_v32 = vpack.c.bf16 %v2031_v4, %v2027_v13 }
 0x4de   :  { %2618 = vmatmul.mubr.bf16.gmra.mrb[36].mxu1 %v5479_v40  ;;  %v5658_v40 = vrot.slane %v2130_v63, %v6402_v16 }
 0x4df   :  { %2627 = vmatprep.mubr.bf16.mxu1 %v5512_v23 }
 0x4e6   :  { %2628 = vmatmul.mubr.bf16.gmra.mrb[40].mxu1 %v5540_v6 }
 0x4e7   :  { %2637 = vmatprep.mubr.bf16.mxu1 %v5567_v44 }
 0x4ee   :  { %2638 = vmatmul.mubr.bf16.gmra.mrb[44].mxu1 %v5589_v28 }
 0x4ef   :  { %2647 = vmatprep.mubr.bf16.mxu1 %v5603_v17 }
 0x4f6   :  { %2648 = vmatmul.mubr.bf16.gmra.mrb[48].mxu1 %v2051_v48 }
 0x4f7   :  { %2657 = vmatprep.mubr.bf16.mxu1 %v2056_v22 }
 0x4fe   :  { %2658 = vmatmul.mubr.bf16.gmra.mrb[52].mxu1 %v2055_v45 }
 0x4ff   :  { %2667 = vmatprep.mubr.bf16.mxu1 %v2060_v43 }
 0x506   :  { %2668 = vmatmul.mubr.bf16.gmra.mrb[56].mxu1 %v2059_v62 }
 0x507   :  { %2677 = vmatprep.mubr.bf16.mxu1 %v2064_v58 }
 0x50e   :  { %2678 = vmatmul.mubr.bf16.gmra.mrb[60].mxu1 %v2063_v32 }
 0x5a9   :  { %v2609_v23 = vpop.f32.mrb[32].mxu1 }
 0x5aa   :  { %v5661_v6 = vadd.f32 %v2609_v23, %v5655_v47  ;;  %v2611_v44 = vpop.f32.mrb[33].mxu1 }
 0x5ab   :  { %v5664_v28 = vadd.f32 %v2611_v44, %v5658_v40  ;;  %v2613_v17 = vpop.f32.mrb[34].mxu1 }
 0x5ac   :  { %v5667_v0 = vadd.f32 %v2613_v17, %v5655_v47  ;;  %v2615_v12 = vpop.f32.mrb[35].mxu1 }
 0x5ad   :  { %v5670_v38 = vadd.f32 %v2615_v12, %v5658_v40  ;;  %v2692_v61 = vadd.f32 %v5664_v28, %v5661_v6 }
 0x5af   :  { %2693 = vadd.xlane.f32.xlu0 %v2692_v61  ;;  %v2695_v39 = vadd.f32 %v5670_v38, %v5667_v0 }
 0x5b1   :  { %v2619_v20 = vpop.f32.mrb[36].mxu1  ;;  %2696 = vadd.xlane.f32.xlu1 %v2695_v39 }
 0x5b2   :  { %v5677_v31 = vadd.f32 %v2619_v20, %v5655_v47  ;;  %v2621_v3 = vpop.f32.mrb[37].mxu1 }
 0x5b3   :  { %v5680_v48 = vadd.f32 %v2621_v3, %v5658_v40  ;;  %v2623_v54 = vpop.f32.mrb[38].mxu1 }
 0x5b4   :  { %v5683_v46 = vadd.f32 %v2623_v54, %v5655_v47  ;;  %v2625_v56 = vpop.f32.mrb[39].mxu1 }
 0x5b5   :  { %v5686_v60 = vadd.f32 %v2625_v56, %v5658_v40  ;;  %v2698_v55 = vadd.f32 %v5680_v48, %v5677_v31 }
 0x5b7   :  { %2699 = vadd.xlane.f32.xlu0 %v2698_v55  ;;  %v2701_v37 = vadd.f32 %v5686_v60, %v5683_v46 }
 0x5b9   :  { %v2629_v29 = vpop.f32.mrb[40].mxu1  ;;  %2702 = vadd.xlane.f32.xlu1 %v2701_v37 }
 0x5ba   :  { %v5693_v51 = vadd.f32 %v2629_v29, %v5655_v47  ;;  %v2631_v22 = vpop.f32.mrb[41].mxu1 }
 0x5bb   :  { %v5696_v24 = vadd.f32 %v2631_v22, %v5658_v40  ;;  %v2633_v50 = vpop.f32.mrb[42].mxu1 }
 0x5bc   :  { %v5699_v10 = vadd.f32 %v2633_v50, %v5655_v47  ;;  %v2635_v14 = vpop.f32.mrb[43].mxu1 }
 0x5bd   :  { %v5702_v57 = vadd.f32 %v2635_v14, %v5658_v40  ;;  %v2704_v2 = vadd.f32 %v5696_v24, %v5693_v51 }
 0x5bf   :  { %2705 = vadd.xlane.f32.xlu0 %v2704_v2  ;;  %v2707_v9 = vadd.f32 %v5702_v57, %v5699_v10 }
 0x5c1   :  { %v2639_v21 = vpop.f32.mrb[44].mxu1  ;;  %2708 = vadd.xlane.f32.xlu1 %v2707_v9 }
 0x5c2   :  { %v5709_v34 = vadd.f32 %v2639_v21, %v5655_v47  ;;  %v2641_v53 = vpop.f32.mrb[45].mxu1 }
 0x5c3   :  { %v5712_v52 = vadd.f32 %v2641_v53, %v5658_v40  ;;  %v2643_v26 = vpop.f32.mrb[46].mxu1 }
 0x5c4   :  { %v5715_v7 = vadd.f32 %v2643_v26, %v5655_v47  ;;  %v2645_v45 = vpop.f32.mrb[47].mxu1  ;;  %v3956_v26 = vld [vmem:[%s6255_s5 + $0x40] sm:$0xff]  }
 0x5c5   :  { %v5718_v49 = vadd.f32 %v2645_v45, %v5658_v40  ;;  %v2710_v1 = vadd.f32 %v5712_v52, %v5709_v34  ;;  %3594 = vmatprep.subr.bf16.mxu0 %v3956_v26  ;;  %v3959_v45 = vld [vmem:[%s6255_s5 + $0x8] sm:$0xff]  }
 0x5c7   :  { %2711 = vadd.xlane.f32.xlu0 %v2710_v1  ;;  %v2713_v15 = vadd.f32 %v5718_v49, %v5715_v7  ;;  %v3960_v1 = vld [vmem:[%s6255_s5 + $0x50] sm:$0xff]  }
 0x5c9   :  { %v2649_v18 = vpop.f32.mrb[48].mxu1  ;;  %2714 = vadd.xlane.f32.xlu1 %v2713_v15  ;;  %v3961_v15 = vld [vmem:[%s6255_s5 + $0x10] sm:$0xff]  }
 0x5ca   :  { %v5725_v5 = vadd.f32 %v2649_v18, %v5655_v47  ;;  %v2651_v19 = vpop.f32.mrb[49].mxu1  ;;  %v3962_v18 = vld [vmem:[%s6255_s5 + $0x58] sm:$0xff]  }
 0x5cb   :  { %v5728_v30 = vadd.f32 %v2651_v19, %v5658_v40  ;;  %v2653_v36 = vpop.f32.mrb[50].mxu1  ;;  %v3963_v19 = vld [vmem:[%s6255_s5 + $0x18] sm:$0xff]  }
 0x5cc   :  { %v5731_v43 = vadd.f32 %v2653_v36, %v5655_v47  ;;  %v2655_v35 = vpop.f32.mrb[51].mxu1  ;;  %v3964_v36 = vld [vmem:[%s6255_s5 + $0x60] sm:$0xff]  }
 0x5cd   :  { %v5734_v59 = vadd.f32 %v2655_v35, %v5658_v40  ;;  %v2716_v33 = vadd.f32 %v5728_v30, %v5725_v5  ;;  %v3965_v35 = vld [vmem:[%s6255_s5 + $0x20] sm:$0xff]  }
 0x5cf   :  { %2717 = vadd.xlane.f32.xlu0 %v2716_v33  ;;  %v2719_v25 = vadd.f32 %v5734_v59, %v5731_v43 }
 0x5d1   :  { %v2659_v8 = vpop.f32.mrb[52].mxu1  ;;  %2720 = vadd.xlane.f32.xlu1 %v2719_v25 }
 0x5d2   :  { %v5741_v62 = vadd.f32 %v2659_v8, %v5655_v47  ;;  %v2661_v11 = vpop.f32.mrb[53].mxu1 }
 0x5d3   :  { %v5744_v42 = vadd.f32 %v2661_v11, %v5658_v40  ;;  %v2663_v27 = vpop.f32.mrb[54].mxu1 }
 0x5d4   :  { %v5747_v58 = vadd.f32 %v2663_v27, %v5655_v47  ;;  %v2665_v13 = vpop.f32.mrb[55].mxu1 }
 0x5d5   :  { %v5750_v4 = vadd.f32 %v2665_v13, %v5658_v40  ;;  %v2722_v32 = vadd.f32 %v5744_v42, %v5741_v62 }
 0x5d7   :  { %2723 = vadd.xlane.f32.xlu0 %v2722_v32  ;;  %v2725_v63 = vadd.f32 %v5750_v4, %v5747_v58 }
 0x5d9   :  { %v2669_v23 = vpop.f32.mrb[56].mxu1  ;;  %2726 = vadd.xlane.f32.xlu1 %v2725_v63 }
 0x5da   :  { %v5757_v44 = vadd.f32 %v2669_v23, %v5655_v47  ;;  %v2671_v17 = vpop.f32.mrb[57].mxu1 }
 0x5db   :  { %v5760_v12 = vadd.f32 %v2671_v17, %v5658_v40  ;;  %v2673_v61 = vpop.f32.mrb[58].mxu1 }
 0x5dc   :  { %v5763_v39 = vadd.f32 %v2673_v61, %v5655_v47  ;;  %v2675_v20 = vpop.f32.mrb[59].mxu1 }
 0x5dd   :  { %v5766_v3 = vadd.f32 %v2675_v20, %v5658_v40  ;;  %v2728_v54 = vadd.f32 %v5760_v12, %v5757_v44 }
 0x5df   :  { %2729 = vadd.xlane.f32.xlu0 %v2728_v54  ;;  %v2731_v56 = vadd.f32 %v5766_v3, %v5763_v39 }
 0x5e1   :  { %v2679_v55 = vpop.f32.mrb[60].mxu1  ;;  %2732 = vadd.xlane.f32.xlu1 %v2731_v56 }
 0x5e2   :  { %v5773_v37 = vadd.f32 %v2679_v55, %v5655_v47  ;;  %v2681_v29 = vpop.f32.mrb[61].mxu1 }
 0x5e3   :  { %v5776_v22 = vadd.f32 %v2681_v29, %v5658_v40  ;;  %v2683_v50 = vpop.f32.mrb[62].mxu1 }
 0x5e4   :  { %v5779_v14 = vadd.f32 %v2683_v50, %v5655_v47  ;;  %v2685_v2 = vpop.f32.mrb[63].mxu1  ;;  %v3957_v47 = vld [vmem:[%s6255_s5] sm:$0xff]  }
 0x5e5   :  { %v5782_v9 = vadd.f32 %v2685_v2, %v5658_v40  ;;  %v2734_v21 = vadd.f32 %v5776_v22, %v5773_v37  ;;  %v3958_v40 = vld [vmem:[%s6255_s5 + $0x48] sm:$0xff]   ;;  %3595 = vmatpush3.bf16.msra.mxu0 %v3957_v47 }
 0x5e6   :  { %3596 = vmatprep.subr.bf16.mxu0 %v3958_v40 }
 0x5e7   :  { %2735 = vadd.xlane.f32.xlu0 %v2734_v21  ;;  %v2737_v53 = vadd.f32 %v5782_v9, %v5779_v14 }
 0x5e9   :  { %2738 = vadd.xlane.f32.xlu1 %v2737_v53  ;;  %3597 = vmatpush3.bf16.msra.mxu0 %v3959_v45 }
 0x5ea   :  { %3598 = vmatprep.subr.bf16.mxu0 %v3960_v1 }
 0x5ed   :  { %3599 = vmatpush3.bf16.msra.mxu0 %v3961_v15 }
 0x5ee   :  { %3600 = vmatprep.subr.bf16.mxu0 %v3962_v18 }
 0x5f1   :  { %3601 = vmatpush3.bf16.msra.mxu0 %v3963_v19 }
 0x5f2   :  { %3602 = vmatprep.subr.bf16.mxu0 %v3964_v36 }
 0x5f5   :  { %3603 = vmatpush3.bf16.msra.mxu0 %v3965_v35 }
 0x63c   :  { %v2694_v33 = vpop.xlane.xlu0 %2693 }
 0x63d   :  { %v2740_v25 = vmul.f32 0.00390625, %v2694_v33 }
 0x63e   :  { %v2697_v8 = vpop.xlane.xlu1 %2696 }
 0x63f   :  { %v5819_v11 = vsub.f32 %v5661_v6, %v2740_v25  ;;  %v5822_v27 = vsub.f32 %v5664_v28, %v2740_v25  ;;  %v2741_v13 = vmul.f32 0.00390625, %v2697_v8 }
 0x641   :  { %v5825_v32 = vsub.f32 %v5667_v0, %v2741_v13  ;;  %v5828_v63 = vsub.f32 %v5670_v38, %v2741_v13  ;;  %v2788_v23 = vmul.f32 %v5819_v11, %v5819_v11  ;;  %v2789_v17 = vmul.f32 %v5822_v27, %v5822_v27 }
 0x643   :  { %v2820_v61 = vadd.f32 %v2789_v17, %v2788_v23  ;;  %v2790_v6 = vmul.f32 %v5825_v32, %v5825_v32  ;;  %v2791_v28 = vmul.f32 %v5828_v63, %v5828_v63 }
 0x644   :  { %v2700_v20 = vpop.xlane.xlu0 %2699 }
 0x645   :  { %v2742_v54 = vmul.f32 0.00390625, %v2700_v20  ;;  %2821 = vadd.xlane.f32.xlu0 %v2820_v61  ;;  %v2823_v0 = vadd.f32 %v2791_v28, %v2790_v6 }
 0x646   :  { %v2703_v56 = vpop.xlane.xlu1 %2702 }
 0x647   :  { %v5839_v38 = vsub.f32 %v5677_v31, %v2742_v54  ;;  %v5842_v55 = vsub.f32 %v5680_v48, %v2742_v54  ;;  %v2743_v29 = vmul.f32 0.00390625, %v2703_v56  ;;  %2824 = vadd.xlane.f32.xlu1 %v2823_v0 }
 0x649   :  { %v5845_v50 = vsub.f32 %v5683_v46, %v2743_v29  ;;  %v5848_v2 = vsub.f32 %v5686_v60, %v2743_v29  ;;  %v2792_v21 = vmul.f32 %v5839_v38, %v5839_v38  ;;  %v2793_v53 = vmul.f32 %v5842_v55, %v5842_v55 }
 0x64b   :  { %v2826_v26 = vadd.f32 %v2793_v53, %v2792_v21  ;;  %v2794_v31 = vmul.f32 %v5845_v50, %v5845_v50  ;;  %v2795_v48 = vmul.f32 %v5848_v2, %v5848_v2 }
 0x64c   :  { %v2706_v47 = vpop.xlane.xlu0 %2705 }
 0x64d   :  { %v2744_v40 = vmul.f32 0.00390625, %v2706_v47  ;;  %2827 = vadd.xlane.f32.xlu0 %v2826_v26  ;;  %v2829_v46 = vadd.f32 %v2795_v48, %v2794_v31 }
 0x64e   :  { %v2709_v45 = vpop.xlane.xlu1 %2708 }
 0x64f   :  { %v5859_v60 = vsub.f32 %v5693_v51, %v2744_v40  ;;  %v5862_v1 = vsub.f32 %v5696_v24, %v2744_v40  ;;  %v2745_v15 = vmul.f32 0.00390625, %v2709_v45  ;;  %2830 = vadd.xlane.f32.xlu1 %v2829_v46 }
 0x651   :  { %v5865_v18 = vsub.f32 %v5699_v10, %v2745_v15  ;;  %v5868_v19 = vsub.f32 %v5702_v57, %v2745_v15  ;;  %v2796_v36 = vmul.f32 %v5859_v60, %v5859_v60  ;;  %v2797_v35 = vmul.f32 %v5862_v1, %v5862_v1 }
 0x653   :  { %v2832_v33 = vadd.f32 %v2797_v35, %v2796_v36  ;;  %v2798_v51 = vmul.f32 %v5865_v18, %v5865_v18  ;;  %v2799_v24 = vmul.f32 %v5868_v19, %v5868_v19  ;;  %v3967_v36 = vld [vmem:[%s6255_s5 + $0x28] sm:$0xff]   ;;  %v3968_v35 = vld [vmem:[%s6255_s5 + $0x70] sm:$0xff]  }
 0x654   :  { %v2712_v25 = vpop.xlane.xlu0 %2711 }
 0x655   :  { %v2746_v8 = vmul.f32 0.00390625, %v2712_v25  ;;  %2833 = vadd.xlane.f32.xlu0 %v2832_v33  ;;  %v2835_v10 = vadd.f32 %v2799_v24, %v2798_v51 }
 0x656   :  { %v2715_v13 = vpop.xlane.xlu1 %2714 }
 0x657   :  { %v5879_v57 = vsub.f32 %v5709_v34, %v2746_v8  ;;  %v5882_v23 = vsub.f32 %v5712_v52, %v2746_v8  ;;  %v2747_v17 = vmul.f32 0.00390625, %v2715_v13  ;;  %2836 = vadd.xlane.f32.xlu1 %v2835_v10 }
 0x659   :  { %v5885_v61 = vsub.f32 %v5715_v7, %v2747_v17  ;;  %v5888_v6 = vsub.f32 %v5718_v49, %v2747_v17  ;;  %v2800_v28 = vmul.f32 %v5879_v57, %v5879_v57  ;;  %v2801_v20 = vmul.f32 %v5882_v23, %v5882_v23 }
 0x65b   :  { %v2838_v54 = vadd.f32 %v2801_v20, %v2800_v28  ;;  %v2802_v34 = vmul.f32 %v5885_v61, %v5885_v61  ;;  %v2803_v52 = vmul.f32 %v5888_v6, %v5888_v6 }
 0x65c   :  { %v2718_v0 = vpop.xlane.xlu0 %2717 }
 0x65d   :  { %v2748_v56 = vmul.f32 0.00390625, %v2718_v0  ;;  %2839 = vadd.xlane.f32.xlu0 %v2838_v54  ;;  %v2841_v7 = vadd.f32 %v2803_v52, %v2802_v34  ;;  %v3971_v34 = vld [vmem:[%s6255_s5 + $0x38] sm:$0xff]  }
 0x65e   :  { %v2721_v29 = vpop.xlane.xlu1 %2720 }
 0x65f   :  { %v5899_v49 = vsub.f32 %v5725_v5, %v2748_v56  ;;  %v5902_v21 = vsub.f32 %v5728_v30, %v2748_v56  ;;  %v2749_v53 = vmul.f32 0.00390625, %v2721_v29  ;;  %2842 = vadd.xlane.f32.xlu1 %v2841_v7 }
 0x661   :  { %v5905_v26 = vsub.f32 %v5731_v43, %v2749_v53  ;;  %v5908_v31 = vsub.f32 %v5734_v59, %v2749_v53  ;;  %v2804_v48 = vmul.f32 %v5899_v49, %v5899_v49  ;;  %v2805_v47 = vmul.f32 %v5902_v21, %v5902_v21  ;;  %v3966_v59 = vld [vmem:[%s6255_s5 + $0x68] sm:$0xff]  }
 0x662   :  { %3604 = vmatprep.subr.bf16.mxu0 %v3966_v59 }
 0x663   :  { %v2844_v40 = vadd.f32 %v2805_v47, %v2804_v48  ;;  %v2806_v5 = vmul.f32 %v5905_v26, %v5905_v26  ;;  %v2807_v30 = vmul.f32 %v5908_v31, %v5908_v31  ;;  %3605 = vmatpush3.bf16.msra.mxu0 %v3967_v36 }
 0x664   :  { %v2724_v46 = vpop.xlane.xlu0 %2723  ;;  %3606 = vmatprep.subr.bf16.mxu0 %v3968_v35 }
 0x665   :  { %v2750_v45 = vmul.f32 0.00390625, %v2724_v46  ;;  %2845 = vadd.xlane.f32.xlu0 %v2844_v40  ;;  %v2847_v43 = vadd.f32 %v2807_v30, %v2806_v5 }
 0x666   :  { %v2727_v15 = vpop.xlane.xlu1 %2726 }
 0x667   :  { %v5928_v33 = vsub.f32 %v5741_v62, %v2750_v45  ;;  %v5931_v51 = vsub.f32 %v5744_v42, %v2750_v45  ;;  %v2751_v24 = vmul.f32 0.00390625, %v2727_v15  ;;  %2848 = vadd.xlane.f32.xlu1 %v2847_v43  ;;  %v3969_v62 = vld [vmem:[%s6255_s5 + $0x30] sm:$0xff]   ;;  %v3970_v42 = vld [vmem:[%s6255_s5 + $0x78] sm:$0xff]  }
 0x668   :  { %3607 = vmatpush3.bf16.msra.mxu0 %v3969_v62 }
 0x669   :  { %v5934_v25 = vsub.f32 %v5747_v58, %v2751_v24  ;;  %v5937_v8 = vsub.f32 %v5750_v4, %v2751_v24  ;;  %v2808_v10 = vmul.f32 %v5928_v33, %v5928_v33  ;;  %v2809_v13 = vmul.f32 %v5931_v51, %v5931_v51  ;;  %3608 = vmatprep.subr.bf16.mxu0 %v3970_v42 }
 0x66b   :  { %v2850_v58 = vadd.f32 %v2809_v13, %v2808_v10  ;;  %v2810_v4 = vmul.f32 %v5934_v25, %v5934_v25  ;;  %v2811_v17 = vmul.f32 %v5937_v8, %v5937_v8 }
 0x66c   :  { %v2730_v28 = vpop.xlane.xlu0 %2729  ;;  %3609 = vmatpush3.bf16.msra.mxu0 %v3971_v34 }
 0x66d   :  { %v2752_v20 = vmul.f32 0.00390625, %v2730_v28  ;;  %2851 = vadd.xlane.f32.xlu0 %v2850_v58  ;;  %v2853_v54 = vadd.f32 %v2811_v17, %v2810_v4 }
 0x66e   :  { %v2733_v52 = vpop.xlane.xlu1 %2732 }
 0x66f   :  { %v5957_v0 = vsub.f32 %v5757_v44, %v2752_v20  ;;  %v5960_v56 = vsub.f32 %v5760_v12, %v2752_v20  ;;  %v2753_v7 = vmul.f32 0.00390625, %v2733_v52  ;;  %2854 = vadd.xlane.f32.xlu1 %v2853_v54  ;;  %v2689_v20 = vld [vmem:[#allocation2 + $0x7] ss:$8 sm:$0x3] }
 0x671   :  { %v5963_v29 = vsub.f32 %v5763_v39, %v2753_v7  ;;  %v5966_v53 = vsub.f32 %v5766_v3, %v2753_v7  ;;  %v2812_v48 = vmul.f32 %v5957_v0, %v5957_v0  ;;  %v2813_v47 = vmul.f32 %v5960_v56, %v5960_v56  ;;  %v2691_v7 = vld [vmem:[#allocation2 + $0x20] ss:$8 sm:$0x3] }
 0x673   :  { %v2856_v44 = vadd.f32 %v2813_v47, %v2812_v48  ;;  %v2814_v12 = vmul.f32 %v5963_v29, %v5963_v29  ;;  %v2815_v40 = vmul.f32 %v5966_v53, %v5966_v53  ;;  %v5997_v48 = vrot.slane %v2689_v20, %v6401_v41 }
 0x674   :  { %v2736_v5 = vpop.xlane.xlu0 %2735  ;;  %v6000_v47 = vrot.slane %v2689_v20, %v6402_v16 }
 0x675   :  { %v2754_v39 = vmul.f32 0.00390625, %v2736_v5  ;;  %2857 = vadd.xlane.f32.xlu0 %v2856_v44  ;;  %v2859_v30 = vadd.f32 %v2815_v40, %v2814_v12 }
 0x676   :  { %v2739_v3 = vpop.xlane.xlu1 %2738 }
 0x677   :  { %v5977_v46 = vsub.f32 %v5773_v37, %v2754_v39  ;;  %v5980_v45 = vsub.f32 %v5776_v22, %v2754_v39  ;;  %v2755_v43 = vmul.f32 0.00390625, %v2739_v3  ;;  %2860 = vadd.xlane.f32.xlu1 %v2859_v30  ;;  %v6005_v39 = vrot.slane %v2691_v7, %v6401_v41 }
 0x678   :  { %v6008_v30 = vrot.slane %v2691_v7, %v6402_v16 }
 0x679   :  { %v5983_v15 = vsub.f32 %v5779_v14, %v2755_v43  ;;  %v5986_v59 = vsub.f32 %v5782_v9, %v2755_v43  ;;  %v2816_v36 = vmul.f32 %v5977_v46, %v5977_v46  ;;  %v2817_v35 = vmul.f32 %v5980_v45, %v5980_v45 }
 0x67b   :  { %v2862_v24 = vadd.f32 %v2817_v35, %v2816_v36  ;;  %v2818_v37 = vmul.f32 %v5983_v15, %v5983_v15  ;;  %v2819_v22 = vmul.f32 %v5986_v59, %v5986_v59 }
 0x67d   :  { %2863 = vadd.xlane.f32.xlu0 %v2862_v24  ;;  %v2865_v10 = vadd.f32 %v2819_v22, %v2818_v37 }
 0x67f   :  { %2866 = vadd.xlane.f32.xlu1 %v2865_v10 }
 0x6d2   :  { %v2822_v14 = vpop.xlane.xlu0 %2821 }
 0x6d3   :  { %v2868_v13 = vmul.f32 0.00390625, %v2822_v14 }
 0x6d4   :  { %v2825_v9 = vpop.xlane.xlu1 %2824 }
 0x6d5   :  { %v2884_v62 = vadd.f32 1e-05, %v2868_v13  ;;  %v2869_v42 = vmul.f32 0.00390625, %v2825_v9 }
 0x6d7   :  { %4036 = vrsqrt.f32 %v2884_v62  ;;  %v2885_v58 = vadd.f32 1e-05, %v2869_v42 }
 0x6d9   :  { %4038 = vrsqrt.f32 %v2885_v58 }
 0x6da   :  { %v2828_v4 = vpop.xlane.xlu0 %2827 }
 0x6db   :  { %v2870_v17 = vmul.f32 0.00390625, %v2828_v4 }
 0x6dc   :  { %v2831_v28 = vpop.xlane.xlu1 %2830 }
 0x6dd   :  { %v2886_v54 = vadd.f32 1e-05, %v2870_v17  ;;  %v2871_v34 = vmul.f32 0.00390625, %v2831_v28 }
 0x6df   :  { %4040 = vrsqrt.f32 %v2886_v54  ;;  %v2887_v52 = vadd.f32 1e-05, %v2871_v34 }
 0x6e1   :  { %v4037_v44 = vpop.eup %4036  ;;  %4042 = vrsqrt.f32 %v2887_v52 }
 0x6e2   :  { %v2916_v12 = vmul.f32 %v4037_v44, %v5819_v11  ;;  %v2834_v40 = vpop.xlane.xlu0 %2833  ;;  %v2917_v5 = vmul.f32 %v4037_v44, %v5822_v27 }
 0x6e3   :  { %v4039_v3 = vpop.eup %4038  ;;  %v2872_v43 = vmul.f32 0.00390625, %v2834_v40 }
 0x6e4   :  { %v2959_v36 = vmul.f32 %v5997_v48, %v2916_v12  ;;  %v2918_v35 = vmul.f32 %v4039_v3, %v5825_v32  ;;  %v2837_v24 = vpop.xlane.xlu1 %2836  ;;  %v2919_v37 = vmul.f32 %v4039_v3, %v5828_v63  ;;  %v2960_v11 = vmul.f32 %v6000_v47, %v2917_v5 }
 0x6e5   :  { %v2888_v22 = vadd.f32 1e-05, %v2872_v43  ;;  %v2873_v10 = vmul.f32 0.00390625, %v2837_v24 }
 0x6e6   :  { %v2961_v27 = vmul.f32 %v5997_v48, %v2918_v35  ;;  %v2962_v41 = vmul.f32 %v6000_v47, %v2919_v37  ;;  %v3003_v16 = vadd.f32 %v6008_v30, %v2960_v11  ;;  %v3002_v14 = vadd.f32 %v6005_v39, %v2959_v36 }
 0x6e7   :  { %4044 = vrsqrt.f32 %v2888_v22  ;;  %v2889_v13 = vadd.f32 1e-05, %v2873_v10 }
 0x6e8   :  { %v3005_v9 = vadd.f32 %v6008_v30, %v2962_v41  ;;  %v3004_v32 = vadd.f32 %v6005_v39, %v2961_v27  ;;  %v3035_v63 = vmax.f32 %v3003_v16, 0.0  ;;  %v3034_v42 = vmax.f32 %v3002_v14, 0.0 }
 0x6e9   :  { %v4041_v62 = vpop.eup %4040  ;;  %4046 = vrsqrt.f32 %v2889_v13 }
 0x6ea   :  { %v2840_v58 = vpop.xlane.xlu0 %2839  ;;  %v3037_v4 = vmax.f32 %v3005_v9, 0.0  ;;  %v3036_v17 = vmax.f32 %v3004_v32, 0.0  ;;  %v2921_v28 = vmul.f32 %v4041_v62, %v5842_v55  ;;  %v2920_v20 = vmul.f32 %v4041_v62, %v5839_v38 }
 0x6eb   :  { %v4043_v54 = vpop.eup %4042  ;;  %v2874_v34 = vmul.f32 0.00390625, %v2840_v58 }
 0x6ec   :  { %v2843_v52 = vpop.xlane.xlu1 %2842  ;;  %v3067_v7 = vpack.c.bf16 %v3037_v4, %v3035_v63  ;;  %v3066_v44 = vpack.c.bf16 %v3036_v17, %v3034_v42  ;;  %v2923_v12 = vmul.f32 %v4043_v54, %v5848_v2  ;;  %v2964_v40 = vmul.f32 %v6000_v47, %v2921_v28 }
 0x6ed   :  { %v2890_v5 = vadd.f32 1e-05, %v2874_v34  ;;  %v2875_v3 = vmul.f32 0.00390625, %v2843_v52  ;;  %v2922_v43 = vmul.f32 %v4043_v54, %v5845_v50  ;;  %v2963_v36 = vmul.f32 %v5997_v48, %v2920_v20 }
 0x6ee   :  { %3243 = vmatprep.mubr.bf16.mxu0 %v3067_v7  ;;  %v2966_v55 = vmul.f32 %v6000_v47, %v2923_v12  ;;  %v3007_v38 = vadd.f32 %v6008_v30, %v2964_v40 }
 0x6ef   :  { %4048 = vrsqrt.f32 %v2890_v5  ;;  %v2891_v35 = vadd.f32 1e-05, %v2875_v3  ;;  %3244 = vmatmul.mubr.bf16.vlgmr.msra.gmra.mrb[64].mxu0 %v3066_v44  ;;  %v2965_v24 = vmul.f32 %v5997_v48, %v2922_v43  ;;  %v3006_v2 = vadd.f32 %v6005_v39, %v2963_v36 }
 0x6f0   :  { %v3009_v37 = vadd.f32 %v6008_v30, %v2966_v55  ;;  %v3039_v10 = vmax.f32 %v3007_v38, 0.0 }
 0x6f1   :  { %v4045_v11 = vpop.eup %4044  ;;  %4050 = vrsqrt.f32 %v2891_v35  ;;  %v3008_v50 = vadd.f32 %v6005_v39, %v2965_v24  ;;  %v3038_v9 = vmax.f32 %v3006_v2, 0.0 }
 0x6f2   :  { %v2846_v22 = vpop.xlane.xlu0 %2845  ;;  %v3041_v27 = vmax.f32 %v3009_v37, 0.0  ;;  %v2925_v41 = vmul.f32 %v4045_v11, %v5862_v1  ;;  %v2924_v16 = vmul.f32 %v4045_v11, %v5859_v60 }
 0x6f3   :  { %v4047_v14 = vpop.eup %4046  ;;  %v2876_v13 = vmul.f32 0.00390625, %v2846_v22  ;;  %v3040_v32 = vmax.f32 %v3008_v50, 0.0 }
 0x6f4   :  { %v2849_v62 = vpop.xlane.xlu1 %2848  ;;  %v3069_v63 = vpack.c.bf16 %v3041_v27, %v3039_v10  ;;  %v2927_v42 = vmul.f32 %v4047_v14, %v5868_v19  ;;  %v2968_v58 = vmul.f32 %v6000_v47, %v2925_v41  ;;  %v2926_v4 = vmul.f32 %v4047_v14, %v5865_v18 }
 0x6f5   :  { %v2892_v17 = vadd.f32 1e-05, %v2876_v13  ;;  %v2877_v28 = vmul.f32 0.00390625, %v2849_v62  ;;  %v3068_v20 = vpack.c.bf16 %v3040_v32, %v3038_v9  ;;  %v2967_v54 = vmul.f32 %v5997_v48, %v2924_v16 }
 0x6f6   :  { %3251 = vmatprep.mubr.bf16.mxu0 %v3069_v63  ;;  %v2970_v60 = vmul.f32 %v6000_v47, %v2927_v42  ;;  %v3011_v1 = vadd.f32 %v6008_v30, %v2968_v58  ;;  %v2969_v34 = vmul.f32 %v5997_v48, %v2926_v4 }
 0x6f7   :  { %4052 = vrsqrt.f32 %v2892_v17  ;;  %v2893_v52 = vadd.f32 1e-05, %v2877_v28  ;;  %3252 = vmatmul.mubr.bf16.gmra.mrb[68].mxu0 %v3068_v20  ;;  %v3010_v19 = vadd.f32 %v6005_v39, %v2967_v54 }
 0x6f8   :  { %v3013_v7 = vadd.f32 %v6008_v30, %v2970_v60  ;;  %v3012_v18 = vadd.f32 %v6005_v39, %v2969_v34  ;;  %v3043_v12 = vmax.f32 %v3011_v1, 0.0 }
 0x6f9   :  { %v4049_v44 = vpop.eup %4048  ;;  %4054 = vrsqrt.f32 %v2893_v52  ;;  %v3042_v40 = vmax.f32 %v3010_v19, 0.0 }
 0x6fa   :  { %v2852_v5 = vpop.xlane.xlu0 %2851  ;;  %v3045_v3 = vmax.f32 %v3013_v7, 0.0  ;;  %v3044_v43 = vmax.f32 %v3012_v18, 0.0  ;;  %v2929_v36 = vmul.f32 %v4049_v44, %v5882_v23  ;;  %v2928_v55 = vmul.f32 %v4049_v44, %v5879_v57 }
 0x6fb   :  { %v4051_v38 = vpop.eup %4050  ;;  %v2878_v35 = vmul.f32 0.00390625, %v2852_v5 }
 0x6fc   :  { %v2855_v24 = vpop.xlane.xlu1 %2854  ;;  %v3071_v2 = vpack.c.bf16 %v3045_v3, %v3043_v12  ;;  %v3070_v37 = vpack.c.bf16 %v3044_v43, %v3042_v40  ;;  %v2931_v11 = vmul.f32 %v4051_v38, %v5888_v6  ;;  %v2972_v50 = vmul.f32 %v6000_v47, %v2929_v36 }
 0x6fd   :  { %v2894_v22 = vadd.f32 1e-05, %v2878_v35  ;;  %v2879_v10 = vmul.f32 0.00390625, %v2855_v24  ;;  %v2930_v27 = vmul.f32 %v4051_v38, %v5885_v61  ;;  %v2971_v41 = vmul.f32 %v5997_v48, %v2928_v55 }
 0x6fe   :  { %3259 = vmatprep.mubr.bf16.mxu0 %v3071_v2  ;;  %v2974_v23 = vmul.f32 %v6000_v47, %v2931_v11  ;;  %v3015_v57 = vadd.f32 %v6008_v30, %v2972_v50 }
 0x6ff   :  { %4056 = vrsqrt.f32 %v2894_v22  ;;  %v2895_v16 = vadd.f32 1e-05, %v2879_v10  ;;  %3260 = vmatmul.mubr.bf16.gmra.mrb[72].mxu0 %v3070_v37  ;;  %v2973_v14 = vmul.f32 %v5997_v48, %v2930_v27  ;;  %v3014_v6 = vadd.f32 %v6005_v39, %v2971_v41 }
 0x700   :  { %v3017_v13 = vadd.f32 %v6008_v30, %v2974_v23  ;;  %v3047_v62 = vmax.f32 %v3015_v57, 0.0 }
 0x701   :  { %v4053_v9 = vpop.eup %4052  ;;  %4058 = vrsqrt.f32 %v2895_v16  ;;  %v3016_v61 = vadd.f32 %v6005_v39, %v2973_v14  ;;  %v3046_v28 = vmax.f32 %v3014_v6, 0.0 }
 0x702   :  { %v2858_v32 = vpop.xlane.xlu0 %2857  ;;  %v3049_v63 = vmax.f32 %v3017_v13, 0.0  ;;  %v2933_v42 = vmul.f32 %v4053_v9, %v5902_v21  ;;  %v2932_v58 = vmul.f32 %v4053_v9, %v5899_v49 }
 0x703   :  { %v4055_v4 = vpop.eup %4054  ;;  %v2880_v17 = vmul.f32 0.00390625, %v2858_v32  ;;  %v3048_v20 = vmax.f32 %v3016_v61, 0.0 }
 0x704   :  { %v2861_v54 = vpop.xlane.xlu1 %2860  ;;  %v3073_v60 = vpack.c.bf16 %v3049_v63, %v3047_v62  ;;  %v2935_v1 = vmul.f32 %v4055_v4, %v5908_v31  ;;  %v2976_v34 = vmul.f32 %v6000_v47, %v2933_v42  ;;  %v2934_v52 = vmul.f32 %v4055_v4, %v5905_v26 }
 0x705   :  { %v2896_v19 = vadd.f32 1e-05, %v2880_v17  ;;  %v2881_v7 = vmul.f32 0.00390625, %v2861_v54  ;;  %v3072_v18 = vpack.c.bf16 %v3048_v20, %v3046_v28  ;;  %v2975_v44 = vmul.f32 %v5997_v48, %v2932_v58 }
 0x706   :  { %3267 = vmatprep.mubr.bf16.mxu0 %v3073_v60  ;;  %v2978_v49 = vmul.f32 %v6000_v47, %v2935_v1  ;;  %v3019_v21 = vadd.f32 %v6008_v30, %v2976_v34  ;;  %v2977_v12 = vmul.f32 %v5997_v48, %v2934_v52 }
 0x707   :  { %4060 = vrsqrt.f32 %v2896_v19  ;;  %v2897_v40 = vadd.f32 1e-05, %v2881_v7  ;;  %3268 = vmatmul.mubr.bf16.gmra.mrb[76].mxu0 %v3072_v18  ;;  %v3018_v31 = vadd.f32 %v6005_v39, %v2975_v44 }
 0x708   :  { %v3021_v5 = vadd.f32 %v6008_v30, %v2978_v49  ;;  %v3020_v26 = vadd.f32 %v6005_v39, %v2977_v12  ;;  %v3051_v43 = vmax.f32 %v3019_v21, 0.0 }
 0x709   :  { %v4057_v3 = vpop.eup %4056  ;;  %4062 = vrsqrt.f32 %v2897_v40  ;;  %v3050_v36 = vmax.f32 %v3018_v31, 0.0 }
 0x70a   :  { %v2864_v55 = vpop.xlane.xlu0 %2863  ;;  %v3053_v38 = vmax.f32 %v3021_v5, 0.0  ;;  %v3052_v35 = vmax.f32 %v3020_v26, 0.0  ;;  %v2937_v24 = vmul.f32 %v4057_v3, %v5931_v51  ;;  %v2936_v2 = vmul.f32 %v4057_v3, %v5928_v33 }
 0x70b   :  { %v4059_v37 = vpop.eup %4058  ;;  %v2882_v11 = vmul.f32 0.00390625, %v2864_v55 }
 0x70c   :  { %v2867_v50 = vpop.xlane.xlu1 %2866  ;;  %v3075_v22 = vpack.c.bf16 %v3053_v38, %v3051_v43  ;;  %v3074_v10 = vpack.c.bf16 %v3052_v35, %v3050_v36  ;;  %v2939_v27 = vmul.f32 %v4059_v37, %v5937_v8  ;;  %v2980_v41 = vmul.f32 %v6000_v47, %v2937_v24 }
 0x70d   :  { %v2898_v23 = vadd.f32 1e-05, %v2882_v11  ;;  %v2883_v57 = vmul.f32 0.00390625, %v2867_v50  ;;  %v2938_v16 = vmul.f32 %v4059_v37, %v5934_v25  ;;  %v2979_v14 = vmul.f32 %v5997_v48, %v2936_v2 }
 0x70e   :  { %3275 = vmatprep.mubr.bf16.mxu0 %v3075_v22  ;;  %v2982_v51 = vmul.f32 %v6000_v47, %v2939_v27  ;;  %v3023_v33 = vadd.f32 %v6008_v30, %v2980_v41 }
 0x70f   :  { %4064 = vrsqrt.f32 %v2898_v23  ;;  %v2899_v6 = vadd.f32 1e-05, %v2883_v57  ;;  %3276 = vmatmul.mubr.bf16.gmra.mrb[80].mxu0 %v3074_v10  ;;  %v2981_v13 = vmul.f32 %v5997_v48, %v2938_v16  ;;  %v3022_v8 = vadd.f32 %v6005_v39, %v2979_v14  ;;  %v6104_v10 = vld [vmem:[#allocation2 + $0x21] ss:$0 sm:$0xff] }
 0x710   :  { %v3025_v9 = vadd.f32 %v6008_v30, %v2982_v51  ;;  %v3055_v32 = vmax.f32 %v3023_v33, 0.0 }
 0x711   :  { %v4061_v61 = vpop.eup %4060  ;;  %4066 = vrsqrt.f32 %v2899_v6  ;;  %v3024_v25 = vadd.f32 %v6005_v39, %v2981_v13  ;;  %v3054_v4 = vmax.f32 %v3022_v8, 0.0 }
 0x712   :  { %v3057_v62 = vmax.f32 %v3025_v9, 0.0  ;;  %v2941_v63 = vmul.f32 %v4061_v61, %v5960_v56  ;;  %v2940_v42 = vmul.f32 %v4061_v61, %v5957_v0 }
 0x713   :  { %v4063_v58 = vpop.eup %4062  ;;  %v3056_v17 = vmax.f32 %v3024_v25, 0.0 }
 0x714   :  { %v3077_v28 = vpack.c.bf16 %v3057_v62, %v3055_v32  ;;  %v2943_v20 = vmul.f32 %v4063_v58, %v5966_v53  ;;  %v2984_v54 = vmul.f32 %v6000_v47, %v2941_v63  ;;  %v2942_v60 = vmul.f32 %v4063_v58, %v5963_v29 }
 0x715   :  { %v3076_v1 = vpack.c.bf16 %v3056_v17, %v3054_v4  ;;  %v2983_v34 = vmul.f32 %v5997_v48, %v2940_v42 }
 0x716   :  { %3283 = vmatprep.mubr.bf16.mxu0 %v3077_v28  ;;  %v2986_v52 = vmul.f32 %v6000_v47, %v2943_v20  ;;  %v3027_v56 = vadd.f32 %v6008_v30, %v2984_v54  ;;  %v2985_v0 = vmul.f32 %v5997_v48, %v2942_v60 }
 0x717   :  { %3284 = vmatmul.mubr.bf16.gmra.mrb[84].mxu0 %v3076_v1  ;;  %v3026_v19 = vadd.f32 %v6005_v39, %v2983_v34 }
 0x718   :  { %v3029_v7 = vadd.f32 %v6008_v30, %v2986_v52  ;;  %v3028_v53 = vadd.f32 %v6005_v39, %v2985_v0  ;;  %v3059_v44 = vmax.f32 %v3027_v56, 0.0 }
 0x719   :  { %v4065_v18 = vpop.eup %4064  ;;  %v3058_v29 = vmax.f32 %v3026_v19, 0.0 }
 0x71a   :  { %v3061_v49 = vmax.f32 %v3029_v7, 0.0  ;;  %v3060_v21 = vmax.f32 %v3028_v53, 0.0  ;;  %v2945_v12 = vmul.f32 %v4065_v18, %v5980_v45  ;;  %v2944_v40 = vmul.f32 %v4065_v18, %v5977_v46 }
 0x71b   :  { %v4067_v31 = vpop.eup %4066 }
 0x71c   :  { %v3079_v5 = vpack.c.bf16 %v3061_v49, %v3059_v44  ;;  %v3078_v26 = vpack.c.bf16 %v3060_v21, %v3058_v29  ;;  %v2947_v3 = vmul.f32 %v4067_v31, %v5986_v59  ;;  %v2988_v43 = vmul.f32 %v6000_v47, %v2945_v12 }
 0x71d   :  { %v2946_v36 = vmul.f32 %v4067_v31, %v5983_v15  ;;  %v2987_v55 = vmul.f32 %v5997_v48, %v2944_v40 }
 0x71e   :  { %3291 = vmatprep.mubr.bf16.mxu0 %v3079_v5  ;;  %v2990_v38 = vmul.f32 %v6000_v47, %v2947_v3  ;;  %v3031_v35 = vadd.f32 %v6008_v30, %v2988_v43 }
 0x71f   :  { %3292 = vmatmul.mubr.bf16.gmra.mrb[88].mxu0 %v3078_v26  ;;  %v2989_v45 = vmul.f32 %v5997_v48, %v2946_v36  ;;  %v3030_v46 = vadd.f32 %v6005_v39, %v2987_v55 }
 0x720   :  { %v3033_v24 = vadd.f32 %v6008_v30, %v2990_v38  ;;  %v3063_v2 = vmax.f32 %v3031_v35, 0.0 }
 0x721   :  { %v3032_v59 = vadd.f32 %v6005_v39, %v2989_v45  ;;  %v3062_v11 = vmax.f32 %v3030_v46, 0.0 }
 0x722   :  { %v3065_v37 = vmax.f32 %v3033_v24, 0.0 }
 0x723   :  { %v3064_v15 = vmax.f32 %v3032_v59, 0.0 }
 0x724   :  { %v3081_v50 = vpack.c.bf16 %v3065_v37, %v3063_v2 }
 0x725   :  { %v3080_v22 = vpack.c.bf16 %v3064_v15, %v3062_v11 }
 0x726   :  { %3299 = vmatprep.mubr.bf16.mxu0 %v3081_v50 }
 0x727   :  { %3300 = vmatmul.mubr.bf16.gmra.mrb[92].mxu0 %v3080_v22 }
 0x7c2   :  { %v3610_v47 = vpop.f32.mrb[64].mxu0 }
 0x7c3   :  { %v3611_v27 = vpop.f32.mrb[65].mxu0 }
 0x7c4   :  { %v3612_v41 = vadd.f32 %v3611_v27, %v3610_v47  ;;  %v3613_v48 = vpop.f32.mrb[66].mxu0 }
 0x7c5   :  { %v3614_v23 = vpop.f32.mrb[67].mxu0 }
 0x7c6   :  { %v6107_v57 = vadd.f32 %v3612_v41, %v6104_v10  ;;  %v3615_v30 = vadd.f32 %v3614_v23, %v3613_v48 }
 0x7c8   :  { %v6110_v39 = vadd.f32 %v3615_v30, %v6104_v10  ;;  %v3308_v16 = vmul.f32 %v6107_v57, %v6107_v57 }
 0x7ca   :  { %3324 = vadd.xlane.f32.xlu0 %v3308_v16  ;;  %v3616_v14 = vpop.f32.mrb[68].mxu0  ;;  %v3309_v51 = vmul.f32 %v6110_v39, %v6110_v39 }
 0x7cb   :  { %v3617_v33 = vpop.f32.mrb[69].mxu0 }
 0x7cc   :  { %v3618_v6 = vadd.f32 %v3617_v33, %v3616_v14  ;;  %3326 = vadd.xlane.f32.xlu1 %v3309_v51  ;;  %v3619_v13 = vpop.f32.mrb[70].mxu0 }
 0x7cd   :  { %v3620_v8 = vpop.f32.mrb[71].mxu0 }
 0x7ce   :  { %v6117_v9 = vadd.f32 %v3618_v6, %v6104_v10  ;;  %v3621_v61 = vadd.f32 %v3620_v8, %v3619_v13 }
 0x7d0   :  { %v6120_v25 = vadd.f32 %v3621_v61, %v6104_v10  ;;  %v3310_v32 = vmul.f32 %v6117_v9, %v6117_v9 }
 0x7d2   :  { %3328 = vadd.xlane.f32.xlu0 %v3310_v32  ;;  %v3622_v62 = vpop.f32.mrb[72].mxu0  ;;  %v3311_v63 = vmul.f32 %v6120_v25, %v6120_v25 }
 0x7d3   :  { %v3623_v42 = vpop.f32.mrb[73].mxu0 }
 0x7d4   :  { %v3624_v58 = vadd.f32 %v3623_v42, %v3622_v62  ;;  %3330 = vadd.xlane.f32.xlu1 %v3311_v63  ;;  %v3625_v4 = vpop.f32.mrb[74].mxu0 }
 0x7d5   :  { %v3626_v17 = vpop.f32.mrb[75].mxu0 }
 0x7d6   :  { %v6127_v28 = vadd.f32 %v3624_v58, %v6104_v10  ;;  %v3627_v20 = vadd.f32 %v3626_v17, %v3625_v4 }
 0x7d8   :  { %v6130_v54 = vadd.f32 %v3627_v20, %v6104_v10  ;;  %v3312_v60 = vmul.f32 %v6127_v28, %v6127_v28 }
 0x7da   :  { %3332 = vadd.xlane.f32.xlu0 %v3312_v60  ;;  %v3628_v1 = vpop.f32.mrb[76].mxu0  ;;  %v3313_v34 = vmul.f32 %v6130_v54, %v6130_v54 }
 0x7db   :  { %v3629_v52 = vpop.f32.mrb[77].mxu0 }
 0x7dc   :  { %v3630_v56 = vadd.f32 %v3629_v52, %v3628_v1  ;;  %3334 = vadd.xlane.f32.xlu1 %v3313_v34  ;;  %v3631_v0 = vpop.f32.mrb[78].mxu0 }
 0x7dd   :  { %v3632_v19 = vpop.f32.mrb[79].mxu0 }
 0x7de   :  { %v6137_v7 = vadd.f32 %v3630_v56, %v6104_v10  ;;  %v3633_v53 = vadd.f32 %v3632_v19, %v3631_v0 }
 0x7e0   :  { %v6140_v18 = vadd.f32 %v3633_v53, %v6104_v10  ;;  %v3314_v44 = vmul.f32 %v6137_v7, %v6137_v7 }
 0x7e2   :  { %3336 = vadd.xlane.f32.xlu0 %v3314_v44  ;;  %v3634_v29 = vpop.f32.mrb[80].mxu0  ;;  %v3315_v49 = vmul.f32 %v6140_v18, %v6140_v18 }
 0x7e3   :  { %v3635_v21 = vpop.f32.mrb[81].mxu0 }
 0x7e4   :  { %v3636_v12 = vadd.f32 %v3635_v21, %v3634_v29  ;;  %3338 = vadd.xlane.f32.xlu1 %v3315_v49  ;;  %v3637_v40 = vpop.f32.mrb[82].mxu0 }
 0x7e5   :  { %v3638_v31 = vpop.f32.mrb[83].mxu0 }
 0x7e6   :  { %v6147_v5 = vadd.f32 %v3636_v12, %v6104_v10  ;;  %v3639_v26 = vadd.f32 %v3638_v31, %v3637_v40 }
 0x7e8   :  { %v6150_v3 = vadd.f32 %v3639_v26, %v6104_v10  ;;  %v3316_v43 = vmul.f32 %v6147_v5, %v6147_v5 }
 0x7ea   :  { %3340 = vadd.xlane.f32.xlu0 %v3316_v43  ;;  %v3640_v36 = vpop.f32.mrb[84].mxu0  ;;  %v3317_v55 = vmul.f32 %v6150_v3, %v6150_v3 }
 0x7eb   :  { %v3641_v38 = vpop.f32.mrb[85].mxu0 }
 0x7ec   :  { %v3642_v35 = vadd.f32 %v3641_v38, %v3640_v36  ;;  %3342 = vadd.xlane.f32.xlu1 %v3317_v55  ;;  %v3643_v45 = vpop.f32.mrb[86].mxu0 }
 0x7ed   :  { %v3644_v46 = vpop.f32.mrb[87].mxu0 }
 0x7ee   :  { %v6157_v24 = vadd.f32 %v3642_v35, %v6104_v10  ;;  %v3645_v59 = vadd.f32 %v3644_v46, %v3643_v45 }
 0x7f0   :  { %v6160_v2 = vadd.f32 %v3645_v59, %v6104_v10  ;;  %v3318_v37 = vmul.f32 %v6157_v24, %v6157_v24 }
 0x7f2   :  { %3344 = vadd.xlane.f32.xlu0 %v3318_v37  ;;  %v3646_v11 = vpop.f32.mrb[88].mxu0  ;;  %v3319_v15 = vmul.f32 %v6160_v2, %v6160_v2 }
 0x7f3   :  { %v3647_v50 = vpop.f32.mrb[89].mxu0 }
 0x7f4   :  { %v3648_v22 = vadd.f32 %v3647_v50, %v3646_v11  ;;  %3346 = vadd.xlane.f32.xlu1 %v3319_v15  ;;  %v3649_v47 = vpop.f32.mrb[90].mxu0 }
 0x7f5   :  { %v3650_v27 = vpop.f32.mrb[91].mxu0 }
 0x7f6   :  { %v6167_v41 = vadd.f32 %v3648_v22, %v6104_v10  ;;  %v3651_v48 = vadd.f32 %v3650_v27, %v3649_v47 }
 0x7f8   :  { %v6170_v23 = vadd.f32 %v3651_v48, %v6104_v10  ;;  %v3320_v30 = vmul.f32 %v6167_v41, %v6167_v41 }
 0x7fa   :  { %3348 = vadd.xlane.f32.xlu0 %v3320_v30  ;;  %v3652_v16 = vpop.f32.mrb[92].mxu0  ;;  %v3321_v14 = vmul.f32 %v6170_v23, %v6170_v23 }
 0x7fb   :  { %v3653_v51 = vpop.f32.mrb[93].mxu0 }
 0x7fc   :  { %v3654_v33 = vadd.f32 %v3653_v51, %v3652_v16  ;;  %3350 = vadd.xlane.f32.xlu1 %v3321_v14  ;;  %v3655_v6 = vpop.f32.mrb[94].mxu0 }
 0x7fd   :  { %v3656_v13 = vpop.f32.mrb[95].mxu0 }
 0x7fe   :  { %v6177_v8 = vadd.f32 %v3654_v33, %v6104_v10  ;;  %v3657_v61 = vadd.f32 %v3656_v13, %v3655_v6 }
 0x800   :  { %v6180_v32 = vadd.f32 %v3657_v61, %v6104_v10  ;;  %v3322_v62 = vmul.f32 %v6177_v8, %v6177_v8 }
 0x802   :  { %3352 = vadd.xlane.f32.xlu0 %v3322_v62  ;;  %v3323_v63 = vmul.f32 %v6180_v32, %v6180_v32 }
 0x804   :  { %3354 = vadd.xlane.f32.xlu1 %v3323_v63 }
 0x857   :  { %v3325_v42 = vpop.xlane.xlu0 %3324 }
 0x858   :  { %v3356_v58 = vmax.f32 %v3325_v42, 1e-24 }
 0x859   :  { %v3327_v4 = vpop.xlane.xlu1 %3326 }
 0x85a   :  { %4068 = vrsqrt.f32 %v3356_v58  ;;  %v3357_v17 = vmax.f32 %v3327_v4, 1e-24 }
 0x85c   :  { %4070 = vrsqrt.f32 %v3357_v17 }
 0x85f   :  { %v3329_v20 = vpop.xlane.xlu0 %3328 }
 0x860   :  { %v3358_v60 = vmax.f32 %v3329_v20, 1e-24 }
 0x861   :  { %v3331_v1 = vpop.xlane.xlu1 %3330 }
 0x862   :  { %4072 = vrsqrt.f32 %v3358_v60  ;;  %v3359_v10 = vmax.f32 %v3331_v1, 1e-24 }
 0x864   :  { %v4069_v34 = vpop.eup %4068  ;;  %4074 = vrsqrt.f32 %v3359_v10 }
 0x865   :  { %v3388_v52 = vmul.f32 %v4069_v34, %v6107_v57 }
 0x866   :  { %v4071_v56 = vpop.eup %4070 }
 0x867   :  { %3404 = vst [vmem:[%s6256_s6] sm:$0xff] %v3388_v52  ;;  %v3389_v0 = vmul.f32 %v4071_v56, %v6110_v39  ;;  %v3333_v19 = vpop.xlane.xlu0 %3332 }
 0x868   :  { %v3360_v53 = vmax.f32 %v3333_v19, 1e-24 }
 0x869   :  { %3405 = vst [vmem:[%s6256_s6 + $0x8] sm:$0xff] %v3389_v0  ;;  %v3335_v44 = vpop.xlane.xlu1 %3334 }
 0x86a   :  { %4076 = vrsqrt.f32 %v3360_v53  ;;  %v3361_v29 = vmax.f32 %v3335_v44, 1e-24 }
 0x86c   :  { %v4073_v49 = vpop.eup %4072  ;;  %4078 = vrsqrt.f32 %v3361_v29 }
 0x86d   :  { %v3390_v57 = vmul.f32 %v4073_v49, %v6117_v9 }
 0x86e   :  { %v4075_v21 = vpop.eup %4074 }
 0x86f   :  { %3406 = vst [vmem:[%s6256_s6 + $0x10] sm:$0xff] %v3390_v57  ;;  %v3391_v39 = vmul.f32 %v4075_v21, %v6120_v25  ;;  %v3337_v12 = vpop.xlane.xlu0 %3336 }
 0x870   :  { %v3362_v40 = vmax.f32 %v3337_v12, 1e-24 }
 0x871   :  { %3407 = vst [vmem:[%s6256_s6 + $0x18] sm:$0xff] %v3391_v39  ;;  %v3339_v31 = vpop.xlane.xlu1 %3338 }
 0x872   :  { %4080 = vrsqrt.f32 %v3362_v40  ;;  %v3363_v26 = vmax.f32 %v3339_v31, 1e-24 }
 0x874   :  { %v4077_v43 = vpop.eup %4076  ;;  %4082 = vrsqrt.f32 %v3363_v26 }
 0x875   :  { %v3392_v9 = vmul.f32 %v4077_v43, %v6127_v28 }
 0x876   :  { %v4079_v36 = vpop.eup %4078 }
 0x877   :  { %3408 = vst [vmem:[%s6256_s6 + $0x20] sm:$0xff] %v3392_v9  ;;  %v3393_v25 = vmul.f32 %v4079_v36, %v6130_v54  ;;  %v3341_v55 = vpop.xlane.xlu0 %3340 }
 0x878   :  { %v3364_v38 = vmax.f32 %v3341_v55, 1e-24 }
 0x879   :  { %3409 = vst [vmem:[%s6256_s6 + $0x28] sm:$0xff] %v3393_v25  ;;  %v3343_v35 = vpop.xlane.xlu1 %3342 }
 0x87a   :  { %4084 = vrsqrt.f32 %v3364_v38  ;;  %v3365_v45 = vmax.f32 %v3343_v35, 1e-24 }
 0x87c   :  { %v4081_v46 = vpop.eup %4080  ;;  %4086 = vrsqrt.f32 %v3365_v45 }
 0x87d   :  { %v3394_v28 = vmul.f32 %v4081_v46, %v6137_v7 }
 0x87e   :  { %v4083_v59 = vpop.eup %4082 }
 0x87f   :  { %3410 = vst [vmem:[%s6256_s6 + $0x30] sm:$0xff] %v3394_v28  ;;  %v3395_v54 = vmul.f32 %v4083_v59, %v6140_v18  ;;  %v3345_v37 = vpop.xlane.xlu0 %3344 }
 0x880   :  { %v3366_v11 = vmax.f32 %v3345_v37, 1e-24 }
 0x881   :  { %3411 = vst [vmem:[%s6256_s6 + $0x38] sm:$0xff] %v3395_v54  ;;  %v3347_v15 = vpop.xlane.xlu1 %3346 }
 0x882   :  { %4088 = vrsqrt.f32 %v3366_v11  ;;  %v3367_v50 = vmax.f32 %v3347_v15, 1e-24 }
 0x884   :  { %v4085_v22 = vpop.eup %4084  ;;  %4090 = vrsqrt.f32 %v3367_v50 }
 0x885   :  { %v3396_v7 = vmul.f32 %v4085_v22, %v6147_v5 }
 0x886   :  { %v4087_v47 = vpop.eup %4086 }
 0x887   :  { %3412 = vst [vmem:[%s6256_s6 + $0x40] sm:$0xff] %v3396_v7  ;;  %v3397_v18 = vmul.f32 %v4087_v47, %v6150_v3  ;;  %v3349_v27 = vpop.xlane.xlu0 %3348 }
 0x888   :  { %v3368_v48 = vmax.f32 %v3349_v27, 1e-24 }
 0x889   :  { %3413 = vst [vmem:[%s6256_s6 + $0x48] sm:$0xff] %v3397_v18  ;;  %v3351_v30 = vpop.xlane.xlu1 %3350 }
 0x88a   :  { %4092 = vrsqrt.f32 %v3368_v48  ;;  %v3369_v16 = vmax.f32 %v3351_v30, 1e-24 }
 0x88c   :  { %v4089_v14 = vpop.eup %4088  ;;  %4094 = vrsqrt.f32 %v3369_v16 }
 0x88d   :  { %v3398_v5 = vmul.f32 %v4089_v14, %v6157_v24 }
 0x88e   :  { %v4091_v51 = vpop.eup %4090 }
 0x88f   :  { %3414 = vst [vmem:[%s6256_s6 + $0x50] sm:$0xff] %v3398_v5  ;;  %v3399_v3 = vmul.f32 %v4091_v51, %v6160_v2  ;;  %v3353_v33 = vpop.xlane.xlu0 %3352 }
 0x890   :  { %v3370_v6 = vmax.f32 %v3353_v33, 1e-24 }
 0x891   :  { %3415 = vst [vmem:[%s6256_s6 + $0x58] sm:$0xff] %v3399_v3  ;;  %v3355_v13 = vpop.xlane.xlu1 %3354 }
 0x892   :  { %4096 = vrsqrt.f32 %v3370_v6  ;;  %v3371_v61 = vmax.f32 %v3355_v13, 1e-24 }
 0x894   :  { %v4093_v62 = vpop.eup %4092  ;;  %4098 = vrsqrt.f32 %v3371_v61 }
 0x895   :  { %v3400_v24 = vmul.f32 %v4093_v62, %v6167_v41 }
 0x896   :  { %v4095_v63 = vpop.eup %4094 }
 0x897   :  { %3416 = vst [vmem:[%s6256_s6 + $0x60] sm:$0xff] %v3400_v24  ;;  %v3401_v2 = vmul.f32 %v4095_v63, %v6170_v23 }
 0x899   :  { %3417 = vst [vmem:[%s6256_s6 + $0x68] sm:$0xff] %v3401_v2 }
 0x89c   :  { %v4097_v42 = vpop.eup %4096 }
 0x89d   :  { %v3402_v58 = vmul.f32 %v4097_v42, %v6177_v8 }
 0x89e   :  { %v4099_v4 = vpop.eup %4098 }
 0x89f   :  { %3418 = vst [vmem:[%s6256_s6 + $0x70] sm:$0xff] %v3402_v58  ;;  %v3403_v41 = vmul.f32 %v4099_v4, %v6180_v32 }
 0x8a1   :  { %3419 = vst [vmem:[%s6256_s6 + $0x78] sm:$0xff] %v3403_v41 }
 0x8a2   :  { %3424 = vsyncpa [#allocation3], 1 }
 0x8a3   :  { %3425 = vsyncpa [#allocation5], 1 }

</bundles_post_ra>
